<compile_context>
chip_gen: v7x
topology: tpu7x:2x2x1
jax: 0.10.0
libtpu: 0.0.40
codegen_flags: <defaults>
</compile_context>

<pallas_src>
import jax
import jax.numpy as jnp
from jax.experimental import pallas as pl
from jax.experimental.pallas import tpu as pltpu


def _round_up(v, m):
    return (v + m - 1) // m * m


# -----------------------------------------------------------------------------
# Kernel
# -----------------------------------------------------------------------------
def stnkd_kernel(x_ref,                  # (1, TILE_N, k_pad)  bf16
                 w1_ref, c1_ref,         # (k_pad, 64)  bf16, (1, 64)   f32
                 w2_ref, c2_ref,         # (64, 128)    bf16, (1, 128)  f32
                 w3_ref, c3_ref,         # (128, 1024)  bf16, (1, 1024) f32
                 wf1_ref, cf1_ref,       # (1024, 512)  bf16, (1, 512)  f32
                 wf2_ref, cf2_ref,       # (512, 256)   bf16, (1, 256)  f32
                 wf3_ref, bf3_ref,       # (256, kk_pad) bf16, (1, kk_pad) f32 (identity folded in)
                 out_ref,                # (1, 1, kk_pad) f32
                 acc_ref):               # (1, 1024) f32 scratch: per-batch running max
    nt = pl.program_id(1)

    # Initialize the per-batch running max at the first point tile.
    @pl.when(nt == 0)
    def _():
        acc_ref[...] = jnp.full(acc_ref.shape, -jnp.inf, dtype=acc_ref.dtype)

    x = x_ref[0]                                                    # (TILE_N, k_pad) bf16

    # conv1..conv3 (1x1 conv == channel matmul); bf16 MXU inputs, f32 accum.
    # BN scale is pre-folded into the weights, so the epilogue is bias + ReLU.
    h = jnp.dot(x, w1_ref[...], preferred_element_type=jnp.float32)
    h = jnp.maximum(h + c1_ref[...], 0.0)
    h = jnp.dot(h.astype(jnp.bfloat16), w2_ref[...],
                preferred_element_type=jnp.float32)
    h = jnp.maximum(h + c2_ref[...], 0.0)
    h = jnp.dot(h.astype(jnp.bfloat16), w3_ref[...],
                preferred_element_type=jnp.float32)
    h = jnp.maximum(h + c3_ref[...], 0.0)                           # (TILE_N, 1024) f32

    # torch.max(x, 2)[0] as a carried max over point tiles (mostly VPU vmax;
    # only the final in-vreg 8-sublane fold hits the XLU).
    acc_ref[...] = jnp.maximum(acc_ref[...], jnp.max(h, axis=0, keepdims=True))

    # FC head (+ identity, folded into bf3) once per batch, after the last tile.
    @pl.when(nt == pl.num_programs(1) - 1)
    def _():
        pooled = acc_ref[...].astype(jnp.bfloat16)                  # (1, 1024)
        f = jnp.dot(pooled, wf1_ref[...], preferred_element_type=jnp.float32)
        f = jnp.maximum(f + cf1_ref[...], 0.0)
        f = jnp.dot(f.astype(jnp.bfloat16), wf2_ref[...],
                    preferred_element_type=jnp.float32)
        f = jnp.maximum(f + cf2_ref[...], 0.0)
        f = jnp.dot(f.astype(jnp.bfloat16), wf3_ref[...],
                    preferred_element_type=jnp.float32) + bf3_ref[...]
        out_ref[...] = f[None]                                      # (1, 1, kk_pad)


# -----------------------------------------------------------------------------
# Parameter construction / host-side folding
# -----------------------------------------------------------------------------
def _fold_bn(conv_b, gamma, beta, mean, var, eps=1e-5):
    """Fold (conv/linear bias) + eval-mode BatchNorm into per-channel scale/bias."""
    scale = gamma / jnp.sqrt(var + eps)
    bias = (conv_b - mean) * scale + beta
    return scale.reshape(1, -1), bias.reshape(1, -1)


def make_params(key, k):
    """Deterministic synthetic parameters matching STNKd.__init__ shapes (f32).

    Returns (w1, s1, c1, w2, s2, c2, w3, s3, c3,
             wf1, sf1, cf1, wf2, sf2, cf2, wf3, bf3)
    where each w is stored transposed (cin, cout) and (s, c) are the folded
    eval-mode BatchNorm scale/bias (last Linear has no BN).
    """
    dims = [(k, 64), (64, 128), (128, 1024), (1024, 512), (512, 256), (256, k * k)]
    keys = jax.random.split(key, 6 * 6)
    params = []
    ki = 0
    for li, (cin, cout) in enumerate(dims):
        w = 0.05 * jax.random.normal(keys[ki], (cin, cout), jnp.float32); ki += 1
        b = 0.05 * jax.random.normal(keys[ki], (cout,), jnp.float32); ki += 1
        if li < 5:  # conv1-3, fc1-2 have BatchNorm (eval mode, folded)
            gamma = 1.0 + 0.1 * jax.random.normal(keys[ki], (cout,), jnp.float32); ki += 1
            beta = 0.1 * jax.random.normal(keys[ki], (cout,), jnp.float32); ki += 1
            mean = 0.1 * jax.random.normal(keys[ki], (cout,), jnp.float32); ki += 1
            var = 0.9 + 0.1 * jnp.abs(jax.random.normal(keys[ki], (cout,), jnp.float32)); ki += 1
            scale, bias = _fold_bn(b, gamma, beta, mean, var)
            params += [w, scale, bias]
        else:       # final Linear: plain weight + bias
            ki += 4
            params += [w, b.reshape(1, -1)]
    return tuple(params)


def _prepare_weights(params, k, k_pad, kk_pad):
    """Fold BN scale into weights, pad conv1 rows / fc3 cols, cast to bf16."""
    (w1, s1, c1, w2, s2, c2, w3, s3, c3,
     wf1, sf1, cf1, wf2, sf2, cf2, wf3, bf3) = params
    kk = k * k

    w1f = jnp.pad(w1 * s1, ((0, k_pad - k), (0, 0))).astype(jnp.bfloat16)
    w2f = (w2 * s2).astype(jnp.bfloat16)
    w3f = (w3 * s3).astype(jnp.bfloat16)
    wf1f = (wf1 * sf1).astype(jnp.bfloat16)
    wf2f = (wf2 * sf2).astype(jnp.bfloat16)

    # Fold the identity add into the final bias; pad output lanes to kk_pad
    # (zero weight columns) so the final matmul / store are lane-dense.
    bf3_eff = bf3 + jnp.eye(k, dtype=jnp.float32).reshape(1, kk)
    wf3p = jnp.pad(wf3, ((0, 0), (0, kk_pad - kk))).astype(jnp.bfloat16)
    bf3p = jnp.pad(bf3_eff, ((0, 0), (0, kk_pad - kk)))

    return (w1f, c1, w2f, c2, w3f, c3, wf1f, cf1, wf2f, cf2, wf3p, bf3p)


# -----------------------------------------------------------------------------
# Wrapper
# -----------------------------------------------------------------------------
def stnkd_forward(x_bkn, params, *, tile_n=1024):
    """x_bkn: [B, k, N] (PyTorch layout), params from make_params. Returns [B, k, k]."""
    B, k, N = x_bkn.shape
    kk = k * k
    k_pad = _round_up(k, 8)                 # pad the conv1 contraction dim
    kk_pad = _round_up(kk, 128)             # lane-dense output block

    # Pick the tile so replicate-padding waste stays small for non-multiple N.
    max_tile = _round_up(max(min(tile_n, N), 8), 8)
    n_tiles = -(-N // max_tile)
    tile_n = _round_up(-(-N // n_tiles), 8)
    n_pad = tile_n * n_tiles

    # ---- host-side prep ------------------------------------------------------
    x = jnp.transpose(x_bkn, (0, 2, 1)).astype(jnp.float32)          # [B, N, k]
    # replicate-pad points (max over duplicates == max over originals)
    x = jnp.pad(x, ((0, 0), (0, n_pad - N), (0, 0)), mode="edge")
    x = jnp.pad(x, ((0, 0), (0, 0), (0, k_pad - k)))                 # zero channels
    x = x.astype(jnp.bfloat16)

    weights = _prepare_weights(params, k, k_pad, kk_pad)

    # ---- specs ---------------------------------------------------------------
    def resident(a):  # weights: full-array block, constant index -> stays in VMEM
        return pl.BlockSpec(a.shape, lambda b, t, _nd=a.ndim: (0,) * _nd)

    in_specs = [pl.BlockSpec((1, tile_n, k_pad), lambda b, t: (b, t, 0))]
    in_specs += [resident(a) for a in weights]
    out_specs = pl.BlockSpec((1, 1, kk_pad), lambda b, t: (b, 0, 0))

    # ---- explicit VMEM budget --------------------------------------------------
    weight_bytes = sum(int(a.size) * a.dtype.itemsize for a in weights)
    x_tile_bytes = tile_n * k_pad * 2                        # bf16 tile
    act_bytes = tile_n * (64 + 128 + 1024) * 4               # f32 intermediates
    act_bytes += tile_n * (64 + 128) * 2                     # bf16 re-casts
    budget = (2 * weight_bytes + 2 * x_tile_bytes + act_bytes
              + 1024 * 4 + 2 * kk_pad * 4)
    vmem_limit = int(min(max(2 * budget, 32 << 20), 64 << 20))

    out = pl.pallas_call(
        stnkd_kernel,
        out_shape=jax.ShapeDtypeStruct((B, 1, kk_pad), jnp.float32),
        grid_spec=pltpu.PrefetchScalarGridSpec(
            num_scalar_prefetch=0,
            grid=(B, n_tiles),
            in_specs=in_specs,
            out_specs=out_specs,
            scratch_shapes=[pltpu.VMEM((1, 1024), jnp.float32)],
        ),
        compiler_params=pltpu.CompilerParams(
            dimension_semantics=("parallel", "arbitrary"),
            vmem_limit_bytes=vmem_limit,
        ),
    )(x, *weights)
    return out[:, 0, :kk].reshape(B, k, k)


# -----------------------------------------------------------------------------
# Pure-JAX reference (same folded math: bf16 matmul inputs, f32 accumulate)
# -----------------------------------------------------------------------------
def stnkd_reference(x_bkn, params, k):
    kk = k * k
    (w1f, c1, w2f, c2, w3f, c3,
     wf1f, cf1, wf2f, cf2, wf3p, bf3p) = _prepare_weights(params, k, k, kk)
    B, _, N = x_bkn.shape

    def mm(a, w):
        return jnp.dot(a.astype(jnp.bfloat16), w, preferred_element_type=jnp.float32)

    x = jnp.transpose(x_bkn, (0, 2, 1)).reshape(B * N, k)
    h = jnp.maximum(mm(x, w1f) + c1, 0.0)
    h = jnp.maximum(mm(h, w2f) + c2, 0.0)
    h = jnp.maximum(mm(h, w3f) + c3, 0.0)
    pooled = jnp.max(h.reshape(B, N, -1), axis=1)
    f = jnp.maximum(mm(pooled, wf1f) + cf1, 0.0)
    f = jnp.maximum(mm(f, wf2f) + cf2, 0.0)
    f = mm(f, wf3p) + bf3p
    return f.reshape(B, k, k)


if __name__ == "__main__":
    B, k, N = 2, 4, 256          # small shapes; grid = (B=2 batches, point tiles)
    key = jax.random.PRNGKey(0)
    kx, kp = jax.random.split(key)
    x = jax.random.normal(kx, (B, k, N), jnp.float32)   # PyTorch layout [B, k, N]
    params = make_params(kp, k)

    out = stnkd_forward(x, params, tile_n=128)
    out = jax.block_until_ready(out)

    ref = stnkd_reference(x, params, k)
    assert out.shape == (B, k, k)
    assert jnp.allclose(out, ref, atol=1e-2, rtol=1e-2), "mismatch vs reference"
    print("KERNEL_OK")
</pallas_src>

<mosaic_0001>
module attributes {stable_mosaic.version = 11 : i64} {
  func.func @stnkd_kernel(%arg0: i32, %arg1: i32, %arg2: memref<1x128x8xbf16, #tpu.memory_space<vmem>>, %arg3: memref<8x64xbf16, #tpu.memory_space<vmem>>, %arg4: memref<1x64xf32, #tpu.memory_space<vmem>>, %arg5: memref<64x128xbf16, #tpu.memory_space<vmem>>, %arg6: memref<1x128xf32, #tpu.memory_space<vmem>>, %arg7: memref<128x1024xbf16, #tpu.memory_space<vmem>>, %arg8: memref<1x1024xf32, #tpu.memory_space<vmem>>, %arg9: memref<1024x512xbf16, #tpu.memory_space<vmem>>, %arg10: memref<1x512xf32, #tpu.memory_space<vmem>>, %arg11: memref<512x256xbf16, #tpu.memory_space<vmem>>, %arg12: memref<1x256xf32, #tpu.memory_space<vmem>>, %arg13: memref<256x128xbf16, #tpu.memory_space<vmem>>, %arg14: memref<1x128xf32, #tpu.memory_space<vmem>>, %arg15: memref<1x1x128xf32, #tpu.memory_space<vmem>>, %arg16: memref<1x1024xf32, #tpu.memory_space<vmem>>) attributes {dimension_semantics = [#tpu.dimension_semantics<parallel>, #tpu.dimension_semantics<arbitrary>], iteration_bounds = array<i64: 2, 2>, scalar_prefetch = 0 : i64, scratch_operands = 1 : i64, tpu.core_type = #tpu.core_type<tc>, window_params = [{transform_indices = @transform_0, window_bounds = array<i64: 1, 128, 8>}, {pipeline_mode = #tpu.pipeline_mode<synchronous>, transform_indices = @transform_1, window_bounds = array<i64: 8, 64>}, {pipeline_mode = #tpu.pipeline_mode<synchronous>, transform_indices = @transform_2, window_bounds = array<i64: 1, 64>}, {pipeline_mode = #tpu.pipeline_mode<synchronous>, transform_indices = @transform_3, window_bounds = array<i64: 64, 128>}, {pipeline_mode = #tpu.pipeline_mode<synchronous>, transform_indices = @transform_4, window_bounds = array<i64: 1, 128>}, {pipeline_mode = #tpu.pipeline_mode<synchronous>, transform_indices = @transform_5, window_bounds = array<i64: 128, 1024>}, {pipeline_mode = #tpu.pipeline_mode<synchronous>, transform_indices = @transform_6, window_bounds = array<i64: 1, 1024>}, {pipeline_mode = #tpu.pipeline_mode<synchronous>, transform_indices = @transform_7, window_bounds = array<i64: 1024, 512>}, {pipeline_mode = #tpu.pipeline_mode<synchronous>, transform_indices = @transform_8, window_bounds = array<i64: 1, 512>}, {pipeline_mode = #tpu.pipeline_mode<synchronous>, transform_indices = @transform_9, window_bounds = array<i64: 512, 256>}, {pipeline_mode = #tpu.pipeline_mode<synchronous>, transform_indices = @transform_10, window_bounds = array<i64: 1, 256>}, {pipeline_mode = #tpu.pipeline_mode<synchronous>, transform_indices = @transform_11, window_bounds = array<i64: 256, 128>}, {pipeline_mode = #tpu.pipeline_mode<synchronous>, transform_indices = @transform_12, window_bounds = array<i64: 1, 128>}, {transform_indices = @transform_13, window_bounds = array<i64: 1, 1, 128>}]} {
    %c0_i32 = arith.constant 0 : i32
    %0 = arith.cmpi eq, %arg1, %c0_i32 : i32
    %1 = arith.extui %0 : i1 to i32
    %c0_i32_0 = arith.constant 0 : i32
    %2 = arith.cmpi ne, %1, %c0_i32_0 : i32
    scf.if %2 {
      %cst_26 = arith.constant 0xFF800000 : f32
      %36 = vector.broadcast %cst_26 : f32 to vector<1x1024xf32>
      %c0_27 = arith.constant 0 : index
      %c0_28 = arith.constant 0 : index
      %37 = vector.load %arg16[%c0_27, %c0_28] : memref<1x1024xf32, #tpu.memory_space<vmem>>, vector<1x1024xf32>
      tpu.vector_store %arg16[%c0_27, %c0_28], %36 {strides = array<i32>} : memref<1x1024xf32, #tpu.memory_space<vmem>>, vector<1x1024xf32>,
    } else {
    }
    %c0 = arith.constant 0 : index
    %c0_1 = arith.constant 0 : index
    %c0_2 = arith.constant 0 : index
    %3 = vector.load %arg2[%c0, %c0_1, %c0_2] : memref<1x128x8xbf16, #tpu.memory_space<vmem>>, vector<1x128x8xbf16>
    %4 = vector.shape_cast %3 : vector<1x128x8xbf16> to vector<128x8xbf16>
    %c0_3 = arith.constant 0 : index
    %c0_4 = arith.constant 0 : index
    %5 = vector.load %arg3[%c0_3, %c0_4] : memref<8x64xbf16, #tpu.memory_space<vmem>>, vector<8x64xbf16>
    %cst = arith.constant dense<0.000000e+00> : vector<128x64xf32>
    %6 = tpu.matmul %4, %5, %cst {dimension_numbers = #tpu.dot_dimension_numbers<[1], [0], [0], [1], [0, 0, 1, 1], [], []>} : vector<128x8xbf16>, vector<8x64xbf16>, vector<128x64xf32> -> vector<128x64xf32>
    %c0_5 = arith.constant 0 : index
    %c0_6 = arith.constant 0 : index
    %7 = vector.load %arg4[%c0_5, %c0_6] : memref<1x64xf32, #tpu.memory_space<vmem>>, vector<1x64xf32>
    %8 = vector.broadcast %7 : vector<1x64xf32> to vector<128x64xf32>
    %9 = arith.addf %6, %8 : vector<128x64xf32>
    %cst_7 = arith.constant 0.000000e+00 : f32
    %10 = vector.broadcast %cst_7 : f32 to vector<128x64xf32>
    %11 = arith.maximumf %9, %10 : vector<128x64xf32>
    %12 = arith.truncf %11 : vector<128x64xf32> to vector<128x64xbf16>
    %c0_8 = arith.constant 0 : index
    %c0_9 = arith.constant 0 : index
    %13 = vector.load %arg5[%c0_8, %c0_9] : memref<64x128xbf16, #tpu.memory_space<vmem>>, vector<64x128xbf16>
    %cst_10 = arith.constant dense<0.000000e+00> : vector<128x128xf32>
    %14 = tpu.matmul %12, %13, %cst_10 {dimension_numbers = #tpu.dot_dimension_numbers<[1], [0], [0], [1], [0, 0, 1, 1], [], []>} : vector<128x64xbf16>, vector<64x128xbf16>, vector<128x128xf32> -> vector<128x128xf32>
    %c0_11 = arith.constant 0 : index
    %c0_12 = arith.constant 0 : index
    %15 = vector.load %arg6[%c0_11, %c0_12] : memref<1x128xf32, #tpu.memory_space<vmem>>, vector<1x128xf32>
    %16 = vector.broadcast %15 : vector<1x128xf32> to vector<128x128xf32>
    %17 = arith.addf %14, %16 : vector<128x128xf32>
    %cst_13 = arith.constant 0.000000e+00 : f32
    %18 = vector.broadcast %cst_13 : f32 to vector<128x128xf32>
    %19 = arith.maximumf %17, %18 : vector<128x128xf32>
    %20 = arith.truncf %19 : vector<128x128xf32> to vector<128x128xbf16>
    %c0_14 = arith.constant 0 : index
    %c0_15 = arith.constant 0 : index
    %21 = vector.load %arg7[%c0_14, %c0_15] : memref<128x1024xbf16, #tpu.memory_space<vmem>>, vector<128x1024xbf16>
    %cst_16 = arith.constant dense<0.000000e+00> : vector<128x1024xf32>
    %22 = tpu.matmul %20, %21, %cst_16 {dimension_numbers = #tpu.dot_dimension_numbers<[1], [0], [0], [1], [0, 0, 1, 1], [], []>} : vector<128x128xbf16>, vector<128x1024xbf16>, vector<128x1024xf32> -> vector<128x1024xf32>
    %c0_17 = arith.constant 0 : index
    %c0_18 = arith.constant 0 : index
    %23 = vector.load %arg8[%c0_17, %c0_18] : memref<1x1024xf32, #tpu.memory_space<vmem>>, vector<1x1024xf32>
    %24 = vector.broadcast %23 : vector<1x1024xf32> to vector<128x1024xf32>
    %25 = arith.addf %22, %24 : vector<128x1024xf32>
    %cst_19 = arith.constant 0.000000e+00 : f32
    %26 = vector.broadcast %cst_19 : f32 to vector<128x1024xf32>
    %27 = arith.maximumf %25, %26 : vector<128x1024xf32>
    %c0_20 = arith.constant 0 : index
    %c0_21 = arith.constant 0 : index
    %28 = vector.load %arg16[%c0_20, %c0_21] : memref<1x1024xf32, #tpu.memory_space<vmem>>, vector<1x1024xf32>
    %cst_22 = arith.constant dense<0xFF800000> : vector<1024xf32>
    %29 = vector.multi_reduction <maximumf>, %27, %cst_22 [0] : vector<128x1024xf32> to vector<1024xf32>
    %30 = vector.shape_cast %29 : vector<1024xf32> to vector<1x1024xf32>
    %31 = arith.maximumf %28, %30 : vector<1x1024xf32>
    %c0_23 = arith.constant 0 : index
    %c0_24 = arith.constant 0 : index
    %32 = vector.load %arg16[%c0_23, %c0_24] : memref<1x1024xf32, #tpu.memory_space<vmem>>, vector<1x1024xf32>
    tpu.vector_store %arg16[%c0_23, %c0_24], %31 {strides = array<i32>} : memref<1x1024xf32, #tpu.memory_space<vmem>>, vector<1x1024xf32>,
    %c1_i32 = arith.constant 1 : i32
    %33 = arith.cmpi eq, %arg1, %c1_i32 : i32
    %34 = arith.extui %33 : i1 to i32
    %c0_i32_25 = arith.constant 0 : i32
    %35 = arith.cmpi ne, %34, %c0_i32_25 : i32
    scf.if %35 {
      %c0_26 = arith.constant 0 : index
      %c0_27 = arith.constant 0 : index
      %36 = vector.load %arg16[%c0_26, %c0_27] : memref<1x1024xf32, #tpu.memory_space<vmem>>, vector<1x1024xf32>
      %37 = arith.truncf %36 : vector<1x1024xf32> to vector<1x1024xbf16>
      %c0_28 = arith.constant 0 : index
      %c0_29 = arith.constant 0 : index
      %38 = vector.load %arg9[%c0_28, %c0_29] : memref<1024x512xbf16, #tpu.memory_space<vmem>>, vector<1024x512xbf16>
      %cst_30 = arith.constant dense<0.000000e+00> : vector<1x512xf32>
      %39 = tpu.matmul %37, %38, %cst_30 {dimension_numbers = #tpu.dot_dimension_numbers<[1], [0], [0], [1], [0, 0, 1, 1], [], []>} : vector<1x1024xbf16>, vector<1024x512xbf16>, vector<1x512xf32> -> vector<1x512xf32>
      %c0_31 = arith.constant 0 : index
      %c0_32 = arith.constant 0 : index
      %40 = vector.load %arg10[%c0_31, %c0_32] : memref<1x512xf32, #tpu.memory_space<vmem>>, vector<1x512xf32>
      %41 = arith.addf %39, %40 : vector<1x512xf32>
      %cst_33 = arith.constant 0.000000e+00 : f32
      %42 = vector.broadcast %cst_33 : f32 to vector<1x512xf32>
      %43 = arith.maximumf %41, %42 : vector<1x512xf32>
      %44 = arith.truncf %43 : vector<1x512xf32> to vector<1x512xbf16>
      %c0_34 = arith.constant 0 : index
      %c0_35 = arith.constant 0 : index
      %45 = vector.load %arg11[%c0_34, %c0_35] : memref<512x256xbf16, #tpu.memory_space<vmem>>, vector<512x256xbf16>
      %cst_36 = arith.constant dense<0.000000e+00> : vector<1x256xf32>
      %46 = tpu.matmul %44, %45, %cst_36 {dimension_numbers = #tpu.dot_dimension_numbers<[1], [0], [0], [1], [0, 0, 1, 1], [], []>} : vector<1x512xbf16>, vector<512x256xbf16>, vector<1x256xf32> -> vector<1x256xf32>
      %c0_37 = arith.constant 0 : index
      %c0_38 = arith.constant 0 : index
      %47 = vector.load %arg12[%c0_37, %c0_38] : memref<1x256xf32, #tpu.memory_space<vmem>>, vector<1x256xf32>
      %48 = arith.addf %46, %47 : vector<1x256xf32>
      %cst_39 = arith.constant 0.000000e+00 : f32
      %49 = vector.broadcast %cst_39 : f32 to vector<1x256xf32>
      %50 = arith.maximumf %48, %49 : vector<1x256xf32>
      %51 = arith.truncf %50 : vector<1x256xf32> to vector<1x256xbf16>
      %c0_40 = arith.constant 0 : index
      %c0_41 = arith.constant 0 : index
      %52 = vector.load %arg13[%c0_40, %c0_41] : memref<256x128xbf16, #tpu.memory_space<vmem>>, vector<256x128xbf16>
      %cst_42 = arith.constant dense<0.000000e+00> : vector<1x128xf32>
      %53 = tpu.matmul %51, %52, %cst_42 {dimension_numbers = #tpu.dot_dimension_numbers<[1], [0], [0], [1], [0, 0, 1, 1], [], []>} : vector<1x256xbf16>, vector<256x128xbf16>, vector<1x128xf32> -> vector<1x128xf32>
      %c0_43 = arith.constant 0 : index
      %c0_44 = arith.constant 0 : index
      %54 = vector.load %arg14[%c0_43, %c0_44] : memref<1x128xf32, #tpu.memory_space<vmem>>, vector<1x128xf32>
      %55 = arith.addf %53, %54 : vector<1x128xf32>
      %56 = vector.shape_cast %55 : vector<1x128xf32> to vector<1x1x128xf32>
      %c0_45 = arith.constant 0 : index
      %c0_46 = arith.constant 0 : index
      %c0_47 = arith.constant 0 : index
      %57 = vector.load %arg15[%c0_45, %c0_46, %c0_47] : memref<1x1x128xf32, #tpu.memory_space<vmem>>, vector<1x1x128xf32>
      tpu.vector_store %arg15[%c0_45, %c0_46, %c0_47], %56 {strides = array<i32>} : memref<1x1x128xf32, #tpu.memory_space<vmem>>, vector<1x1x128xf32>,
    } else {
    }
    return
  }
  func.func @transform_0(%arg0: i32, %arg1: i32) -> (i32, i32, i32) {
    %c0_i32 = arith.constant 0 : i32
    %c0_i32_0 = arith.constant 0 : i32
    return %arg0, %arg1, %c0_i32 : i32, i32, i32
  }
  func.func @transform_1(%arg0: i32, %arg1: i32) -> (i32, i32) {
    %c0_i32 = arith.constant 0 : i32
    %c0_i32_0 = arith.constant 0 : i32
    %c0_i32_1 = arith.constant 0 : i32
    return %c0_i32, %c0_i32_0 : i32, i32
  }
  func.func @transform_2(%arg0: i32, %arg1: i32) -> (i32, i32) {
    %c0_i32 = arith.constant 0 : i32
    %c0_i32_0 = arith.constant 0 : i32
    %c0_i32_1 = arith.constant 0 : i32
    return %c0_i32, %c0_i32_0 : i32, i32
  }
  func.func @transform_3(%arg0: i32, %arg1: i32) -> (i32, i32) {
    %c0_i32 = arith.constant 0 : i32
    %c0_i32_0 = arith.constant 0 : i32
    %c0_i32_1 = arith.constant 0 : i32
    return %c0_i32, %c0_i32_0 : i32, i32
  }
  func.func @transform_4(%arg0: i32, %arg1: i32) -> (i32, i32) {
    %c0_i32 = arith.constant 0 : i32
    %c0_i32_0 = arith.constant 0 : i32
    %c0_i32_1 = arith.constant 0 : i32
    return %c0_i32, %c0_i32_0 : i32, i32
  }
  func.func @transform_5(%arg0: i32, %arg1: i32) -> (i32, i32) {
    %c0_i32 = arith.constant 0 : i32
    %c0_i32_0 = arith.constant 0 : i32
    %c0_i32_1 = arith.constant 0 : i32
    return %c0_i32, %c0_i32_0 : i32, i32
  }
  func.func @transform_6(%arg0: i32, %arg1: i32) -> (i32, i32) {
    %c0_i32 = arith.constant 0 : i32
    %c0_i32_0 = arith.constant 0 : i32
    %c0_i32_1 = arith.constant 0 : i32
    return %c0_i32, %c0_i32_0 : i32, i32
  }
  func.func @transform_7(%arg0: i32, %arg1: i32) -> (i32, i32) {
    %c0_i32 = arith.constant 0 : i32
    %c0_i32_0 = arith.constant 0 : i32
    %c0_i32_1 = arith.constant 0 : i32
    return %c0_i32, %c0_i32_0 : i32, i32
  }
  func.func @transform_8(%arg0: i32, %arg1: i32) -> (i32, i32) {
    %c0_i32 = arith.constant 0 : i32
    %c0_i32_0 = arith.constant 0 : i32
    %c0_i32_1 = arith.constant 0 : i32
    return %c0_i32, %c0_i32_0 : i32, i32
  }
  func.func @transform_9(%arg0: i32, %arg1: i32) -> (i32, i32) {
    %c0_i32 = arith.constant 0 : i32
    %c0_i32_0 = arith.constant 0 : i32
    %c0_i32_1 = arith.constant 0 : i32
    return %c0_i32, %c0_i32_0 : i32, i32
  }
  func.func @transform_10(%arg0: i32, %arg1: i32) -> (i32, i32) {
    %c0_i32 = arith.constant 0 : i32
    %c0_i32_0 = arith.constant 0 : i32
    %c0_i32_1 = arith.constant 0 : i32
    return %c0_i32, %c0_i32_0 : i32, i32
  }
  func.func @transform_11(%arg0: i32, %arg1: i32) -> (i32, i32) {
    %c0_i32 = arith.constant 0 : i32
    %c0_i32_0 = arith.constant 0 : i32
    %c0_i32_1 = arith.constant 0 : i32
    return %c0_i32, %c0_i32_0 : i32, i32
  }
  func.func @transform_12(%arg0: i32, %arg1: i32) -> (i32, i32) {
    %c0_i32 = arith.constant 0 : i32
    %c0_i32_0 = arith.constant 0 : i32
    %c0_i32_1 = arith.constant 0 : i32
    return %c0_i32, %c0_i32_0 : i32, i32
  }
  func.func @transform_13(%arg0: i32, %arg1: i32) -> (i32, i32, i32) {
    %c0_i32 = arith.constant 0 : i32
    %c0_i32_0 = arith.constant 0 : i32
    %c0_i32_1 = arith.constant 0 : i32
    return %arg0, %c0_i32, %c0_i32_0 : i32, i32, i32
  }
}

</mosaic_0001>

<bundles_post_ra>
// kernel: tpu_custom_call.1
= control target key start
LH: loop header
LB: loop body
LE: loop exit
PB: predicated region body
PF: predicated region fallthrough
CT: control target
= control target key end

     0   :  { %s7038_s0 = inlined_call_operand.vmem [shape: bf16[2,256,8], index: 0, kind: input, shape index: {}]   ;;  %s7039_s1 = inlined_call_operand.vmem [shape: bf16[8,64], index: 1, kind: input, shape index: {}]   ;;  %s7040_s2 = inlined_call_operand.vmem [shape: f32[1,64], index: 2, kind: input, shape index: {}]   ;;  %s7041_s3 = inlined_call_operand.vmem [shape: bf16[64,128], index: 3, kind: input, shape index: {}]   ;;  %s7042_s4 = inlined_call_operand.vmem [shape: f32[1,128], index: 4, kind: input, shape index: {}]   ;;  %s7043_s5 = inlined_call_operand.hbm [shape: bf16[128,1024], index: 5, kind: input, shape index: {}]   ;;  %s7044_s6 = inlined_call_operand.vmem [shape: f32[1,1024], index: 6, kind: input, shape index: {}]   ;;  %s7045_s7 = inlined_call_operand.hbm [shape: bf16[1024,512], index: 7, kind: input, shape index: {}]   ;;  %s7046_s8 = inlined_call_operand.vmem [shape: f32[1,512], index: 8, kind: input, shape index: {}]   ;;  %s7047_s9 = inlined_call_operand.hbm [shape: bf16[512,256], index: 9, kind: input, shape index: {}]   ;;  %s7048_s10 = inlined_call_operand.vmem [shape: f32[1,256], index: 10, kind: input, shape index: {}]   ;;  %s7049_s11 = inlined_call_operand.vmem [shape: bf16[256,128], index: 11, kind: input, shape index: {}]   ;;  %s7050_s12 = inlined_call_operand.vmem [shape: f32[1,128], index: 12, kind: input, shape index: {}]   ;;  %s7051_s13 = inlined_call_operand.hbm [shape: f32[2,1,128], index: 13, kind: output, shape index: {}]  }
   0x1   :  { %7068 = sst [smem:[#allocation23_spill]] %s7048_s10 }
   0x2   :  { %7069 = sst [smem:[#allocation24_spill]] %s7049_s11 }
   0x3   :  { %7070 = sst [smem:[#allocation25_spill]] %s7050_s12 }
   0x4   :  { %7071 = sst [smem:[#allocation26_spill]] %s7051_s13 }
   0x5   :  { %18 = vsyncpa [#allocation4], 0 }
   0x6   :  { %19 = vsyncpa [#allocation7], 0 }
   0x7   :  { %20 = vsyncpa [#allocation5], 0 }
   0x8   :  { %22 = vsyncpa [#allocation5 + $0x1], 0  ;;  %s6324_s25 = smov 0   ;;  %s6326_s26 = smov 0  }
   0x9   :  { %s6328_s27 = smov 0   ;;  %s6330_s28 = smov 0  }
   0xa   :  { %s6332_s29 = smov 0   ;;  %s6334_s30 = smov 0  }
   0xb   :  { %s6336_s14 = smov 0   ;;  %s6338_s15 = smov 0  }
   0xc LB: > { %7072 = sst [smem:[#allocation13_spill]] %s6211_s25  ;;  %s4866_s16 = sadd.s32 4294967295, %s6239_s15   ;;  %s6239_s15 = sphi %s6338_s15, %s28_s15   ;;  %s6235_s14 = sphi %s6336_s14, %s7106_s14   ;;  %s6231_s30 = sphi %s6334_s30, %s7105_s30   ;;  %s6227_s29 = sphi %s6332_s29, %s7104_s29   ;;  %s6223_s28 = sphi %s6330_s28, %s7103_s28   ;;  %s6219_s27 = sphi %s6328_s27, %s7102_s27   ;;  %s6215_s26 = sphi %s6326_s26, %s7108_s26   ;;  %s6211_s25 = sphi %s6324_s25, %s7107_s25  }
   0xd   : > { %7073 = sst [smem:[#allocation14_spill]] %s6219_s27  ;;  %s4867_s17 = sadd.s32 4294967294, %s6239_s15  }
   0xe   : > { %7074 = sst [smem:[#allocation15_spill]] %s6231_s30  ;;  %s37_s18 = sadd.s32 1, %s6231_s30 }
   0xf   : > { %7075 = sst [smem:[#allocation16_spill]] %s6235_s14  ;;  %s40_s19 = sadd.s32 1, %s6235_s14 }
  0x10   : > { %7076 = sst [smem:[#allocation17_spill]] %s6239_s15  ;;  %p38_p0 = scmp.ge.s32.totalorder %s37_s18, 2 }
  0x11   : > { %s327_s20 = sadd.s32 1, %s6219_s27  ;;  %p337_p1 = scmp.ne.s32.totalorder %s6219_s27, %s6215_s26 }
  0x12   : > { %p338_p2 = scmp.eq.s32.totalorder %s4866_s16, 3  ;;  %s7110_s18 = smov (%p38_p0, %s37_s18), 0 }
  0x13   : > { %7077 = sst [smem:[#allocation18_spill]] %s7110_s18  ;;  %s7112_s19 = smov (!%p38_p0, %s40_s19), %s6235_s14 }
  0x14   : > { %p6374_p3 = por %p338_p2, %p337_p1  ;;  %p343_p4 = scmp.ne.s32.totalorder %s6215_s26, %s6211_s25 }
  0x15   : > { %p42_p5 = scmp.ge.s32.totalorder %s7112_s19, 2  ;;  %p344_p6 = scmp.eq.s32.totalorder %s4867_s17, 3 }
  0x16   : > { %s7078_s21 = scalar_select %p6374_p3, 1, 0 }
  0x17   : > { %p4868_p7 = scmp.ge.s32.totalorder %s6239_s15, 1  ;;  %p351_p8 = scmp.lt.s32.totalorder %s6239_s15, 5 }
  0x18   : > { %7079 = sst [smem:[#allocation19_spill]] %s7078_s21  ;;  %s7114_s19 = smov (%p42_p5, %s7112_s19), 0 }
  0x19   : > { %7080 = sst [smem:[#allocation20_spill]] %s7114_s19  ;;  %p6384_p9 = por %p344_p6, %p343_p4 }
  0x1a   : > { %p6388_p10 = pnand %p4868_p7, %p351_p8  ;;  %s324_s24 = ssub.s32 %s6235_s14, %s7114_s19 }
  0x1b   : > { %s7081_s22 = scalar_select %p6384_p9, 1, 0 }
  0x1c   : > { %s7083_s23 = scalar_select %p6388_p10, 1, 0 }
  0x1d   : > { %7082 = sst [smem:[#allocation21_spill]] %s7081_s22  ;;  %p325_p11 = scmp.eq.s32.totalorder %s324_s24, 0 }
  0x1e   : > { %p5447_p12 = pneg %p6388_p10  ;;  %p6396_p13 = scmp.eq.s32.totalorder %s4866_s16, 0 }
  0x1f   : > { %s6401_s18 = scalar_select %p325_p11, %s6219_s27, %s327_s20  }
  0x20   : > { %s7084_s17 = scalar_select %p6396_p13, 1, 0 }
  0x21   : > { %7085 = sst [smem:[#allocation22_spill]] %s6401_s18  ;;  %p6405_p0 = pnand %p6396_p13, %p5447_p12 }
  0x22   : > { %s6241_s22 = smov [#allocation6]   ;;  %s6053_s14 = scalar_lea.hbm %s7045_s7, 32768 }
  0x23   : > { %s391_s25 = sshll.u32 %s6241_s22, 4  ;;  %p6054_p1 = scmp.ne.s32.totalorder %s7045_s7, %s6053_s14  ;;  %s392_s25 = int_to_ptr.vmem [resolvable:$true] %s391_s25 }
  0x24   : > { %p6417_p2 = pneg %p6405_p0  ;;  %p6060_p6 = scmp.lt.u32.totalorder %s6053_s14, %s7045_s7 }
  0x26   : > { %p6056_p4 = pnand %p6417_p2, %p6054_p1 }
  0x28   : > { %p6057_p5 = pneg %p6056_p4 }
  0x2a   : > { %p6062_p7 = pnand %p6060_p6, %p6057_p5 }
  0x2c   : > { %6065 = shalt.err (!%p6062_p7)
}
  0x2d   : > { %s6066_s19 = scalar_lea.vmem %s392_s25, 32768  ;;  %p6074_p9 = scmp.lt.s32.totalorder %s392_s25, %s392_s25 }
  0x2e   : > { %p6067_p8 = scmp.ne.s32.totalorder %s392_s25, %s6066_s19  ;;  %p6075_p3 = scmp.lt.s32.totalorder %s6066_s19, %s6066_s19 }
  0x30   : > { %p6069_p11 = pnand %p6067_p8, %p6417_p2  ;;  %p6076_p13 = por %p6075_p3, %p6074_p9 }
  0x32   : > { %p6070_p12 = pneg %p6069_p11 }
  0x34   : > { %p6077_p10 = pnand %p6076_p13, %p6070_p12 }
  0x36   : > { %6080 = shalt.err (!%p6077_p10)
}
  0x37   : > { %s6242_s15 = smov 256   ;;  %s6243_s24 = smov 16  }
  0x38   : > { %5453 = dma.hbm_to_vmem [thread:$0]  (!%p6405_p0), %s7045_s7, 32768, %s392_s25, [#allocation7], %s6242_s15, %s6242_s15, %s6243_s24  }
  0x39   : > { %s6244_s16 = smov [#allocation3]   ;;  %s6081_s21 = scalar_lea.hbm %s7043_s5, 8192 }
  0x3a   : > { %s375_s22 = sshll.u32 %s6244_s16, 4  ;;  %p6082_p3 = scmp.ne.s32.totalorder %s7043_s5, %s6081_s21  ;;  %s376_s22 = int_to_ptr.vmem [resolvable:$true] %s375_s22 }
  0x3b   : > { %p6088_p13 = scmp.lt.u32.totalorder %s6081_s21, %s7043_s5 }
  0x3c   : > { %p6084_p9 = pnand %p6082_p3, %p6417_p2 }
  0x3e   : > { %p6085_p10 = pneg %p6084_p9 }
  0x40   : > { %p6090_p1 = pnand %p6088_p13, %p6085_p10 }
  0x42   : > { %6093 = shalt.err (!%p6090_p1)
}
  0x43   : > { %s6094_s25 = scalar_lea.vmem %s376_s22, 8192  ;;  %p6102_p7 = scmp.lt.s32.totalorder %s376_s22, %s376_s22 }
  0x44   : > { %p6095_p4 = scmp.ne.s32.totalorder %s376_s22, %s6094_s25  ;;  %p6103_p8 = scmp.lt.s32.totalorder %s6094_s25, %s6094_s25 }
  0x46   : > { %p6097_p5 = pnand %p6095_p4, %p6417_p2  ;;  %p6104_p11 = por %p6103_p8, %p6102_p7 }
  0x48   : > { %p6098_p6 = pneg %p6097_p5 }
  0x4a   : > { %p6105_p12 = pnand %p6104_p11, %p6098_p6 }
  0x4c   : > { %6108 = shalt.err (!%p6105_p12)
}
  0x4d   : > { %s6245_s12 = smov 512   ;;  %s6246_s13 = smov 32  }
  0x4e   : > { %5450 = dma.hbm_to_vmem [thread:$0]  (!%p6405_p0), %s7043_s5, 8192, %s376_s22, [#allocation4], %s6245_s12, %s6245_s12, %s6246_s13  }
  0x4f   : > { %s6247_s27 = smov [#allocation8]   ;;  %s6109_s18 = scalar_lea.hbm %s7047_s9, 8192 }
  0x50   : > { %s407_s21 = sshll.u32 %s6247_s27, 4  ;;  %p6110_p3 = scmp.ne.s32.totalorder %s7047_s9, %s6109_s18  ;;  %s408_s21 = int_to_ptr.vmem [resolvable:$true] %s407_s21 }
  0x51   : > { %p6116_p13 = scmp.lt.u32.totalorder %s6109_s18, %s7047_s9 }
  0x52   : > { %p6112_p9 = pnand %p6110_p3, %p6417_p2 }
  0x54   : > { %p6113_p10 = pneg %p6112_p9 }
  0x56   : > { %p6118_p1 = pnand %p6116_p13, %p6113_p10 }
  0x58   : > { %6121 = shalt.err (!%p6118_p1)
}
  0x59   : > { %s6122_s22 = scalar_lea.vmem %s408_s21, 8192  ;;  %p6130_p7 = scmp.lt.s32.totalorder %s408_s21, %s408_s21 }
  0x5a   : > { %p6123_p4 = scmp.ne.s32.totalorder %s408_s21, %s6122_s22  ;;  %p6131_p8 = scmp.lt.s32.totalorder %s6122_s22, %s6122_s22 }
  0x5c   : > { %p6125_p5 = pnand %p6123_p4, %p6417_p2  ;;  %p6132_p11 = por %p6131_p8, %p6130_p7 }
  0x5e   : > { %p6126_p6 = pneg %p6125_p5 }
  0x60   : > { %p6133_p12 = pnand %p6132_p11, %p6126_p6 }
  0x62   : > { %6136 = shalt.err (!%p6133_p12)
}
  0x63   : > { %s6248_s12 = smov 128   ;;  %s6249_s13 = smov 8  }
  0x64   : > { %5456 = dma.hbm_to_vmem [thread:$0]  (!%p6405_p0), %s7047_s9, 8192, %s408_s21, [#allocation7], %s6248_s12, %s6248_s12, %s6249_s13  }
  0x65   : > { %p7088_p3 = scmp.ne.s32.totalorder %s7083_s23, 0 }
  0x66   : > { %p7089_p9 = scmp.ne.s32.totalorder (!%p7088_p3), %s7084_s17, 0 }
  0x67   : > { %445 = sbr.rel (%p7088_p3) target bundleno = 1914 (0x77a), region = 72 }
  0x6e   : > { %6198 = dma.done.wait (%p7089_p9), [#allocation4], 8192  }
  0x6f   : > { %6200 = vsyncadd (%p7089_p9), [#allocation4], 4294959104 }
  0x70   : > { %6202 = dma.done.wait (%p7089_p9), [#allocation7], 40960  }
  0x71   : > { %6204 = vsyncadd (%p7089_p9), [#allocation7], 4294926336  ;;  %s498_s30 = sand.u32 1, %s6215_s26   ;;  %s4877_s23 = sshll.u32 %s6223_s28, 4 }
  0x72   : > { %p501_p0 = scmp.lt.s32.totalorder %s6227_s29, 1  ;;  %p503_p2 = scmp.lt.s32.totalorder %s4877_s23, 31 }
  0x73   : > { %s6490_s17 = scalar_lea.vmem [#allocation9], %s498_s30  ;;  %p4880_p10 = scmp.ne.s32.totalorder %s6223_s28, 0 }
  0x74   : > { %s502_s20 = scalar_select %p501_p0, %s6227_s29, 1 }
  0x75   : > { %s7116_s23 = smov (!%p503_p2, %s4877_s23), 31  ;;  %514 = sbr.rel (%p4880_p10) target bundleno = 124 (0x7c), region = 88 }
  0x76   : > { %s4878_s27 = sshll.u32 %s502_s20, 5  ;;  %v6250_v0 = vmov (!%p4880_p10), -inf  }
  0x77   : > { %s506_s21 = sadd.s32 %s4878_s27, %s7116_s23  ;;  %515 = vst [vmem:[#allocation2] sm:$0xff] (!%p4880_p10), %v6250_v0 }
  0x78   : > { %s4879_s15 = sshll.u32 %s506_s21, 2 }
  0x79   : > { %s6486_s14 = scalar_lea.vmem %s7038_s0, %s4879_s15 }
  0x7c PF: > { %v532_v1 = vld [vmem:[%s7039_s1] sm:$0xf]  ;;  %vm605_vm0 = vcmask 1043456   ;;  %vm580_vm1 = vcmask 64512   ;;  %v5545_v4 = vld [vmem:[%s6486_s14 + $0x8] sm:$0xff]   ;;  %v5546_v5 = vld [vmem:[%s6486_s14 + $0x10] sm:$0xff]  }
  0x7d   : > { %v5544_v2 = vld [vmem:[%s6486_s14] sm:$0xff]   ;;  %5432 = vmatprep.subr.msk.bf16.mxu0 %vm605_vm0, %v532_v1  ;;  %v607_v3 = vsel %vm605_vm0, %v532_v1, 0  ;;  %v5547_v6 = vld [vmem:[%s6486_s14 + $0x18] sm:$0xff]   ;;  %v5553_v9 = vld [vmem:[%s7041_s3 + $0x8] sm:$0xff]   ;;  %vm769_vm2 = vcmask 523264   ;;  %p4975_p13 = scmp.ne.s32.totalorder %s6223_s28, 1 }
  0x7e   : > { %5359 = vmatpush3.bf16.msra.mxu0 %v607_v3  ;;  %5360 = vmatprep.mubr.msk.bf16.mxu0 %vm580_vm1, %v5544_v2  ;;  %v5548_v7 = vld [vmem:[%s6486_s14 + $0x20] sm:$0xff]   ;;  %v5549_v10 = vld [vmem:[%s6486_s14 + $0x28] sm:$0xff]   ;;  %v5550_v11 = vld [vmem:[%s6486_s14 + $0x30] sm:$0xff]   ;;  %s7090_s22 = sld [smem:[#allocation24_spill]] (!%p4975_p13)  ;;  %s7091_s12 = sld [smem:[#allocation23_spill]] (!%p4975_p13) }
  0x7f   : > { %v5552_v8 = vld [vmem:[%s7041_s3] sm:$0xff]   ;;  %v5551_v12 = vld [vmem:[%s6486_s14 + $0x38] sm:$0xff]   ;;  %v5554_v13 = vld [vmem:[%s7041_s3 + $0x10] sm:$0xff]   ;;  %s7092_s11 = sld [smem:[#allocation25_spill]] (!%p4975_p13) }
  0x80   : > { %5376 = vmatprep.subr.bf16.mxu1 %v5552_v8  ;;  %v5555_v14 = vld [vmem:[%s7041_s3 + $0x18] sm:$0xff]   ;;  %v915_v15 = vld [vmem:[#allocation3] sm:$0xff]  ;;  %v6524_v17 = vld [vmem:[#allocation3 + $0x8] sm:$0xff] }
  0x81   : > { %5361 = vmatmul.mubr.msk.bf16.vlgmr.msra.gmra.mrb[0].mxu0 %vm580_vm1, %v5545_v4  ;;  %5377 = vmatpush3.bf16.msra.mxu1 %v5552_v8  ;;  %v919_v16 = vld [vmem:[#allocation3 + $0x20] sm:$0xff]  ;;  %v6526_v20 = vld [vmem:[#allocation3 + $0x28] sm:$0xff]  ;;  %v6535_v43 = vld [vmem:[%s7040_s2] ss:$0 sm:$0xff] }
  0x82   : > { %5364 = vmatprep.mubr.msk.bf16.mxu0 %vm580_vm1, %v5546_v5  ;;  %5378 = vmatprep.subr.bf16.mxu1 %v5553_v9  ;;  %v4911_v18 = vcombine.low %v915_v15, %v919_v16  ;;  %v4912_v19 = vcombine.high %v915_v15, %v919_v16  ;;  %v923_v21 = vld [vmem:[#allocation3 + $0x40] sm:$0xff]  ;;  %v4913_v23 = vcombine.low %v6524_v17, %v6526_v20  ;;  %v924_v56 = vld [vmem:[#allocation3 + $0x48] sm:$0xff] }
  0x83   : > { %v927_v22 = vld [vmem:[#allocation3 + $0x60] sm:$0xff]  ;;  %v4914_v24 = vcombine.high %v6524_v17, %v6526_v20  ;;  %v928_v57 = vld [vmem:[#allocation3 + $0x68] sm:$0xff] }
  0x84   : > { %v4920_v25 = vcombine.high %v923_v21, %v927_v22  ;;  %v931_v26 = vld [vmem:[#allocation3 + $0x80] sm:$0xff]  ;;  %1341 = vmatprep.subr.bf16.mxu0 %v4912_v19  ;;  %v4919_v28 = vcombine.low %v923_v21, %v927_v22  ;;  %v4922_v63 = vcombine.high %v924_v56, %v928_v57  ;;  %v932_v2 = vld [vmem:[#allocation3 + $0x88] sm:$0xff] }
  0x85   : > { %5379 = vmatpush3.bf16.msra.mxu1 %v5553_v9  ;;  %v935_v27 = vld [vmem:[#allocation3 + $0xa0] sm:$0xff]  ;;  %1342 = vmatpush1.bf16.msra.mxu0 %v4911_v18  ;;  %v936_v3 = vld [vmem:[#allocation3 + $0xa8] sm:$0xff]  ;;  %v4921_v9 = vcombine.low %v924_v56, %v928_v57 }
  0x86   : > { %5380 = vmatprep.subr.bf16.mxu1 %v5554_v13  ;;  %1343 = vmatprep.subr.bf16.mxu0 %v4920_v25  ;;  %v4928_v29 = vcombine.high %v931_v26, %v935_v27  ;;  %v939_v30 = vld [vmem:[#allocation3 + $0xc0] sm:$0xff]  ;;  %v4927_v32 = vcombine.low %v931_v26, %v935_v27  ;;  %v4929_v19 = vcombine.low %v932_v2, %v936_v3  ;;  %v952_v25 = vld [vmem:[#allocation3 + $0x128] sm:$0xff] }
  0x87   : > { %v943_v31 = vld [vmem:[#allocation3 + $0xe0] sm:$0xff] }
  0x88   : > { %v4936_v33 = vcombine.high %v939_v30, %v943_v31  ;;  %v947_v34 = vld [vmem:[#allocation3 + $0x100] sm:$0xff]  ;;  %v4935_v36 = vcombine.low %v939_v30, %v943_v31 }
  0x89   : > { %5365 = vmatmul.mubr.msk.bf16.gmra.mrb[4].mxu0 %vm580_vm1, %v5547_v6  ;;  %5381 = vmatpush3.bf16.msra.mxu1 %v5554_v13  ;;  %v951_v35 = vld [vmem:[#allocation3 + $0x120] sm:$0xff]  ;;  %v940_v13 = vld [vmem:[#allocation3 + $0xc8] sm:$0xff] }
  0x8a   : > { %5368 = vmatprep.mubr.msk.bf16.mxu0 %vm580_vm1, %v5548_v7  ;;  %5382 = vmatprep.subr.bf16.mxu1 %v5555_v14  ;;  %v4944_v37 = vcombine.high %v947_v34, %v951_v35  ;;  %v955_v38 = vld [vmem:[#allocation3 + $0x140] sm:$0xff]  ;;  %v4943_v40 = vcombine.low %v947_v34, %v951_v35  ;;  %v956_v35 = vld [vmem:[#allocation3 + $0x148] sm:$0xff] }
  0x8b   : > { %1344 = vmatpush1.bf16.msra.mxu0 %v4919_v28  ;;  %v959_v39 = vld [vmem:[#allocation3 + $0x160] sm:$0xff] }
  0x8c   : > { %1345 = vmatprep.subr.bf16.mxu0 %v4928_v29  ;;  %v4952_v41 = vcombine.high %v955_v38, %v959_v39  ;;  %v4951_v42 = vcombine.low %v955_v38, %v959_v39  ;;  %v963_v57 = vld [vmem:[#allocation3 + $0x180] sm:$0xff] }
  0x8d   : > { %5383 = vmatpush3.bf16.msra.mxu1 %v5555_v14  ;;  %v944_v14 = vld [vmem:[#allocation3 + $0xe8] sm:$0xff] }
  0x8e   : > { %1454 = vmatprep.subr.bf16.mxu1 %v4914_v24  ;;  %v4938_v24 = vcombine.high %v940_v13, %v944_v14  ;;  %v4937_v31 = vcombine.low %v940_v13, %v944_v14  ;;  %v922_v14 = vld [vmem:[#allocation3 + $0x38] sm:$0xff] }
  0x8f   : > { %1346 = vmatpush1.bf16.msra.mxu0 %v4927_v32 }
  0x90   : > { %1347 = vmatprep.subr.bf16.mxu0 %v4936_v33 }
  0x91   : > { %5369 = vmatmul.mubr.msk.bf16.gmra.mrb[8].mxu0 %vm580_vm1, %v5549_v10 }
  0x92   : > { %5372 = vmatprep.mubr.msk.bf16.mxu0 %vm580_vm1, %v5550_v11  ;;  %v4930_v11 = vcombine.high %v932_v2, %v936_v3  ;;  %v972_v2 = vld [vmem:[#allocation3 + $0x1c8] sm:$0xff] }
  0x93   : > { %1348 = vmatpush1.bf16.msra.mxu0 %v4935_v36  ;;  %v960_v36 = vld [vmem:[#allocation3 + $0x168] sm:$0xff] }
  0x94   : > { %1349 = vmatprep.subr.bf16.mxu0 %v4944_v37 }
  0x97   : > { %1350 = vmatpush1.bf16.msra.mxu0 %v4943_v40 }
  0x98   : > { %1351 = vmatprep.subr.bf16.mxu0 %v4952_v41 }
  0x99   : > { %5373 = vmatmul.mubr.msk.bf16.gmra.mrb[12].mxu0 %vm580_vm1, %v5551_v12 }
  0x9b   : > { %1352 = vmatpush1.bf16.msra.mxu0 %v4951_v42 }
 0x154   : > { %v5362_v44 = vpop.f32.mrb[0].mxu0 }
 0x155   : > { %v652_v45 = vadd.f32 %v5362_v44, %v6535_v43  ;;  %v643_v46 = vpop.f32.mrb[1].mxu0  ;;  %v4954_v44 = vcombine.high %v956_v35, %v960_v36 }
 0x156   : > { %v644_v47 = vadd.f32 %v6535_v43, %v643_v46  ;;  %v5363_v48 = vpop.f32.mrb[2].mxu0 }
 0x157   : > { %v655_v49 = vadd.f32 %v5363_v48, %v6535_v43  ;;  %v646_v50 = vpop.f32.mrb[3].mxu0  ;;  %v708_v52 = vmax.f32 %v652_v45, 0.0 }
 0x158   : > { %v647_v51 = vadd.f32 %v6535_v43, %v646_v50  ;;  %v706_v54 = vmax.f32 %v644_v47, 0.0 }
 0x159   : > { %v709_v53 = vmax.f32 %v655_v49, 0.0 }
 0x15a   : > { %v707_v55 = vmax.f32 %v647_v51, 0.0 }
 0x15b   : > { %v723_v58 = vpack.c.bf16 %v709_v53, %v708_v52  ;;  %v4953_v52 = vcombine.low %v956_v35, %v960_v36 }
 0x15c   : > { %v5366_v59 = vpop.f32.mrb[4].mxu0  ;;  %v722_v60 = vpack.c.bf16 %v707_v55, %v706_v54 }
 0x15d   : > { %v668_v61 = vadd.f32 %v5366_v59, %v6535_v43  ;;  %v659_v62 = vpop.f32.mrb[5].mxu0  ;;  %v964_v59 = vld [vmem:[#allocation3 + $0x188] sm:$0xff] }
 0x15e   : > { %v660_v0 = vadd.f32 %v6535_v43, %v659_v62  ;;  %5384 = vmatprep.mubr.msk.bf16.mxu1 %vm769_vm2, %v722_v60  ;;  %v5367_v1 = vpop.f32.mrb[6].mxu0 }
 0x15f   : > { %v712_v4 = vmax.f32 %v668_v61, 0.0  ;;  %v671_v5 = vadd.f32 %v5367_v1, %v6535_v43  ;;  %5385 = vmatmul.mubr.msk.bf16.vlgmr.msra.gmra.mrb[0].mxu1 %vm769_vm2, %v723_v58  ;;  %v662_v6 = vpop.f32.mrb[7].mxu0  ;;  %v967_v58 = vld [vmem:[#allocation3 + $0x1a0] sm:$0xff]  ;;  %v968_v61 = vld [vmem:[#allocation3 + $0x1a8] sm:$0xff] }
 0x160   : > { %v710_v7 = vmax.f32 %v660_v0, 0.0  ;;  %v663_v8 = vadd.f32 %v6535_v43, %v662_v6  ;;  %1455 = vmatpush1.bf16.msra.mxu1 %v4913_v23  ;;  %v948_v23 = vld [vmem:[#allocation3 + $0x108] sm:$0xff]  ;;  %v4960_v60 = vcombine.high %v963_v57, %v967_v58  ;;  %v4959_v62 = vcombine.low %v963_v57, %v967_v58  ;;  %v971_v0 = vld [vmem:[#allocation3 + $0x1c0] sm:$0xff]  ;;  %v941_v58 = vld [vmem:[#allocation3 + $0xd0] sm:$0xff] }
 0x161   : > { %v713_v10 = vmax.f32 %v671_v5, 0.0  ;;  %1456 = vmatprep.subr.bf16.mxu1 %v4922_v63  ;;  %v4946_v33 = vcombine.high %v948_v23, %v952_v25  ;;  %v4945_v40 = vcombine.low %v948_v23, %v952_v25  ;;  %v4961_v63 = vcombine.low %v964_v59, %v968_v61  ;;  %v975_v1 = vld [vmem:[#allocation3 + $0x1e0] sm:$0xff] }
 0x162   : > { %v711_v12 = vmax.f32 %v663_v8, 0.0  ;;  %1353 = vmatprep.subr.bf16.mxu0 %v4960_v60  ;;  %v4968_v3 = vcombine.high %v971_v0, %v975_v1  ;;  %v4967_v5 = vcombine.low %v971_v0, %v975_v1  ;;  %v6251_v8 = vmov 0   ;;  %v945_v60 = vld [vmem:[#allocation3 + $0xf0] sm:$0xff] }
 0x163   : > { %v725_v15 = vpack.c.bf16 %v713_v10, %v712_v4  ;;  %1354 = vmatpush1.bf16.msra.mxu0 %v4959_v62  ;;  %v976_v4 = vld [vmem:[#allocation3 + $0x1e8] sm:$0xff]  ;;  %1373 = vmatprep.mubr.bf16.mxu0 %v6251_v8  ;;  %v921_v10 = vld [vmem:[#allocation3 + $0x30] sm:$0xff]  ;;  %v946_v62 = vld [vmem:[#allocation3 + $0xf8] sm:$0xff] }
 0x164   : > { %v724_v16 = vpack.c.bf16 %v711_v12, %v710_v7  ;;  %v5370_v18 = vpop.f32.mrb[8].mxu0  ;;  %1457 = vmatpush1.bf16.msra.mxu1 %v4921_v9  ;;  %v4969_v6 = vcombine.low %v972_v2, %v976_v4  ;;  %v4970_v7 = vcombine.high %v972_v2, %v976_v4  ;;  %1355 = vmatprep.subr.bf16.mxu0 %v4968_v3  ;;  %v917_v9 = vld [vmem:[#allocation3 + $0x10] sm:$0xff] }
 0x165   : > { %v684_v21 = vadd.f32 %v5370_v18, %v6535_v43  ;;  %v675_v22 = vpop.f32.mrb[9].mxu0  ;;  %1458 = vmatprep.subr.bf16.mxu1 %v4930_v11  ;;  %v918_v11 = vld [vmem:[#allocation3 + $0x18] sm:$0xff]  ;;  %v4915_v12 = vcombine.low %v917_v9, %v921_v10  ;;  %v4916_v13 = vcombine.high %v917_v9, %v921_v10 }
 0x166   : > { %5388 = vmatprep.mubr.msk.bf16.mxu1 %vm769_vm2, %v724_v16  ;;  %v676_v17 = vadd.f32 %v6535_v43, %v675_v22  ;;  %v5371_v20 = vpop.f32.mrb[10].mxu0  ;;  %v4918_v16 = vcombine.high %v918_v11, %v922_v14  ;;  %v6569_v18 = vld [vmem:[%s7042_s4] ss:$0 sm:$0xff] }
 0x167   : > { %5389 = vmatmul.mubr.msk.bf16.gmra.mrb[4].mxu1 %vm769_vm2, %v725_v15  ;;  %v716_v26 = vmax.f32 %v684_v21, 0.0  ;;  %v687_v27 = vadd.f32 %v5371_v20, %v6535_v43  ;;  %v678_v28 = vpop.f32.mrb[11].mxu0  ;;  %1356 = vmatpush1.bf16.msra.mxu0 %v4967_v5  ;;  %v4917_v15 = vcombine.low %v918_v11, %v922_v14  ;;  %v4940_v5 = vcombine.high %v941_v58, %v945_v60  ;;  %v953_v11 = vld [vmem:[#allocation3 + $0x130] sm:$0xff] }
 0x168   : > { %v714_v29 = vmax.f32 %v676_v17, 0.0  ;;  %v679_v30 = vadd.f32 %v6535_v43, %v678_v28  ;;  %1459 = vmatpush1.bf16.msra.mxu1 %v4929_v19  ;;  %1567 = vmatprep.subr.bf16.mxu0 %v4916_v13  ;;  %v925_v28 = vld [vmem:[#allocation3 + $0x50] sm:$0xff]  ;;  %v954_v13 = vld [vmem:[#allocation3 + $0x138] sm:$0xff] }
 0x169   : > { %v717_v32 = vmax.f32 %v687_v27, 0.0  ;;  %1460 = vmatprep.subr.bf16.mxu1 %v4938_v24 }
 0x16a   : > { %v715_v34 = vmax.f32 %v679_v30, 0.0 }
 0x16b   : > { %v727_v37 = vpack.c.bf16 %v717_v32, %v716_v26  ;;  %v926_v32 = vld [vmem:[#allocation3 + $0x58] sm:$0xff] }
 0x16c   : > { %v726_v38 = vpack.c.bf16 %v715_v34, %v714_v29  ;;  %v5374_v39 = vpop.f32.mrb[12].mxu0  ;;  %1461 = vmatpush1.bf16.msra.mxu1 %v4937_v31  ;;  %v929_v31 = vld [vmem:[#allocation3 + $0x70] sm:$0xff] }
 0x16d   : > { %v700_v41 = vadd.f32 %v5374_v39, %v6535_v43  ;;  %v691_v42 = vpop.f32.mrb[13].mxu0  ;;  %1462 = vmatprep.subr.bf16.mxu1 %v4946_v33  ;;  %v930_v33 = vld [vmem:[#allocation3 + $0x78] sm:$0xff] }
 0x16e   : > { %5392 = vmatprep.mubr.msk.bf16.mxu1 %vm769_vm2, %v726_v38  ;;  %v692_v45 = vadd.f32 %v6535_v43, %v691_v42  ;;  %v5375_v46 = vpop.f32.mrb[14].mxu0  ;;  %v937_v42 = vld [vmem:[#allocation3 + $0xb0] sm:$0xff] }
 0x16f   : > { %5393 = vmatmul.mubr.msk.bf16.gmra.mrb[8].mxu1 %vm769_vm2, %v727_v37  ;;  %v720_v47 = vmax.f32 %v700_v41, 0.0  ;;  %v703_v48 = vadd.f32 %v5375_v46, %v6535_v43  ;;  %v694_v49 = vpop.f32.mrb[15].mxu0  ;;  %v933_v37 = vld [vmem:[#allocation3 + $0x90] sm:$0xff]  ;;  %v4926_v41 = vcombine.high %v926_v32, %v930_v33 }
 0x170   : > { %v718_v50 = vmax.f32 %v692_v45, 0.0  ;;  %v695_v51 = vadd.f32 %v6535_v43, %v694_v49  ;;  %1463 = vmatpush1.bf16.msra.mxu1 %v4945_v40  ;;  %v4962_v43 = vcombine.high %v964_v59, %v968_v61  ;;  %v4924_v40 = vcombine.high %v925_v28, %v929_v31  ;;  %v938_v45 = vld [vmem:[#allocation3 + $0xb8] sm:$0xff] }
 0x171   : > { %v721_v53 = vmax.f32 %v703_v48, 0.0  ;;  %1464 = vmatprep.subr.bf16.mxu1 %v4954_v44  ;;  %v934_v44 = vld [vmem:[#allocation3 + $0x98] sm:$0xff]  ;;  %v4931_v1 = vcombine.low %v933_v37, %v937_v42 }
 0x172   : > { %v719_v54 = vmax.f32 %v695_v51, 0.0  ;;  %v4923_v51 = vcombine.low %v925_v28, %v929_v31  ;;  %v942_v61 = vld [vmem:[#allocation3 + $0xd8] sm:$0xff]  ;;  %v4933_v2 = vcombine.low %v934_v44, %v938_v45 }
 0x173   : > { %v729_v55 = vpack.c.bf16 %v721_v53, %v720_v47  ;;  %v958_v28 = vld [vmem:[#allocation3 + $0x158] sm:$0xff] }
 0x174   : > { %v728_v56 = vpack.c.bf16 %v719_v54, %v718_v50  ;;  %1465 = vmatpush1.bf16.msra.mxu1 %v4953_v52  ;;  %v4925_v52 = vcombine.low %v926_v32, %v930_v33 }
 0x175   : > { %1466 = vmatprep.subr.bf16.mxu1 %v4962_v43 }
 0x176   : > { %5396 = vmatprep.mubr.msk.bf16.mxu1 %vm769_vm2, %v728_v56  ;;  %v4934_v56 = vcombine.high %v934_v44, %v938_v45  ;;  %v969_v45 = vld [vmem:[#allocation3 + $0x1b0] sm:$0xff] }
 0x177   : > { %5397 = vmatmul.mubr.msk.bf16.gmra.mrb[12].mxu1 %vm769_vm2, %v729_v55  ;;  %v4932_v55 = vcombine.high %v933_v37, %v937_v42 }
 0x178   : > { %1467 = vmatpush1.bf16.msra.mxu1 %v4961_v63  ;;  %1486 = vmatprep.mubr.bf16.mxu1 %v6251_v8 }
 0x179   : > { %1468 = vmatprep.subr.bf16.mxu1 %v4970_v7  ;;  %v949_v7 = vld [vmem:[#allocation3 + $0x110] sm:$0xff] }
 0x17a   : > { %v4947_v33 = vcombine.low %v949_v7, %v953_v11 }
 0x17c   : > { %1469 = vmatpush1.bf16.msra.mxu1 %v4969_v6  ;;  %v4942_v6 = vcombine.high %v942_v61, %v946_v62 }
 0x17d   : > { %1680 = vmatprep.subr.bf16.mxu1 %v4918_v16 }
 0x232   : > { %v5386_v19 = vpop.f32.mrb[0].mxu1 }
 0x233   : > { %v837_v21 = vadd.f32 %v5386_v19, %v6569_v18  ;;  %v828_v22 = vpop.f32.mrb[1].mxu1 }
 0x234   : > { %v829_v24 = vadd.f32 %v6569_v18, %v828_v22  ;;  %v5387_v17 = vpop.f32.mrb[2].mxu1  ;;  %v4939_v22 = vcombine.low %v941_v58, %v945_v60  ;;  %v973_v58 = vld [vmem:[#allocation3 + $0x1d0] sm:$0xff] }
 0x235   : > { %v840_v20 = vadd.f32 %v5387_v17, %v6569_v18  ;;  %v831_v23 = vpop.f32.mrb[3].mxu1  ;;  %v893_v26 = vmax.f32 %v837_v21, 0.0  ;;  %v977_v60 = vld [vmem:[#allocation3 + $0x1f0] sm:$0xff] }
 0x236   : > { %v832_v25 = vadd.f32 %v6569_v18, %v831_v23  ;;  %v891_v29 = vmax.f32 %v829_v24, 0.0  ;;  %v4941_v24 = vcombine.low %v942_v61, %v946_v62  ;;  %v974_v61 = vld [vmem:[#allocation3 + $0x1d8] sm:$0xff] }
 0x237   : > { %v894_v27 = vmax.f32 %v840_v20, 0.0  ;;  %v4948_v20 = vcombine.high %v949_v7, %v953_v11  ;;  %v978_v62 = vld [vmem:[#allocation3 + $0x1f8] sm:$0xff] }
 0x238   : > { %v892_v30 = vmax.f32 %v832_v25, 0.0  ;;  %v957_v25 = vld [vmem:[#allocation3 + $0x150] sm:$0xff]  ;;  %v6670_v7 = vld [vmem:[%s7044_s6] sm:$0xff] }
 0x239   : > { %v6575_v34 = vpack.c.bf16 %v894_v27, %v893_v26  ;;  %v961_v27 = vld [vmem:[#allocation3 + $0x170] sm:$0xff] }
 0x23a   : > { %v6577_v35 = vpack.c.bf16 %v892_v30, %v891_v29  ;;  %v5390_v36 = vpop.f32.mrb[4].mxu1  ;;  %v962_v29 = vld [vmem:[#allocation3 + $0x178] sm:$0xff] }
 0x23b   : > { %v853_v38 = vadd.f32 %v5390_v36, %v6569_v18  ;;  %v844_v39 = vpop.f32.mrb[5].mxu1 }
 0x23c   : > { %v845_v46 = vadd.f32 %v6569_v18, %v844_v39  ;;  %1374 = vmatmul.mubr.bf16.vlgmr.msra.gmra.mrb[16].mxu0 %v6577_v35  ;;  %1487 = vmatmul.mubr.bf16.vlgmr.msra.gmra.mrb[16].mxu1 %v6577_v35  ;;  %v5391_v47 = vpop.f32.mrb[6].mxu1  ;;  %v4956_v39 = vcombine.high %v957_v25, %v961_v27 }
 0x23d   : > { %v897_v48 = vmax.f32 %v853_v38, 0.0  ;;  %1568 = vmatpush1.bf16.msra.mxu0 %v4915_v12  ;;  %1681 = vmatpush1.bf16.msra.mxu1 %v4917_v15  ;;  %v856_v49 = vadd.f32 %v5391_v47, %v6569_v18  ;;  %v847_v50 = vpop.f32.mrb[7].mxu1  ;;  %v950_v12 = vld [vmem:[#allocation3 + $0x118] sm:$0xff] }
 0x23e   : > { %v895_v53 = vmax.f32 %v845_v46, 0.0  ;;  %v848_v54 = vadd.f32 %v6569_v18, %v847_v50  ;;  %1383 = vmatprep.mubr.bf16.mxu0 %v6251_v8  ;;  %1496 = vmatprep.mubr.bf16.mxu1 %v6251_v8  ;;  %v4950_v23 = vcombine.high %v950_v12, %v954_v13  ;;  %v4949_v36 = vcombine.low %v950_v12, %v954_v13  ;;  %v966_v46 = vld [vmem:[#allocation3 + $0x198] sm:$0xff] }
 0x23f   : > { %v898_v57 = vmax.f32 %v856_v49, 0.0  ;;  %1569 = vmatprep.subr.bf16.mxu0 %v4924_v40  ;;  %1682 = vmatprep.subr.bf16.mxu1 %v4926_v41  ;;  %v4958_v40 = vcombine.high %v958_v28, %v962_v29  ;;  %v965_v41 = vld [vmem:[#allocation3 + $0x190] sm:$0xff]  ;;  %v970_v47 = vld [vmem:[#allocation3 + $0x1b8] sm:$0xff] }
 0x240   : > { %v896_v59 = vmax.f32 %v848_v54, 0.0  ;;  %v4957_v54 = vcombine.low %v958_v28, %v962_v29 }
 0x241   : > { %v6587_v63 = vpack.c.bf16 %v898_v57, %v897_v48  ;;  %1570 = vmatpush1.bf16.msra.mxu0 %v4923_v51  ;;  %1683 = vmatpush1.bf16.msra.mxu1 %v4925_v52  ;;  %v4966_v57 = vcombine.high %v966_v46, %v970_v47 }
 0x242   : > { %v6589_v43 = vpack.c.bf16 %v896_v59, %v895_v53  ;;  %v5394_v0 = vpop.f32.mrb[8].mxu1  ;;  %1571 = vmatprep.subr.bf16.mxu0 %v4932_v55  ;;  %1684 = vmatprep.subr.bf16.mxu1 %v4934_v56  ;;  %v4955_v53 = vcombine.low %v957_v25, %v961_v27  ;;  %v4964_v56 = vcombine.high %v965_v41, %v969_v45 }
 0x243   : > { %v869_v3 = vadd.f32 %v5394_v0, %v6569_v18  ;;  %v860_v4 = vpop.f32.mrb[9].mxu1 }
 0x244   : > { %1384 = vmatmul.mubr.bf16.gmra.mrb[20].mxu0 %v6575_v34  ;;  %1497 = vmatmul.mubr.bf16.gmra.mrb[20].mxu1 %v6575_v34  ;;  %v861_v9 = vadd.f32 %v6569_v18, %v860_v4  ;;  %v5395_v10 = vpop.f32.mrb[10].mxu1  ;;  %v4974_v4 = vcombine.high %v974_v61, %v978_v62 }
 0x245   : > { %v901_v14 = vmax.f32 %v869_v3, 0.0  ;;  %1393 = vmatprep.mubr.bf16.mxu0 %v6251_v8  ;;  %1506 = vmatprep.mubr.bf16.mxu1 %v6251_v8  ;;  %v872_v15 = vadd.f32 %v5395_v10, %v6569_v18  ;;  %v863_v16 = vpop.f32.mrb[11].mxu1  ;;  %v4965_v3 = vcombine.low %v966_v46, %v970_v47 }
 0x246   : > { %v899_v19 = vmax.f32 %v861_v9, 0.0  ;;  %1572 = vmatpush1.bf16.msra.mxu0 %v4931_v1  ;;  %1685 = vmatpush1.bf16.msra.mxu1 %v4933_v2  ;;  %v864_v21 = vadd.f32 %v6569_v18, %v863_v16  ;;  %v4963_v2 = vcombine.low %v965_v41, %v969_v45 }
 0x247   : > { %v902_v17 = vmax.f32 %v872_v15, 0.0  ;;  %1573 = vmatprep.subr.bf16.mxu0 %v4940_v5  ;;  %1686 = vmatprep.subr.bf16.mxu1 %v4942_v6  ;;  %v4971_v5 = vcombine.low %v973_v58, %v977_v60  ;;  %v4973_v6 = vcombine.low %v974_v61, %v978_v62 }
 0x248   : > { %v900_v26 = vmax.f32 %v864_v21, 0.0 }
 0x249   : > { %v6599_v30 = vpack.c.bf16 %v902_v17, %v901_v14 }
 0x24a   : > { %v6601_v31 = vpack.c.bf16 %v900_v26, %v899_v19  ;;  %1574 = vmatpush1.bf16.msra.mxu0 %v4939_v22  ;;  %1687 = vmatpush1.bf16.msra.mxu1 %v4941_v24  ;;  %v5398_v32 = vpop.f32.mrb[12].mxu1 }
 0x24b   : > { %v885_v37 = vadd.f32 %v5398_v32, %v6569_v18  ;;  %1575 = vmatprep.subr.bf16.mxu0 %v4948_v20  ;;  %1688 = vmatprep.subr.bf16.mxu1 %v4950_v23  ;;  %v876_v38 = vpop.f32.mrb[13].mxu1 }
 0x24c   : > { %1394 = vmatmul.mubr.bf16.gmra.mrb[24].mxu0 %v6589_v43  ;;  %1507 = vmatmul.mubr.bf16.gmra.mrb[24].mxu1 %v6589_v43  ;;  %v877_v42 = vadd.f32 %v6569_v18, %v876_v38  ;;  %v5399_v44 = vpop.f32.mrb[14].mxu1 }
 0x24d   : > { %1403 = vmatprep.mubr.bf16.mxu0 %v6251_v8  ;;  %1516 = vmatprep.mubr.bf16.mxu1 %v6251_v8  ;;  %v905_v48 = vmax.f32 %v885_v37, 0.0  ;;  %v888_v49 = vadd.f32 %v5399_v44, %v6569_v18  ;;  %v879_v50 = vpop.f32.mrb[15].mxu1 }
 0x24e   : > { %v903_v51 = vmax.f32 %v877_v42, 0.0  ;;  %1576 = vmatpush1.bf16.msra.mxu0 %v4947_v33  ;;  %1689 = vmatpush1.bf16.msra.mxu1 %v4949_v36  ;;  %v880_v52 = vadd.f32 %v6569_v18, %v879_v50  ;;  %v4972_v18 = vcombine.high %v973_v58, %v977_v60 }
 0x24f   : > { %v906_v55 = vmax.f32 %v888_v49, 0.0  ;;  %1577 = vmatprep.subr.bf16.mxu0 %v4956_v39  ;;  %1690 = vmatprep.subr.bf16.mxu1 %v4958_v40 }
 0x250   : > { %v904_v59 = vmax.f32 %v880_v52, 0.0 }
 0x251   : > { %v6611_v0 = vpack.c.bf16 %v906_v55, %v905_v48 }
 0x252   : > { %v913_v1 = vpack.c.bf16 %v904_v59, %v903_v51  ;;  %1578 = vmatpush1.bf16.msra.mxu0 %v4955_v53  ;;  %1691 = vmatpush1.bf16.msra.mxu1 %v4957_v54 }
 0x253   : > { %1579 = vmatprep.subr.bf16.mxu0 %v4964_v56  ;;  %1692 = vmatprep.subr.bf16.mxu1 %v4966_v57 }
 0x254   : > { %1404 = vmatmul.mubr.bf16.gmra.mrb[28].mxu0 %v6587_v63  ;;  %1517 = vmatmul.mubr.bf16.gmra.mrb[28].mxu1 %v6587_v63 }
 0x255   : > { %1413 = vmatprep.mubr.bf16.mxu0 %v6251_v8  ;;  %1526 = vmatprep.mubr.bf16.mxu1 %v6251_v8 }
 0x256   : > { %1580 = vmatpush1.bf16.msra.mxu0 %v4963_v2  ;;  %1693 = vmatpush1.bf16.msra.mxu1 %v4965_v3 }
 0x257   : > { %1581 = vmatprep.subr.bf16.mxu0 %v4972_v18  ;;  %1694 = vmatprep.subr.bf16.mxu1 %v4974_v4 }
 0x25a   : > { %1582 = vmatpush1.bf16.msra.mxu0 %v4971_v5  ;;  %1695 = vmatpush1.bf16.msra.mxu1 %v4973_v6 }
 0x25c   : > { %1414 = vmatmul.mubr.bf16.gmra.mrb[32].mxu0 %v6601_v31  ;;  %1527 = vmatmul.mubr.bf16.gmra.mrb[32].mxu1 %v6601_v31 }
 0x25d   : > { %1423 = vmatprep.mubr.bf16.mxu0 %v6251_v8  ;;  %1536 = vmatprep.mubr.bf16.mxu1 %v6251_v8 }
 0x264   : > { %1424 = vmatmul.mubr.bf16.gmra.mrb[36].mxu0 %v6599_v30  ;;  %1537 = vmatmul.mubr.bf16.gmra.mrb[36].mxu1 %v6599_v30 }
 0x265   : > { %1433 = vmatprep.mubr.bf16.mxu0 %v6251_v8  ;;  %1546 = vmatprep.mubr.bf16.mxu1 %v6251_v8 }
 0x26c   : > { %1434 = vmatmul.mubr.bf16.gmra.mrb[40].mxu0 %v913_v1  ;;  %1547 = vmatmul.mubr.bf16.gmra.mrb[40].mxu1 %v913_v1 }
 0x26d   : > { %1443 = vmatprep.mubr.bf16.mxu0 %v6251_v8  ;;  %1556 = vmatprep.mubr.bf16.mxu1 %v6251_v8 }
 0x274   : > { %1444 = vmatmul.mubr.bf16.gmra.mrb[44].mxu0 %v6611_v0  ;;  %1557 = vmatmul.mubr.bf16.gmra.mrb[44].mxu1 %v6611_v0 }
 0x275   : > { %1599 = vmatprep.mubr.bf16.mxu0 %v6251_v8  ;;  %1712 = vmatprep.mubr.bf16.mxu1 %v6251_v8 }
 0x27c   : > { %1600 = vmatmul.mubr.bf16.vlgmr.msra.gmra.mrb[48].mxu0 %v6577_v35  ;;  %1713 = vmatmul.mubr.bf16.vlgmr.msra.gmra.mrb[48].mxu1 %v6577_v35 }
 0x27d   : > { %1609 = vmatprep.mubr.bf16.mxu0 %v6251_v8  ;;  %1722 = vmatprep.mubr.bf16.mxu1 %v6251_v8 }
 0x284   : > { %1610 = vmatmul.mubr.bf16.gmra.mrb[52].mxu0 %v6575_v34  ;;  %1723 = vmatmul.mubr.bf16.gmra.mrb[52].mxu1 %v6575_v34  ;;  %v981_v34 = vlaneseq }
 0x285   : > { %1619 = vmatprep.mubr.bf16.mxu0 %v6251_v8  ;;  %1732 = vmatprep.mubr.bf16.mxu1 %v6251_v8 }
 0x286   : > { %v6659_v35 = vshrl.u32 %v981_v34, 7 }
 0x288   : > { %v6676_v9 = vsub.s32 3, %v6659_v35 }
 0x28a   : > { %v6692_v13 = vrot.slane %v6670_v7, %v6676_v9 }
 0x28c   : > { %1620 = vmatmul.mubr.bf16.gmra.mrb[56].mxu0 %v6589_v43  ;;  %1733 = vmatmul.mubr.bf16.gmra.mrb[56].mxu1 %v6589_v43  ;;  %v6665_v43 = vsub.s32 2, %v6659_v35 }
 0x28d   : > { %1629 = vmatprep.mubr.bf16.mxu0 %v6251_v8  ;;  %1742 = vmatprep.mubr.bf16.mxu1 %v6251_v8 }
 0x28e   : > { %v6684_v11 = vrot.slane %v6670_v7, %v6665_v43 }
 0x294   : > { %1630 = vmatmul.mubr.bf16.gmra.mrb[60].mxu0 %v6587_v63  ;;  %1743 = vmatmul.mubr.bf16.gmra.mrb[60].mxu1 %v6587_v63  ;;  %v6662_v63 = vsub.s32 0, %v6659_v35 }
 0x295   : > { %1639 = vmatprep.mubr.bf16.mxu0 %v6251_v8  ;;  %1752 = vmatprep.mubr.bf16.mxu1 %v6251_v8 }
 0x296   : > { %v6680_v10 = vrot.slane %v6670_v7, %v6662_v63 }
 0x29c   : > { %1640 = vmatmul.mubr.bf16.gmra.mrb[64].mxu0 %v6601_v31  ;;  %1753 = vmatmul.mubr.bf16.gmra.mrb[64].mxu1 %v6601_v31 }
 0x29d   : > { %1649 = vmatprep.mubr.bf16.mxu0 %v6251_v8  ;;  %1762 = vmatprep.mubr.bf16.mxu1 %v6251_v8 }
 0x2a4   : > { %1650 = vmatmul.mubr.bf16.gmra.mrb[68].mxu0 %v6599_v30  ;;  %1763 = vmatmul.mubr.bf16.gmra.mrb[68].mxu1 %v6599_v30 }
 0x2a5   : > { %1659 = vmatprep.mubr.bf16.mxu0 %v6251_v8  ;;  %1772 = vmatprep.mubr.bf16.mxu1 %v6251_v8 }
 0x2ac   : > { %1660 = vmatmul.mubr.bf16.gmra.mrb[72].mxu0 %v913_v1  ;;  %1773 = vmatmul.mubr.bf16.gmra.mrb[72].mxu1 %v913_v1 }
 0x2ad   : > { %1669 = vmatprep.mubr.bf16.mxu0 %v6251_v8  ;;  %1782 = vmatprep.mubr.bf16.mxu1 %v6251_v8  ;;  %v6673_v8 = vsub.s32 1, %v6659_v35 }
 0x2af   : > { %v6688_v12 = vrot.slane %v6670_v7, %v6673_v8 }
 0x2b4   : > { %1670 = vmatmul.mubr.bf16.gmra.mrb[76].mxu0 %v6611_v0  ;;  %1783 = vmatmul.mubr.bf16.gmra.mrb[76].mxu1 %v6611_v0 }
 0x30f   : > { %v1375_v14 = vpop.f32.mrb[16].mxu0  ;;  %v1488_v15 = vpop.f32.mrb[16].mxu1 }
 0x310   : > { %v1376_v16 = vadd.f32 %v1375_v14, %v6680_v10  ;;  %v1489_v19 = vadd.f32 %v1488_v15, %v6684_v11  ;;  %v1377_v21 = vpop.f32.mrb[17].mxu0  ;;  %v1490_v22 = vpop.f32.mrb[17].mxu1 }
 0x311   : > { %v1378_v24 = vadd.f32 %v1377_v21, %v6688_v12  ;;  %v1491_v17 = vadd.f32 %v1490_v22, %v6692_v13  ;;  %v1379_v20 = vpop.f32.mrb[18].mxu0  ;;  %v1492_v23 = vpop.f32.mrb[18].mxu1 }
 0x312   : > { %v1380_v25 = vadd.f32 %v1379_v20, %v6680_v10  ;;  %v1493_v26 = vadd.f32 %v1492_v23, %v6684_v11  ;;  %v1381_v27 = vpop.f32.mrb[19].mxu0  ;;  %v1494_v28 = vpop.f32.mrb[19].mxu1  ;;  %v1793_v31 = vmax.f32 %v1376_v16, 0.0  ;;  %v1795_v32 = vmax.f32 %v1489_v19, 0.0 }
 0x313   : > { %v1382_v29 = vadd.f32 %v1381_v27, %v6688_v12  ;;  %v1495_v30 = vadd.f32 %v1494_v28, %v6692_v13  ;;  %v1794_v37 = vmax.f32 %v1378_v24, 0.0  ;;  %v1796_v38 = vmax.f32 %v1491_v17, 0.0 }
 0x314   : > { %v1801_v33 = vmax.f32 %v1380_v25, 0.0  ;;  %v1803_v36 = vmax.f32 %v1493_v26, 0.0 }
 0x315   : > { %v1802_v39 = vmax.f32 %v1382_v29, 0.0  ;;  %v1804_v40 = vmax.f32 %v1495_v30, 0.0 }
 0x316   : > { %v1922_v41 = vmax.f32 %v1793_v31, %v1801_v33  ;;  %v1964_v42 = vmax.f32 %v1795_v32, %v1803_v36 }
 0x317   : > { %v1943_v44 = vmax.f32 %v1794_v37, %v1802_v39  ;;  %v1985_v45 = vmax.f32 %v1796_v38, %v1804_v40  ;;  %v1385_v46 = vpop.f32.mrb[20].mxu0  ;;  %v1498_v47 = vpop.f32.mrb[20].mxu1 }
 0x318   : > { %v1386_v48 = vadd.f32 %v1385_v46, %v6680_v10  ;;  %v1499_v49 = vadd.f32 %v1498_v47, %v6684_v11  ;;  %v1387_v50 = vpop.f32.mrb[21].mxu0  ;;  %v1500_v51 = vpop.f32.mrb[21].mxu1 }
 0x319   : > { %v1388_v52 = vadd.f32 %v1387_v50, %v6688_v12  ;;  %v1501_v53 = vadd.f32 %v1500_v51, %v6692_v13  ;;  %v1389_v54 = vpop.f32.mrb[22].mxu0  ;;  %v1502_v55 = vpop.f32.mrb[22].mxu1 }
 0x31a   : > { %v1809_v56 = vmax.f32 %v1386_v48, 0.0  ;;  %v1811_v57 = vmax.f32 %v1499_v49, 0.0  ;;  %v1390_v58 = vadd.f32 %v1389_v54, %v6680_v10  ;;  %v1503_v59 = vadd.f32 %v1502_v55, %v6684_v11  ;;  %v1391_v60 = vpop.f32.mrb[23].mxu0  ;;  %v1504_v61 = vpop.f32.mrb[23].mxu1 }
 0x31b   : > { %v1810_v62 = vmax.f32 %v1388_v52, 0.0  ;;  %v1812_v0 = vmax.f32 %v1501_v53, 0.0  ;;  %v1392_v1 = vadd.f32 %v1391_v60, %v6688_v12  ;;  %v1505_v2 = vadd.f32 %v1504_v61, %v6692_v13 }
 0x31c   : > { %v1923_v3 = vmax.f32 %v1922_v41, %v1809_v56  ;;  %v1965_v18 = vmax.f32 %v1964_v42, %v1811_v57  ;;  %v1817_v4 = vmax.f32 %v1390_v58, 0.0  ;;  %v1819_v5 = vmax.f32 %v1503_v59, 0.0 }
 0x31d   : > { %v1944_v6 = vmax.f32 %v1943_v44, %v1810_v62  ;;  %v1986_v34 = vmax.f32 %v1985_v45, %v1812_v0  ;;  %v1818_v14 = vmax.f32 %v1392_v1, 0.0  ;;  %v1820_v15 = vmax.f32 %v1505_v2, 0.0 }
 0x31e   : > { %v1924_v16 = vmax.f32 %v1923_v3, %v1817_v4  ;;  %v1966_v19 = vmax.f32 %v1965_v18, %v1819_v5 }
 0x31f   : > { %v1945_v21 = vmax.f32 %v1944_v6, %v1818_v14  ;;  %v1987_v22 = vmax.f32 %v1986_v34, %v1820_v15  ;;  %v1395_v24 = vpop.f32.mrb[24].mxu0  ;;  %v1508_v17 = vpop.f32.mrb[24].mxu1 }
 0x320   : > { %v1396_v20 = vadd.f32 %v1395_v24, %v6680_v10  ;;  %v1509_v23 = vadd.f32 %v1508_v17, %v6684_v11  ;;  %v1397_v25 = vpop.f32.mrb[25].mxu0  ;;  %v1510_v26 = vpop.f32.mrb[25].mxu1 }
 0x321   : > { %v1398_v27 = vadd.f32 %v1397_v25, %v6688_v12  ;;  %v1511_v28 = vadd.f32 %v1510_v26, %v6692_v13  ;;  %v1399_v29 = vpop.f32.mrb[26].mxu0  ;;  %v1512_v30 = vpop.f32.mrb[26].mxu1 }
 0x322   : > { %v1825_v31 = vmax.f32 %v1396_v20, 0.0  ;;  %v1827_v32 = vmax.f32 %v1509_v23, 0.0  ;;  %v1400_v33 = vadd.f32 %v1399_v29, %v6680_v10  ;;  %v1513_v36 = vadd.f32 %v1512_v30, %v6684_v11  ;;  %v1401_v37 = vpop.f32.mrb[27].mxu0  ;;  %v1514_v38 = vpop.f32.mrb[27].mxu1 }
 0x323   : > { %v1826_v39 = vmax.f32 %v1398_v27, 0.0  ;;  %v1828_v40 = vmax.f32 %v1511_v28, 0.0  ;;  %v1402_v41 = vadd.f32 %v1401_v37, %v6688_v12  ;;  %v1515_v42 = vadd.f32 %v1514_v38, %v6692_v13 }
 0x324   : > { %v1925_v44 = vmax.f32 %v1924_v16, %v1825_v31  ;;  %v1967_v45 = vmax.f32 %v1966_v19, %v1827_v32  ;;  %v1833_v46 = vmax.f32 %v1400_v33, 0.0  ;;  %v1835_v47 = vmax.f32 %v1513_v36, 0.0 }
 0x325   : > { %v1946_v48 = vmax.f32 %v1945_v21, %v1826_v39  ;;  %v1988_v49 = vmax.f32 %v1987_v22, %v1828_v40  ;;  %v1834_v50 = vmax.f32 %v1402_v41, 0.0  ;;  %v1836_v51 = vmax.f32 %v1515_v42, 0.0 }
 0x326   : > { %v1926_v52 = vmax.f32 %v1925_v44, %v1833_v46  ;;  %v1968_v53 = vmax.f32 %v1967_v45, %v1835_v47 }
 0x327   : > { %v1947_v54 = vmax.f32 %v1946_v48, %v1834_v50  ;;  %v1989_v55 = vmax.f32 %v1988_v49, %v1836_v51  ;;  %v1405_v56 = vpop.f32.mrb[28].mxu0  ;;  %v1518_v57 = vpop.f32.mrb[28].mxu1 }
 0x328   : > { %v1406_v58 = vadd.f32 %v1405_v56, %v6680_v10  ;;  %v1519_v59 = vadd.f32 %v1518_v57, %v6684_v11  ;;  %v1407_v60 = vpop.f32.mrb[29].mxu0  ;;  %v1520_v61 = vpop.f32.mrb[29].mxu1 }
 0x329   : > { %v1408_v62 = vadd.f32 %v1407_v60, %v6688_v12  ;;  %v1521_v0 = vadd.f32 %v1520_v61, %v6692_v13  ;;  %v1409_v1 = vpop.f32.mrb[30].mxu0  ;;  %v1522_v2 = vpop.f32.mrb[30].mxu1 }
 0x32a   : > { %v1841_v3 = vmax.f32 %v1406_v58, 0.0  ;;  %v1843_v18 = vmax.f32 %v1519_v59, 0.0  ;;  %v1410_v4 = vadd.f32 %v1409_v1, %v6680_v10  ;;  %v1523_v5 = vadd.f32 %v1522_v2, %v6684_v11  ;;  %v1411_v6 = vpop.f32.mrb[31].mxu0  ;;  %v1524_v34 = vpop.f32.mrb[31].mxu1 }
 0x32b   : > { %v1842_v14 = vmax.f32 %v1408_v62, 0.0  ;;  %v1844_v15 = vmax.f32 %v1521_v0, 0.0  ;;  %v1412_v16 = vadd.f32 %v1411_v6, %v6688_v12  ;;  %v1525_v19 = vadd.f32 %v1524_v34, %v6692_v13 }
 0x32c   : > { %v1927_v21 = vmax.f32 %v1926_v52, %v1841_v3  ;;  %v1969_v22 = vmax.f32 %v1968_v53, %v1843_v18  ;;  %v1849_v24 = vmax.f32 %v1410_v4, 0.0  ;;  %v1851_v17 = vmax.f32 %v1523_v5, 0.0 }
 0x32d   : > { %v1948_v20 = vmax.f32 %v1947_v54, %v1842_v14  ;;  %v1990_v23 = vmax.f32 %v1989_v55, %v1844_v15  ;;  %v1850_v25 = vmax.f32 %v1412_v16, 0.0  ;;  %v1852_v26 = vmax.f32 %v1525_v19, 0.0 }
 0x32e   : > { %v1928_v27 = vmax.f32 %v1927_v21, %v1849_v24  ;;  %v1970_v28 = vmax.f32 %v1969_v22, %v1851_v17 }
 0x32f   : > { %v1949_v29 = vmax.f32 %v1948_v20, %v1850_v25  ;;  %v1991_v30 = vmax.f32 %v1990_v23, %v1852_v26  ;;  %v1415_v31 = vpop.f32.mrb[32].mxu0  ;;  %v1528_v32 = vpop.f32.mrb[32].mxu1 }
 0x330   : > { %v1416_v33 = vadd.f32 %v1415_v31, %v6680_v10  ;;  %v1529_v36 = vadd.f32 %v1528_v32, %v6684_v11  ;;  %v1417_v37 = vpop.f32.mrb[33].mxu0  ;;  %v1530_v38 = vpop.f32.mrb[33].mxu1 }
 0x331   : > { %v1418_v39 = vadd.f32 %v1417_v37, %v6688_v12  ;;  %v1531_v40 = vadd.f32 %v1530_v38, %v6692_v13  ;;  %v1419_v41 = vpop.f32.mrb[34].mxu0  ;;  %v1532_v42 = vpop.f32.mrb[34].mxu1 }
 0x332   : > { %v1857_v44 = vmax.f32 %v1416_v33, 0.0  ;;  %v1859_v45 = vmax.f32 %v1529_v36, 0.0  ;;  %v1420_v46 = vadd.f32 %v1419_v41, %v6680_v10  ;;  %v1533_v47 = vadd.f32 %v1532_v42, %v6684_v11  ;;  %v1421_v48 = vpop.f32.mrb[35].mxu0  ;;  %v1534_v49 = vpop.f32.mrb[35].mxu1 }
 0x333   : > { %v1858_v50 = vmax.f32 %v1418_v39, 0.0  ;;  %v1860_v51 = vmax.f32 %v1531_v40, 0.0  ;;  %v1422_v52 = vadd.f32 %v1421_v48, %v6688_v12  ;;  %v1535_v53 = vadd.f32 %v1534_v49, %v6692_v13 }
 0x334   : > { %v1929_v54 = vmax.f32 %v1928_v27, %v1857_v44  ;;  %v1971_v55 = vmax.f32 %v1970_v28, %v1859_v45  ;;  %v1865_v56 = vmax.f32 %v1420_v46, 0.0  ;;  %v1867_v57 = vmax.f32 %v1533_v47, 0.0 }
 0x335   : > { %v1950_v58 = vmax.f32 %v1949_v29, %v1858_v50  ;;  %v1992_v59 = vmax.f32 %v1991_v30, %v1860_v51  ;;  %v1866_v60 = vmax.f32 %v1422_v52, 0.0  ;;  %v1868_v61 = vmax.f32 %v1535_v53, 0.0 }
 0x336   : > { %v1930_v62 = vmax.f32 %v1929_v54, %v1865_v56  ;;  %v1972_v0 = vmax.f32 %v1971_v55, %v1867_v57  ;;  %v999_v46 = vsub.s32 4, %v6659_v35  ;;  %v1007_v51 = vsub.s32 6, %v6659_v35 }
 0x337   : > { %v1951_v1 = vmax.f32 %v1950_v58, %v1866_v60  ;;  %v1993_v2 = vmax.f32 %v1992_v59, %v1868_v61  ;;  %v1425_v3 = vpop.f32.mrb[36].mxu0  ;;  %v1538_v18 = vpop.f32.mrb[36].mxu1  ;;  %v1003_v52 = vsub.s32 5, %v6659_v35  ;;  %v6252_v57 = vmov 1966171168  }
 0x338   : > { %v1426_v4 = vadd.f32 %v1425_v3, %v6680_v10  ;;  %v1539_v5 = vadd.f32 %v1538_v18, %v6684_v11  ;;  %v1427_v6 = vpop.f32.mrb[37].mxu0  ;;  %v1540_v34 = vpop.f32.mrb[37].mxu1  ;;  %v2103_v58 = vunpack.c.l.s4 %v6252_v57  ;;  %v1011_v59 = vsub.s32 7, %v6659_v35 }
 0x339   : > { %v1428_v14 = vadd.f32 %v1427_v6, %v6688_v12  ;;  %v1541_v15 = vadd.f32 %v1540_v34, %v6692_v13  ;;  %v1429_v16 = vpop.f32.mrb[38].mxu0  ;;  %v1542_v19 = vpop.f32.mrb[38].mxu1 }
 0x33a   : > { %v1873_v21 = vmax.f32 %v1426_v4, 0.0  ;;  %v1875_v22 = vmax.f32 %v1539_v5, 0.0  ;;  %v1430_v24 = vadd.f32 %v1429_v16, %v6680_v10  ;;  %v1543_v17 = vadd.f32 %v1542_v19, %v6684_v11  ;;  %v1431_v20 = vpop.f32.mrb[39].mxu0  ;;  %v1544_v23 = vpop.f32.mrb[39].mxu1 }
 0x33b   : > { %v1874_v25 = vmax.f32 %v1428_v14, 0.0  ;;  %v1876_v26 = vmax.f32 %v1541_v15, 0.0  ;;  %v1432_v27 = vadd.f32 %v1431_v20, %v6688_v12  ;;  %v1545_v28 = vadd.f32 %v1544_v23, %v6692_v13 }
 0x33c   : > { %v1931_v29 = vmax.f32 %v1930_v62, %v1873_v21  ;;  %v1973_v30 = vmax.f32 %v1972_v0, %v1875_v22  ;;  %v1881_v31 = vmax.f32 %v1430_v24, 0.0  ;;  %v1883_v32 = vmax.f32 %v1543_v17, 0.0 }
 0x33d   : > { %v1952_v33 = vmax.f32 %v1951_v1, %v1874_v25  ;;  %v1994_v36 = vmax.f32 %v1993_v2, %v1876_v26  ;;  %v1882_v37 = vmax.f32 %v1432_v27, 0.0  ;;  %v1884_v38 = vmax.f32 %v1545_v28, 0.0 }
 0x33e   : > { %v1932_v39 = vmax.f32 %v1931_v29, %v1881_v31  ;;  %v1974_v40 = vmax.f32 %v1973_v30, %v1883_v32  ;;  %v6757_v27 = vrot.slane %v6670_v7, %v999_v46  ;;  %v6764_v32 = vrot.slane %v6670_v7, %v1007_v51 }
 0x33f   : > { %v1953_v41 = vmax.f32 %v1952_v33, %v1882_v37  ;;  %v1995_v42 = vmax.f32 %v1994_v36, %v1884_v38  ;;  %v1435_v44 = vpop.f32.mrb[40].mxu0  ;;  %v1548_v45 = vpop.f32.mrb[40].mxu1  ;;  %v6769_v33 = vrot.slane %v6670_v7, %v1003_v52 }
 0x340   : > { %v1436_v47 = vadd.f32 %v1435_v44, %v6680_v10  ;;  %v1549_v48 = vadd.f32 %v1548_v45, %v6684_v11  ;;  %v1437_v49 = vpop.f32.mrb[41].mxu0  ;;  %v1550_v50 = vpop.f32.mrb[41].mxu1 }
 0x341   : > { %v1438_v53 = vadd.f32 %v1437_v49, %v6688_v12  ;;  %v1551_v54 = vadd.f32 %v1550_v50, %v6692_v13  ;;  %v1439_v55 = vpop.f32.mrb[42].mxu0  ;;  %v1552_v56 = vpop.f32.mrb[42].mxu1 }
 0x342   : > { %v1889_v60 = vmax.f32 %v1436_v47, 0.0  ;;  %v1891_v61 = vmax.f32 %v1549_v48, 0.0  ;;  %v1440_v62 = vadd.f32 %v1439_v55, %v6680_v10  ;;  %v1553_v0 = vadd.f32 %v1552_v56, %v6684_v11  ;;  %v1441_v1 = vpop.f32.mrb[43].mxu0  ;;  %v1554_v2 = vpop.f32.mrb[43].mxu1 }
 0x343   : > { %v1890_v3 = vmax.f32 %v1438_v53, 0.0  ;;  %v1892_v18 = vmax.f32 %v1551_v54, 0.0  ;;  %v1442_v4 = vadd.f32 %v1441_v1, %v6688_v12  ;;  %v1555_v5 = vadd.f32 %v1554_v2, %v6692_v13 }
 0x344   : > { %v1933_v6 = vmax.f32 %v1932_v39, %v1889_v60  ;;  %v1975_v34 = vmax.f32 %v1974_v40, %v1891_v61  ;;  %v1897_v14 = vmax.f32 %v1440_v62, 0.0  ;;  %v1899_v15 = vmax.f32 %v1553_v0, 0.0 }
 0x345   : > { %v1954_v16 = vmax.f32 %v1953_v41, %v1890_v3  ;;  %v1996_v19 = vmax.f32 %v1995_v42, %v1892_v18  ;;  %v1898_v21 = vmax.f32 %v1442_v4, 0.0  ;;  %v1900_v22 = vmax.f32 %v1555_v5, 0.0 }
 0x346   : > { %v1934_v24 = vmax.f32 %v1933_v6, %v1897_v14  ;;  %v1976_v17 = vmax.f32 %v1975_v34, %v1899_v15  ;;  %v2104_v40 = vunpack.c.0.s8 %v2103_v58  ;;  %v6776_v41 = vrot.slane %v6670_v7, %v1011_v59 }
 0x347   : > { %v1955_v20 = vmax.f32 %v1954_v16, %v1898_v21  ;;  %v1997_v23 = vmax.f32 %v1996_v19, %v1900_v22  ;;  %v1445_v25 = vpop.f32.mrb[44].mxu0  ;;  %v1558_v26 = vpop.f32.mrb[44].mxu1 }
 0x348   : > { %v1446_v28 = vadd.f32 %v1445_v25, %v6680_v10  ;;  %v1559_v29 = vadd.f32 %v1558_v26, %v6684_v11  ;;  %v1447_v30 = vpop.f32.mrb[45].mxu0  ;;  %v1560_v31 = vpop.f32.mrb[45].mxu1 }
 0x349   : > { %v1448_v36 = vadd.f32 %v1447_v30, %v6688_v12  ;;  %v1561_v37 = vadd.f32 %v1560_v31, %v6692_v13  ;;  %v1449_v38 = vpop.f32.mrb[46].mxu0  ;;  %v1562_v39 = vpop.f32.mrb[46].mxu1 }
 0x34a   : > { %v1905_v42 = vmax.f32 %v1446_v28, 0.0  ;;  %v1907_v44 = vmax.f32 %v1559_v29, 0.0  ;;  %v1450_v45 = vadd.f32 %v1449_v38, %v6680_v10  ;;  %v1563_v47 = vadd.f32 %v1562_v39, %v6684_v11  ;;  %v1451_v48 = vpop.f32.mrb[47].mxu0  ;;  %v1564_v49 = vpop.f32.mrb[47].mxu1 }
 0x34b   : > { %v1906_v50 = vmax.f32 %v1448_v36, 0.0  ;;  %v1908_v53 = vmax.f32 %v1561_v37, 0.0  ;;  %v1452_v54 = vadd.f32 %v1451_v48, %v6688_v12  ;;  %v1565_v55 = vadd.f32 %v1564_v49, %v6692_v13 }
 0x34c   : > { %v1935_v56 = vmax.f32 %v1934_v24, %v1905_v42  ;;  %v1977_v57 = vmax.f32 %v1976_v17, %v1907_v44  ;;  %v1913_v58 = vmax.f32 %v1450_v45, 0.0  ;;  %v1915_v60 = vmax.f32 %v1563_v47, 0.0 }
 0x34d   : > { %v1956_v7 = vmax.f32 %v1955_v20, %v1906_v50  ;;  %v1998_v61 = vmax.f32 %v1997_v23, %v1908_v53  ;;  %v1914_v62 = vmax.f32 %v1452_v54, 0.0  ;;  %v1916_v0 = vmax.f32 %v1565_v55, 0.0 }
 0x34e   : > { %v1936_v1 = vmax.f32 %v1935_v56, %v1913_v58  ;;  %v1978_v10 = vmax.f32 %v1977_v57, %v1915_v60  ;;  %v6783_v11 = vsub.s32 %v2104_v40, %v6659_v35  ;;  %v5942_v35 = vld [vmem:[#allocation8 + $0x4] ss:$8 sps:$4 sm:$0xff] (!%p4975_p13)  }
 0x34f   : > { %v1957_v2 = vmax.f32 %v1956_v7, %v1914_v62  ;;  %v1999_v3 = vmax.f32 %v1998_v61, %v1916_v0  ;;  %v1601_v18 = vpop.f32.mrb[48].mxu0  ;;  %v1714_v4 = vpop.f32.mrb[48].mxu1 }
 0x350   : > { %v1937_v12 = vrot.slane %v1936_v1, 4  ;;  %v1979_v5 = vrot.slane %v1978_v10, 4  ;;  %v1602_v13 = vadd.f32 %v1601_v18, %v6757_v27  ;;  %v1715_v6 = vadd.f32 %v1714_v4, %v6764_v32  ;;  %v1603_v34 = vpop.f32.mrb[49].mxu0  ;;  %v1716_v14 = vpop.f32.mrb[49].mxu1 }
 0x351   : > { %v1958_v15 = vrot.slane %v1957_v2, 4  ;;  %v2000_v16 = vrot.slane %v1999_v3, 4  ;;  %v1604_v19 = vadd.f32 %v1603_v34, %v6769_v33  ;;  %v1717_v21 = vadd.f32 %v1716_v14, %v6776_v41  ;;  %v1605_v22 = vpop.f32.mrb[50].mxu0  ;;  %v1718_v24 = vpop.f32.mrb[50].mxu1 }
 0x352   : > { %v1938_v17 = vmax.f32 %v1936_v1, %v1937_v12  ;;  %v1980_v20 = vmax.f32 %v1978_v10, %v1979_v5  ;;  %v1797_v23 = vmax.f32 %v1602_v13, 0.0  ;;  %v1799_v25 = vmax.f32 %v1715_v6, 0.0  ;;  %v1607_v26 = vpop.f32.mrb[51].mxu0  ;;  %v1720_v28 = vpop.f32.mrb[51].mxu1 }
 0x353   : > { %v1959_v29 = vmax.f32 %v1957_v2, %v1958_v15  ;;  %v2001_v30 = vmax.f32 %v1999_v3, %v2000_v16  ;;  %v1798_v31 = vmax.f32 %v1604_v19, 0.0  ;;  %v1800_v36 = vmax.f32 %v1717_v21, 0.0 }
 0x354   : > { %v1939_v37 = vrot.slane %v1938_v17, 2  ;;  %v1981_v38 = vrot.slane %v1980_v20, 2  ;;  %v1606_v39 = vadd.f32 %v1605_v22, %v6757_v27  ;;  %v1719_v40 = vadd.f32 %v1718_v24, %v6764_v32 }
 0x355   : > { %v1960_v42 = vrot.slane %v1959_v29, 2  ;;  %v2002_v44 = vrot.slane %v2001_v30, 2  ;;  %v1608_v45 = vadd.f32 %v1607_v26, %v6769_v33  ;;  %v1721_v47 = vadd.f32 %v1720_v28, %v6776_v41 }
 0x356   : > { %v1940_v48 = vmax.f32 %v1938_v17, %v1939_v37  ;;  %v1982_v49 = vmax.f32 %v1980_v20, %v1981_v38  ;;  %v1805_v50 = vmax.f32 %v1606_v39, 0.0  ;;  %v1807_v53 = vmax.f32 %v1719_v40, 0.0 }
 0x357   : > { %v1961_v54 = vmax.f32 %v1959_v29, %v1960_v42  ;;  %v2003_v55 = vmax.f32 %v2001_v30, %v2002_v44  ;;  %v1806_v56 = vmax.f32 %v1608_v45, 0.0  ;;  %v1808_v57 = vmax.f32 %v1721_v47, 0.0  ;;  %v1611_v58 = vpop.f32.mrb[52].mxu0  ;;  %v1724_v60 = vpop.f32.mrb[52].mxu1 }
 0x358   : > { %v1941_v7 = vrot.slane %v1940_v48, 1  ;;  %v1983_v61 = vrot.slane %v1982_v49, 1  ;;  %v2006_v62 = vmax.f32 %v1797_v23, %v1805_v50  ;;  %v2048_v0 = vmax.f32 %v1799_v25, %v1807_v53  ;;  %v1613_v1 = vpop.f32.mrb[53].mxu0  ;;  %v1726_v10 = vpop.f32.mrb[53].mxu1 }
 0x359   : > { %v1962_v2 = vrot.slane %v1961_v54, 1  ;;  %v2004_v3 = vrot.slane %v2003_v55, 1  ;;  %v2027_v18 = vmax.f32 %v1798_v31, %v1806_v56  ;;  %v2069_v4 = vmax.f32 %v1800_v36, %v1808_v57  ;;  %v1615_v12 = vpop.f32.mrb[54].mxu0  ;;  %v1728_v5 = vpop.f32.mrb[54].mxu1 }
 0x35a   : > { %v1942_v13 = vmax.f32 %v1940_v48, %v1941_v7  ;;  %v1984_v6 = vmax.f32 %v1982_v49, %v1983_v61  ;;  %v1612_v34 = vadd.f32 %v1611_v58, %v6757_v27  ;;  %v1725_v14 = vadd.f32 %v1724_v60, %v6764_v32  ;;  %v1617_v15 = vpop.f32.mrb[55].mxu0  ;;  %v1730_v16 = vpop.f32.mrb[55].mxu1 }
 0x35b   : > { %v1963_v19 = vmax.f32 %v1961_v54, %v1962_v2  ;;  %v2005_v21 = vmax.f32 %v2003_v55, %v2004_v3  ;;  %v1614_v22 = vadd.f32 %v1613_v1, %v6769_v33  ;;  %v1727_v24 = vadd.f32 %v1726_v10, %v6776_v41 }
 0x35c   : > { %v1813_v17 = vmax.f32 %v1612_v34, 0.0  ;;  %v1815_v20 = vmax.f32 %v1725_v14, 0.0  ;;  %v1616_v23 = vadd.f32 %v1615_v12, %v6757_v27  ;;  %v1729_v25 = vadd.f32 %v1728_v5, %v6764_v32 }
 0x35d   : > { %v2098_v26 = vcombine.low %v1942_v13, %v1963_v19  ;;  %v2099_v28 = vcombine.low %v1984_v6, %v2005_v21  ;;  %v1814_v29 = vmax.f32 %v1614_v22, 0.0  ;;  %v1816_v30 = vmax.f32 %v1727_v24, 0.0 }
 0x35e   : > { %v2007_v31 = vmax.f32 %v2006_v62, %v1813_v17  ;;  %v2049_v36 = vmax.f32 %v2048_v0, %v1815_v20  ;;  %v1821_v37 = vmax.f32 %v1616_v23, 0.0  ;;  %v1823_v38 = vmax.f32 %v1729_v25, 0.0 }
 0x35f   : > { %v6800_v39 = vrot.slane %v2098_v26, %v6783_v11  ;;  %v6803_v40 = vrot.slane %v2099_v28, %v6783_v11  ;;  %v2028_v42 = vmax.f32 %v2027_v18, %v1814_v29  ;;  %v2070_v44 = vmax.f32 %v2069_v4, %v1816_v30  ;;  %v1621_v45 = vpop.f32.mrb[56].mxu0  ;;  %v1734_v47 = vpop.f32.mrb[56].mxu1 }
 0x360   : > { %v2008_v48 = vmax.f32 %v2007_v31, %v1821_v37  ;;  %v2050_v49 = vmax.f32 %v2049_v36, %v1823_v38  ;;  %v1618_v50 = vadd.f32 %v1617_v15, %v6769_v33  ;;  %v1731_v53 = vadd.f32 %v1730_v16, %v6776_v41  ;;  %v1623_v54 = vpop.f32.mrb[57].mxu0  ;;  %v1736_v55 = vpop.f32.mrb[57].mxu1 }
 0x361   : > { %v2130_v56 = vcombine.low %v6800_v39, %v6803_v40  ;;  %v1622_v57 = vadd.f32 %v1621_v45, %v6757_v27  ;;  %v1735_v58 = vadd.f32 %v1734_v47, %v6764_v32  ;;  %v1624_v60 = vadd.f32 %v1623_v54, %v6769_v33  ;;  %v1625_v7 = vpop.f32.mrb[58].mxu0  ;;  %v1738_v61 = vpop.f32.mrb[58].mxu1  ;;  %v5564_v39 = vld [vmem:[#allocation6 + $0x224] ss:$16 sps:$4 sm:$0xff] (!%p4975_p13)   ;;  %v5566_v40 = vld [vmem:[#allocation6 + $0x20] ss:$16 sps:$4 sm:$0xff] (!%p4975_p13)  }
 0x362   : > { %v1822_v62 = vmax.f32 %v1618_v50, 0.0  ;;  %v1824_v0 = vmax.f32 %v1731_v53, 0.0  ;;  %v1737_v1 = vadd.f32 %v1736_v55, %v6776_v41  ;;  %v1626_v10 = vadd.f32 %v1625_v7, %v6757_v27  ;;  %v1627_v2 = vpop.f32.mrb[59].mxu0  ;;  %v1740_v3 = vpop.f32.mrb[59].mxu1 }
 0x363   : > { %v1829_v18 = vmax.f32 %v1622_v57, 0.0  ;;  %v1831_v4 = vmax.f32 %v1735_v58, 0.0  ;;  %v1830_v12 = vmax.f32 %v1624_v60, 0.0  ;;  %v1739_v16 = vadd.f32 %v1738_v61, %v6764_v32 }
 0x364   : > { %v2029_v5 = vmax.f32 %v2028_v42, %v1822_v62  ;;  %v2071_v13 = vmax.f32 %v2070_v44, %v1824_v0  ;;  %v1832_v6 = vmax.f32 %v1737_v1, 0.0  ;;  %v1837_v34 = vmax.f32 %v1626_v10, 0.0 }
 0x365   : > { %v2009_v14 = vmax.f32 %v2008_v48, %v1829_v18  ;;  %v2051_v15 = vmax.f32 %v2050_v49, %v1831_v4  ;;  %v1628_v19 = vadd.f32 %v1627_v2, %v6769_v33  ;;  %v1741_v24 = vadd.f32 %v1740_v3, %v6776_v41 }
 0x366   : > { %v2030_v21 = vmax.f32 %v2029_v5, %v1830_v12  ;;  %v2072_v22 = vmax.f32 %v2071_v13, %v1832_v6  ;;  %v1839_v20 = vmax.f32 %v1739_v16, 0.0 }
 0x367   : > { %v2010_v17 = vmax.f32 %v2009_v14, %v1837_v34  ;;  %v1838_v23 = vmax.f32 %v1628_v19, 0.0  ;;  %v1631_v25 = vpop.f32.mrb[60].mxu0  ;;  %v1744_v26 = vpop.f32.mrb[60].mxu1  ;;  %v1840_v28 = vmax.f32 %v1741_v24, 0.0 }
 0x368   : > { %v1632_v29 = vadd.f32 %v1631_v25, %v6757_v27  ;;  %v1745_v30 = vadd.f32 %v1744_v26, %v6764_v32  ;;  %v1633_v31 = vpop.f32.mrb[61].mxu0  ;;  %v1746_v36 = vpop.f32.mrb[61].mxu1  ;;  %v2052_v37 = vmax.f32 %v2051_v15, %v1839_v20 }
 0x369   : > { %v2031_v38 = vmax.f32 %v2030_v21, %v1838_v23  ;;  %v1634_v42 = vadd.f32 %v1633_v31, %v6769_v33  ;;  %v1747_v44 = vadd.f32 %v1746_v36, %v6776_v41  ;;  %v1635_v45 = vpop.f32.mrb[62].mxu0  ;;  %v1748_v47 = vpop.f32.mrb[62].mxu1  ;;  %v2073_v48 = vmax.f32 %v2072_v22, %v1840_v28 }
 0x36a   : > { %v1845_v49 = vmax.f32 %v1632_v29, 0.0  ;;  %v1847_v50 = vmax.f32 %v1745_v30, 0.0  ;;  %v1636_v53 = vadd.f32 %v1635_v45, %v6757_v27  ;;  %v1637_v54 = vpop.f32.mrb[63].mxu0  ;;  %v1750_v55 = vpop.f32.mrb[63].mxu1  ;;  %v1749_v60 = vadd.f32 %v1748_v47, %v6764_v32 }
 0x36b   : > { %v1846_v57 = vmax.f32 %v1634_v42, 0.0  ;;  %v1848_v58 = vmax.f32 %v1747_v44, 0.0  ;;  %v1638_v7 = vadd.f32 %v1637_v54, %v6769_v33  ;;  %v1751_v1 = vadd.f32 %v1750_v55, %v6776_v41 }
 0x36c   : > { %v2011_v61 = vmax.f32 %v2010_v17, %v1845_v49  ;;  %v2053_v62 = vmax.f32 %v2052_v37, %v1847_v50  ;;  %v1853_v0 = vmax.f32 %v1636_v53, 0.0  ;;  %v1855_v3 = vmax.f32 %v1749_v60, 0.0 }
 0x36d   : > { %v2032_v10 = vmax.f32 %v2031_v38, %v1846_v57  ;;  %v2074_v2 = vmax.f32 %v2073_v48, %v1848_v58  ;;  %v1854_v18 = vmax.f32 %v1638_v7, 0.0  ;;  %v1856_v12 = vmax.f32 %v1751_v1, 0.0 }
 0x36e   : > { %v2012_v4 = vmax.f32 %v2011_v61, %v1853_v0  ;;  %v2054_v5 = vmax.f32 %v2053_v62, %v1855_v3 }
 0x36f   : > { %v2033_v13 = vmax.f32 %v2032_v10, %v1854_v18  ;;  %v1641_v6 = vpop.f32.mrb[64].mxu0  ;;  %v1754_v34 = vpop.f32.mrb[64].mxu1  ;;  %v2075_v14 = vmax.f32 %v2074_v2, %v1856_v12 }
 0x370   : > { %v1642_v15 = vadd.f32 %v1641_v6, %v6757_v27  ;;  %v1755_v16 = vadd.f32 %v1754_v34, %v6764_v32  ;;  %v1643_v19 = vpop.f32.mrb[65].mxu0  ;;  %v1756_v21 = vpop.f32.mrb[65].mxu1 }
 0x371   : > { %v1644_v22 = vadd.f32 %v1643_v19, %v6769_v33  ;;  %v1757_v24 = vadd.f32 %v1756_v21, %v6776_v41  ;;  %v1645_v17 = vpop.f32.mrb[66].mxu0  ;;  %v1758_v20 = vpop.f32.mrb[66].mxu1 }
 0x372   : > { %v1861_v23 = vmax.f32 %v1642_v15, 0.0  ;;  %v1863_v25 = vmax.f32 %v1755_v16, 0.0  ;;  %v1646_v26 = vadd.f32 %v1645_v17, %v6757_v27  ;;  %v1759_v28 = vadd.f32 %v1758_v20, %v6764_v32  ;;  %v1647_v29 = vpop.f32.mrb[67].mxu0  ;;  %v1760_v30 = vpop.f32.mrb[67].mxu1 }
 0x373   : > { %v1862_v31 = vmax.f32 %v1644_v22, 0.0  ;;  %v1864_v36 = vmax.f32 %v1757_v24, 0.0  ;;  %v1648_v37 = vadd.f32 %v1647_v29, %v6769_v33  ;;  %v1761_v38 = vadd.f32 %v1760_v30, %v6776_v41 }
 0x374   : > { %v2013_v42 = vmax.f32 %v2012_v4, %v1861_v23  ;;  %v2055_v44 = vmax.f32 %v2054_v5, %v1863_v25  ;;  %v1869_v45 = vmax.f32 %v1646_v26, 0.0  ;;  %v1871_v47 = vmax.f32 %v1759_v28, 0.0 }
 0x375   : > { %v2034_v48 = vmax.f32 %v2033_v13, %v1862_v31  ;;  %v2076_v49 = vmax.f32 %v2075_v14, %v1864_v36  ;;  %v1870_v50 = vmax.f32 %v1648_v37, 0.0  ;;  %v1872_v53 = vmax.f32 %v1761_v38, 0.0 }
 0x376   : > { %v2014_v54 = vmax.f32 %v2013_v42, %v1869_v45  ;;  %v2056_v55 = vmax.f32 %v2055_v44, %v1871_v47 }
 0x377   : > { %v2035_v57 = vmax.f32 %v2034_v48, %v1870_v50  ;;  %v2077_v58 = vmax.f32 %v2076_v49, %v1872_v53  ;;  %v1651_v60 = vpop.f32.mrb[68].mxu0  ;;  %v1764_v7 = vpop.f32.mrb[68].mxu1 }
 0x378   : > { %v1652_v61 = vadd.f32 %v1651_v60, %v6757_v27  ;;  %v1765_v62 = vadd.f32 %v1764_v7, %v6764_v32  ;;  %v1653_v0 = vpop.f32.mrb[69].mxu0  ;;  %v1766_v1 = vpop.f32.mrb[69].mxu1 }
 0x379   : > { %v1654_v10 = vadd.f32 %v1653_v0, %v6769_v33  ;;  %v1767_v2 = vadd.f32 %v1766_v1, %v6776_v41  ;;  %v1655_v3 = vpop.f32.mrb[70].mxu0  ;;  %v1768_v18 = vpop.f32.mrb[70].mxu1 }
 0x37a   : > { %v1877_v4 = vmax.f32 %v1652_v61, 0.0  ;;  %v1879_v12 = vmax.f32 %v1765_v62, 0.0  ;;  %v1656_v5 = vadd.f32 %v1655_v3, %v6757_v27  ;;  %v1769_v13 = vadd.f32 %v1768_v18, %v6764_v32  ;;  %v1657_v6 = vpop.f32.mrb[71].mxu0  ;;  %v1770_v34 = vpop.f32.mrb[71].mxu1 }
 0x37b   : > { %v1878_v14 = vmax.f32 %v1654_v10, 0.0  ;;  %v1880_v15 = vmax.f32 %v1767_v2, 0.0  ;;  %v1658_v16 = vadd.f32 %v1657_v6, %v6769_v33  ;;  %v1771_v19 = vadd.f32 %v1770_v34, %v6776_v41 }
 0x37c   : > { %v2015_v21 = vmax.f32 %v2014_v54, %v1877_v4  ;;  %v2057_v22 = vmax.f32 %v2056_v55, %v1879_v12  ;;  %v1885_v24 = vmax.f32 %v1656_v5, 0.0  ;;  %v1887_v17 = vmax.f32 %v1769_v13, 0.0 }
 0x37d   : > { %v2036_v20 = vmax.f32 %v2035_v57, %v1878_v14  ;;  %v2078_v23 = vmax.f32 %v2077_v58, %v1880_v15  ;;  %v1886_v25 = vmax.f32 %v1658_v16, 0.0  ;;  %v1888_v26 = vmax.f32 %v1771_v19, 0.0 }
 0x37e   : > { %v2016_v28 = vmax.f32 %v2015_v21, %v1885_v24  ;;  %v2058_v29 = vmax.f32 %v2057_v22, %v1887_v17 }
 0x37f   : > { %v2037_v30 = vmax.f32 %v2036_v20, %v1886_v25  ;;  %v2079_v31 = vmax.f32 %v2078_v23, %v1888_v26  ;;  %v1661_v36 = vpop.f32.mrb[72].mxu0  ;;  %v1774_v37 = vpop.f32.mrb[72].mxu1 }
 0x380   : > { %v1662_v38 = vadd.f32 %v1661_v36, %v6757_v27  ;;  %v1775_v42 = vadd.f32 %v1774_v37, %v6764_v32  ;;  %v1663_v44 = vpop.f32.mrb[73].mxu0  ;;  %v1776_v45 = vpop.f32.mrb[73].mxu1 }
 0x381   : > { %v1664_v47 = vadd.f32 %v1663_v44, %v6769_v33  ;;  %v1777_v48 = vadd.f32 %v1776_v45, %v6776_v41  ;;  %v1665_v49 = vpop.f32.mrb[74].mxu0  ;;  %v1778_v50 = vpop.f32.mrb[74].mxu1 }
 0x382   : > { %v1893_v53 = vmax.f32 %v1662_v38, 0.0  ;;  %v1895_v54 = vmax.f32 %v1775_v42, 0.0  ;;  %v1666_v55 = vadd.f32 %v1665_v49, %v6757_v27  ;;  %v1779_v57 = vadd.f32 %v1778_v50, %v6764_v32  ;;  %v1667_v58 = vpop.f32.mrb[75].mxu0  ;;  %v1780_v60 = vpop.f32.mrb[75].mxu1 }
 0x383   : > { %v1894_v7 = vmax.f32 %v1664_v47, 0.0  ;;  %v1896_v61 = vmax.f32 %v1777_v48, 0.0  ;;  %v1668_v62 = vadd.f32 %v1667_v58, %v6769_v33  ;;  %v1781_v0 = vadd.f32 %v1780_v60, %v6776_v41 }
 0x384   : > { %v2017_v1 = vmax.f32 %v2016_v28, %v1893_v53  ;;  %v2059_v10 = vmax.f32 %v2058_v29, %v1895_v54  ;;  %v1901_v2 = vmax.f32 %v1666_v55, 0.0  ;;  %v1903_v3 = vmax.f32 %v1779_v57, 0.0 }
 0x385   : > { %v2038_v18 = vmax.f32 %v2037_v30, %v1894_v7  ;;  %v2080_v4 = vmax.f32 %v2079_v31, %v1896_v61  ;;  %v1902_v12 = vmax.f32 %v1668_v62, 0.0  ;;  %v1904_v5 = vmax.f32 %v1781_v0, 0.0 }
 0x386   : > { %v2018_v13 = vmax.f32 %v2017_v1, %v1901_v2  ;;  %v2060_v6 = vmax.f32 %v2059_v10, %v1903_v3 }
 0x387   : > { %v2039_v34 = vmax.f32 %v2038_v18, %v1902_v12  ;;  %v2081_v14 = vmax.f32 %v2080_v4, %v1904_v5  ;;  %v1671_v15 = vpop.f32.mrb[76].mxu0  ;;  %v1784_v16 = vpop.f32.mrb[76].mxu1 }
 0x388   : > { %v1672_v19 = vadd.f32 %v1671_v15, %v6757_v27  ;;  %v1785_v21 = vadd.f32 %v1784_v16, %v6764_v32  ;;  %v1673_v22 = vpop.f32.mrb[77].mxu0  ;;  %v1786_v24 = vpop.f32.mrb[77].mxu1 }
 0x389   : > { %v1674_v17 = vadd.f32 %v1673_v22, %v6769_v33  ;;  %v1787_v20 = vadd.f32 %v1786_v24, %v6776_v41  ;;  %v1675_v23 = vpop.f32.mrb[78].mxu0  ;;  %v1788_v25 = vpop.f32.mrb[78].mxu1 }
 0x38a   : > { %v1909_v26 = vmax.f32 %v1672_v19, 0.0  ;;  %v1911_v28 = vmax.f32 %v1785_v21, 0.0  ;;  %v1676_v29 = vadd.f32 %v1675_v23, %v6757_v27  ;;  %v1789_v30 = vadd.f32 %v1788_v25, %v6764_v32  ;;  %v1677_v31 = vpop.f32.mrb[79].mxu0  ;;  %v1790_v36 = vpop.f32.mrb[79].mxu1 }
 0x38b   : > { %v1910_v37 = vmax.f32 %v1674_v17, 0.0  ;;  %v1912_v38 = vmax.f32 %v1787_v20, 0.0  ;;  %v1678_v42 = vadd.f32 %v1677_v31, %v6769_v33  ;;  %v1791_v44 = vadd.f32 %v1790_v36, %v6776_v41  ;;  %v5556_v36 = vld [vmem:[#allocation6 + $0x4] ss:$16 sps:$4 sm:$0xff] (!%p4975_p13)  }
 0x38c   : > { %v2019_v45 = vmax.f32 %v2018_v13, %v1909_v26  ;;  %v2061_v47 = vmax.f32 %v2060_v6, %v1911_v28  ;;  %v1917_v48 = vmax.f32 %v1676_v29, 0.0  ;;  %v1919_v49 = vmax.f32 %v1789_v30, 0.0  ;;  %v1921_v29 = vld [vmem:[#allocation2] sm:$0xff]  ;;  %3762 = vmatprep.subr.bf16.mxu1 (!%p4975_p13), %v5556_v36  ;;  %v5632_v36 = vld [vmem:[#allocation6 + $0x180] ss:$16 sps:$4 sm:$0xff] (!%p4975_p13)  }
 0x38d   : > { %v2040_v50 = vmax.f32 %v2039_v34, %v1910_v37  ;;  %v2082_v53 = vmax.f32 %v2081_v14, %v1912_v38  ;;  %v1918_v54 = vmax.f32 %v1678_v42, 0.0  ;;  %v1920_v55 = vmax.f32 %v1791_v44, 0.0  ;;  %v5558_v37 = vld [vmem:[#allocation6 + $0x204] ss:$16 sps:$4 sm:$0xff] (!%p4975_p13)   ;;  %v5560_v38 = vld [vmem:[#allocation6] ss:$16 sps:$4 sm:$0xff] (!%p4975_p13)  }
 0x38e   : > { %v2020_v57 = vmax.f32 %v2019_v45, %v1917_v48  ;;  %v2062_v27 = vmax.f32 %v2061_v47, %v1919_v49  ;;  %v2138_v26 = vrot.slane %v2130_v56, %v6783_v11  ;;  %v5561_v42 = vld [vmem:[#allocation6 + $0x200] ss:$16 sps:$4 sm:$0xff] (!%p4975_p13)   ;;  %3803 = vmatprep.subr.bf16.mxu0 (!%p4975_p13), %v5558_v37  ;;  %v5562_v44 = vld [vmem:[#allocation6 + $0x24] ss:$16 sps:$4 sm:$0xff] (!%p4975_p13)   ;;  %3763 = vmatpush1.bf16.msra.mxu1 (!%p4975_p13), %v5560_v38 }
 0x38f   : > { %v2041_v58 = vmax.f32 %v2040_v50, %v1918_v54  ;;  %v2083_v32 = vmax.f32 %v2082_v53, %v1920_v55  ;;  %3804 = vmatpush1.bf16.msra.mxu0 (!%p4975_p13), %v5561_v42  ;;  %3764 = vmatprep.subr.bf16.mxu1 (!%p4975_p13), %v5562_v44  ;;  %v5568_v56 = vld [vmem:[#allocation6 + $0x44] ss:$16 sps:$4 sm:$0xff] (!%p4975_p13)   ;;  %v5572_v47 = vld [vmem:[#allocation6 + $0x40] ss:$16 sps:$4 sm:$0xff] (!%p4975_p13)  }
 0x390   : > { %v2021_v60 = vrot.slane %v2020_v57, 4  ;;  %v2063_v7 = vrot.slane %v2062_v27, 4  ;;  %3805 = vmatprep.subr.bf16.mxu0 (!%p4975_p13), %v5564_v39  ;;  %v5570_v45 = vld [vmem:[#allocation6 + $0x244] ss:$16 sps:$4 sm:$0xff] (!%p4975_p13)   ;;  %v5573_v48 = vld [vmem:[#allocation6 + $0x240] ss:$16 sps:$4 sm:$0xff] (!%p4975_p13)  }
 0x391   : > { %v2042_v61 = vrot.slane %v2041_v58, 4  ;;  %v2084_v62 = vrot.slane %v2083_v32, 4  ;;  %v5574_v49 = vld [vmem:[#allocation6 + $0x64] ss:$16 sps:$4 sm:$0xff] (!%p4975_p13)   ;;  %v5578_v53 = vld [vmem:[#allocation6 + $0x60] ss:$16 sps:$4 sm:$0xff] (!%p4975_p13)  }
 0x392   : > { %v2022_v0 = vmax.f32 %v2020_v57, %v2021_v60  ;;  %v2064_v33 = vmax.f32 %v2062_v27, %v2063_v7  ;;  %3765 = vmatpush1.bf16.msra.mxu1 (!%p4975_p13), %v5566_v40  ;;  %v5576_v50 = vld [vmem:[#allocation6 + $0x264] ss:$16 sps:$4 sm:$0xff] (!%p4975_p13)   ;;  %v5579_v54 = vld [vmem:[#allocation6 + $0x260] ss:$16 sps:$4 sm:$0xff] (!%p4975_p13)  }
 0x393   : > { %v2043_v1 = vmax.f32 %v2041_v58, %v2042_v61  ;;  %v2085_v41 = vmax.f32 %v2083_v32, %v2084_v62  ;;  %3766 = vmatprep.subr.bf16.mxu1 (!%p4975_p13), %v5568_v56  ;;  %v5580_v55 = vld [vmem:[#allocation6 + $0x84] ss:$16 sps:$4 sm:$0xff] (!%p4975_p13)   ;;  %v5584_v27 = vld [vmem:[#allocation6 + $0x80] ss:$16 sps:$4 sm:$0xff] (!%p4975_p13)  }
 0x394   : > { %v2023_v10 = vrot.slane %v2022_v0, 2  ;;  %v2065_v2 = vrot.slane %v2064_v33, 2  ;;  %v5582_v57 = vld [vmem:[#allocation6 + $0x284] ss:$16 sps:$4 sm:$0xff] (!%p4975_p13)   ;;  %v5585_v58 = vld [vmem:[#allocation6 + $0x280] ss:$16 sps:$4 sm:$0xff] (!%p4975_p13)  }
 0x395   : > { %v2044_v3 = vrot.slane %v2043_v1, 2  ;;  %v2086_v18 = vrot.slane %v2085_v41, 2  ;;  %v5586_v32 = vld [vmem:[#allocation6 + $0xa4] ss:$16 sps:$4 sm:$0xff] (!%p4975_p13)   ;;  %v5590_v7 = vld [vmem:[#allocation6 + $0xa0] ss:$16 sps:$4 sm:$0xff] (!%p4975_p13)  }
 0x396   : > { %v2024_v4 = vmax.f32 %v2022_v0, %v2023_v10  ;;  %v2066_v12 = vmax.f32 %v2064_v33, %v2065_v2  ;;  %3767 = vmatpush1.bf16.msra.mxu1 (!%p4975_p13), %v5572_v47  ;;  %v5588_v60 = vld [vmem:[#allocation6 + $0x2a4] ss:$16 sps:$4 sm:$0xff] (!%p4975_p13)   ;;  %v5591_v61 = vld [vmem:[#allocation6 + $0x2a0] ss:$16 sps:$4 sm:$0xff] (!%p4975_p13)  }
 0x397   : > { %v2045_v5 = vmax.f32 %v2043_v1, %v2044_v3  ;;  %v2087_v13 = vmax.f32 %v2085_v41, %v2086_v18  ;;  %3768 = vmatprep.subr.bf16.mxu1 (!%p4975_p13), %v5574_v49  ;;  %v5592_v62 = vld [vmem:[#allocation6 + $0xc4] ss:$16 sps:$4 sm:$0xff] (!%p4975_p13)   ;;  %v5596_v33 = vld [vmem:[#allocation6 + $0xc0] ss:$16 sps:$4 sm:$0xff] (!%p4975_p13)  }
 0x398   : > { %v2025_v6 = vrot.slane %v2024_v4, 1  ;;  %v2067_v34 = vrot.slane %v2066_v12, 1  ;;  %v5594_v0 = vld [vmem:[#allocation6 + $0x2c4] ss:$16 sps:$4 sm:$0xff] (!%p4975_p13)   ;;  %v5597_v1 = vld [vmem:[#allocation6 + $0x2c0] ss:$16 sps:$4 sm:$0xff] (!%p4975_p13)  }
 0x399   : > { %v2046_v14 = vrot.slane %v2045_v5, 1  ;;  %v2088_v15 = vrot.slane %v2087_v13, 1  ;;  %v5598_v41 = vld [vmem:[#allocation6 + $0xe4] ss:$16 sps:$4 sm:$0xff] (!%p4975_p13)   ;;  %v5602_v2 = vld [vmem:[#allocation6 + $0xe0] ss:$16 sps:$4 sm:$0xff] (!%p4975_p13)  }
 0x39a   : > { %v2026_v16 = vmax.f32 %v2024_v4, %v2025_v6  ;;  %v2068_v19 = vmax.f32 %v2066_v12, %v2067_v34  ;;  %3769 = vmatpush1.bf16.msra.mxu1 (!%p4975_p13), %v5578_v53  ;;  %v5600_v10 = vld [vmem:[#allocation6 + $0x2e4] ss:$16 sps:$4 sm:$0xff] (!%p4975_p13)   ;;  %v5603_v3 = vld [vmem:[#allocation6 + $0x2e0] ss:$16 sps:$4 sm:$0xff] (!%p4975_p13)  }
 0x39b   : > { %v2047_v21 = vmax.f32 %v2045_v5, %v2046_v14  ;;  %v2089_v22 = vmax.f32 %v2087_v13, %v2088_v15  ;;  %3770 = vmatprep.subr.bf16.mxu1 (!%p4975_p13), %v5580_v55  ;;  %v5604_v18 = vld [vmem:[#allocation6 + $0x104] ss:$16 sps:$4 sm:$0xff] (!%p4975_p13)   ;;  %v5608_v12 = vld [vmem:[#allocation6 + $0x100] ss:$16 sps:$4 sm:$0xff] (!%p4975_p13)  }
 0x39c   : > { %v5606_v4 = vld [vmem:[#allocation6 + $0x304] ss:$16 sps:$4 sm:$0xff] (!%p4975_p13)   ;;  %v5609_v5 = vld [vmem:[#allocation6 + $0x300] ss:$16 sps:$4 sm:$0xff] (!%p4975_p13)  }
 0x39d   : > { %v2100_v24 = vcombine.low %v2026_v16, %v2047_v21  ;;  %v2101_v17 = vcombine.low %v2068_v19, %v2089_v22  ;;  %v5610_v13 = vld [vmem:[#allocation6 + $0x124] ss:$16 sps:$4 sm:$0xff] (!%p4975_p13)   ;;  %v5614_v34 = vld [vmem:[#allocation6 + $0x120] ss:$16 sps:$4 sm:$0xff] (!%p4975_p13)  }
 0x39e   : > { %3771 = vmatpush1.bf16.msra.mxu1 (!%p4975_p13), %v5584_v27  ;;  %v5612_v6 = vld [vmem:[#allocation6 + $0x324] ss:$16 sps:$4 sm:$0xff] (!%p4975_p13)   ;;  %v5615_v14 = vld [vmem:[#allocation6 + $0x320] ss:$16 sps:$4 sm:$0xff] (!%p4975_p13)  }
 0x39f   : > { %v2122_v20 = vrot.slane %v2100_v24, %v6783_v11  ;;  %v2129_v23 = vrot.slane %v2101_v17, %v6783_v11  ;;  %3772 = vmatprep.subr.bf16.mxu1 (!%p4975_p13), %v5586_v32  ;;  %v5616_v15 = vld [vmem:[#allocation6 + $0x144] ss:$16 sps:$4 sm:$0xff] (!%p4975_p13)   ;;  %v5620_v19 = vld [vmem:[#allocation6 + $0x140] ss:$16 sps:$4 sm:$0xff] (!%p4975_p13)  }
 0x3a0   : > { %v5618_v16 = vld [vmem:[#allocation6 + $0x344] ss:$16 sps:$4 sm:$0xff] (!%p4975_p13)   ;;  %v5621_v21 = vld [vmem:[#allocation6 + $0x340] ss:$16 sps:$4 sm:$0xff] (!%p4975_p13)  }
 0x3a1   : > { %v2131_v25 = vcombine.low %v2122_v20, %v2129_v23  ;;  %v5622_v22 = vld [vmem:[#allocation6 + $0x164] ss:$16 sps:$4 sm:$0xff] (!%p4975_p13)   ;;  %v5626_v20 = vld [vmem:[#allocation6 + $0x160] ss:$16 sps:$4 sm:$0xff] (!%p4975_p13)  }
 0x3a2   : > { %3773 = vmatpush1.bf16.msra.mxu1 (!%p4975_p13), %v5590_v7  ;;  %v5624_v24 = vld [vmem:[#allocation6 + $0x364] ss:$16 sps:$4 sm:$0xff] (!%p4975_p13)   ;;  %v5633_v37 = vld [vmem:[#allocation6 + $0x380] ss:$16 sps:$4 sm:$0xff] (!%p4975_p13)   ;;  %v5655_v7 = vld [vmem:[#allocation6 + $0x8] ss:$16 sps:$4 sm:$0xff] (!%p4975_p13)  }
 0x3a3   : > { %v2145_v28 = vrot.slane %v2131_v25, %v6783_v11  ;;  %2153 = sbr.rel (%p4975_p13) target bundleno = 1887 (0x75f), region = 92  ;;  %v5567_v11 = vld [vmem:[#allocation6 + $0x220] ss:$16 sps:$4 sm:$0xff] (!%p4975_p13)   ;;  %3774 = vmatprep.subr.bf16.mxu1 (!%p4975_p13), %v5592_v62  ;;  %v5634_v38 = vld [vmem:[#allocation6 + $0x1a4] ss:$16 sps:$4 sm:$0xff] (!%p4975_p13)  }
 0x3a4   : > { %3806 = vmatpush1.bf16.msra.mxu0 (!%p4975_p13), %v5567_v11  ;;  %v5636_v42 = vld [vmem:[#allocation6 + $0x3a4] ss:$16 sps:$4 sm:$0xff] (!%p4975_p13)   ;;  %v5638_v44 = vld [vmem:[#allocation6 + $0x1a0] ss:$16 sps:$4 sm:$0xff] (!%p4975_p13)   ;;  %v5663_v62 = vld [vmem:[#allocation6 + $0x2c] ss:$16 sps:$4 sm:$0xff] (!%p4975_p13)  }
 0x3a5   : > { %v2146_v30 = vcombine.low %v2138_v26, %v2145_v28  ;;  %3807 = vmatprep.subr.bf16.mxu0 (!%p4975_p13), %v5570_v45  ;;  %v5627_v26 = vld [vmem:[#allocation6 + $0x360] ss:$16 sps:$4 sm:$0xff] (!%p4975_p13)   ;;  %v5628_v28 = vld [vmem:[#allocation6 + $0x184] ss:$16 sps:$4 sm:$0xff] (!%p4975_p13)  }
 0x3a6   : > { %3775 = vmatpush1.bf16.msra.mxu1 (!%p4975_p13), %v5596_v33  ;;  %v5639_v39 = vld [vmem:[#allocation6 + $0x3a0] ss:$16 sps:$4 sm:$0xff] (!%p4975_p13)   ;;  %v5640_v40 = vld [vmem:[#allocation6 + $0x1c4] ss:$16 sps:$4 sm:$0xff] (!%p4975_p13)  }
 0x3a7   : > { %v2148_v31 = vmax.f32 %v1921_v29, %v2146_v30  ;;  %3776 = vmatprep.subr.bf16.mxu1 (!%p4975_p13), %v5598_v41  ;;  %v5630_v29 = vld [vmem:[#allocation6 + $0x384] ss:$16 sps:$4 sm:$0xff] (!%p4975_p13)   ;;  %v5644_v56 = vld [vmem:[#allocation6 + $0x1c0] ss:$16 sps:$4 sm:$0xff] (!%p4975_p13)   ;;  %v5669_v41 = vld [vmem:[#allocation6 + $0x4c] ss:$16 sps:$4 sm:$0xff] (!%p4975_p13)  }
 0x3a8   : > { %3808 = vmatpush1.bf16.msra.mxu0 (!%p4975_p13), %v5573_v48  ;;  %v5642_v11 = vld [vmem:[#allocation6 + $0x3c4] ss:$16 sps:$4 sm:$0xff] (!%p4975_p13)   ;;  %v5645_v45 = vld [vmem:[#allocation6 + $0x3c0] ss:$16 sps:$4 sm:$0xff] (!%p4975_p13)  }
 0x3a9   : > { %2149 = vst [vmem:[#allocation2] sm:$0xff] %v2148_v31  ;;  %3809 = vmatprep.subr.bf16.mxu0 (!%p4975_p13), %v5576_v50  ;;  %v5646_v47 = vld [vmem:[#allocation6 + $0x1e4] ss:$16 sps:$4 sm:$0xff] (!%p4975_p13)   ;;  %v5650_v49 = vld [vmem:[#allocation6 + $0x1e0] ss:$16 sps:$4 sm:$0xff] (!%p4975_p13)  }
 0x3aa   : > { %3777 = vmatpush1.bf16.msra.mxu1 %v5602_v2  ;;  %v5648_v48 = vld [vmem:[#allocation6 + $0x3e4] ss:$16 sps:$4 sm:$0xff]   ;;  %v5652_v32 = vld [vmem:[#allocation6 + $0x400] ss:$16 sps:$4 sm:$0xff]   ;;  %v5667_v2 = vld [vmem:[#allocation6 + $0x48] ss:$16 sps:$4 sm:$0xff]  }
 0x3ab   : > { %3778 = vmatprep.subr.bf16.mxu1 %v5604_v18  ;;  %v5654_v55 = vld [vmem:[#allocation6 + $0x404] ss:$16 sps:$4 sm:$0xff]   ;;  %v5658_v33 = vld [vmem:[#allocation6 + $0x420] ss:$16 sps:$4 sm:$0xff]   ;;  %v5675_v18 = vld [vmem:[#allocation6 + $0x6c] ss:$16 sps:$4 sm:$0xff]  }
 0x3ac   : > { %3810 = vmatpush1.bf16.msra.mxu0 %v5579_v54  ;;  %v5651_v54 = vld [vmem:[#allocation6 + $0x3e0] ss:$16 sps:$4 sm:$0xff]  }
 0x3ad   : > { %3811 = vmatprep.subr.bf16.mxu0 %v5582_v57  ;;  %v5657_v57 = vld [vmem:[#allocation6 + $0xc] ss:$16 sps:$4 sm:$0xff]  }
 0x3ae   : > { %3779 = vmatpush1.bf16.msra.mxu1 %v5608_v12  ;;  %v5673_v12 = vld [vmem:[#allocation6 + $0x68] ss:$16 sps:$4 sm:$0xff]  }
 0x3af   : > { %3780 = vmatprep.subr.bf16.mxu1 %v5610_v13  ;;  %v5681_v13 = vld [vmem:[#allocation6 + $0x8c] ss:$16 sps:$4 sm:$0xff]  }
 0x3b0   : > { %3812 = vmatpush1.bf16.msra.mxu0 %v5585_v58  ;;  %v6865_v17 = vld [vmem:[#allocation2] sm:$0xff] }
 0x3b1   : > { %3813 = vmatprep.subr.bf16.mxu0 %v5588_v60  ;;  %v2163_v23 = vrot.slane %v6865_v17, %v6673_v8  ;;  %v2171_v25 = vrot.slane %v6865_v17, %v6676_v9  ;;  %v2159_v50 = vrot.slane %v6865_v17, %v6662_v63  ;;  %v2167_v53 = vrot.slane %v6865_v17, %v6665_v43 }
 0x3b2   : > { %3781 = vmatpush1.bf16.msra.mxu1 %v5614_v34  ;;  %v2179_v27 = vrot.slane %v6865_v17, %v1003_v52  ;;  %v5661_v52 = vld [vmem:[#allocation6 + $0x28] ss:$16 sps:$4 sm:$0xff]  }
 0x3b3   : > { %3782 = vmatprep.subr.bf16.mxu1 %v5616_v15  ;;  %v2197_v30 = vpack.c.bf16 %v2163_v23, %v2163_v23  ;;  %v6871_v31 = vpack.c.bf16 %v2171_v25, %v2171_v25  ;;  %v6881_v58 = vpack.c.bf16 %v2159_v50, %v2159_v50  ;;  %v6883_v60 = vpack.c.bf16 %v2167_v53, %v2167_v53  ;;  %v5679_v34 = vld [vmem:[#allocation6 + $0x88] ss:$16 sps:$4 sm:$0xff]   ;;  %v5687_v15 = vld [vmem:[#allocation6 + $0xac] ss:$16 sps:$4 sm:$0xff]   ;;  %v5696_v23 = vld [vmem:[#allocation6 + $0x4e4] ss:$16 sps:$4 sm:$0xff]  }
 0x3b4   : > { %3814 = vmatpush1.bf16.msra.mxu0 %v5591_v61  ;;  %v5660_v61 = vld [vmem:[#allocation6 + $0x424] ss:$16 sps:$4 sm:$0xff]   ;;  %v5699_v25 = vld [vmem:[#allocation6 + $0xec] ss:$16 sps:$4 sm:$0xff]   ;;  %v5721_v50 = vld [vmem:[#allocation6 + $0x168] ss:$16 sps:$4 sm:$0xff]  }
 0x3b5   : > { %3815 = vmatprep.subr.bf16.mxu0 %v5594_v0  ;;  %3794 = vmatprep.mubr.bf16.mxu1 %v2197_v30  ;;  %v6885_v0 = vpack.c.bf16 %v2179_v27, %v2179_v27  ;;  %v5726_v53 = vld [vmem:[#allocation6 + $0x584] ss:$16 sps:$4 sm:$0xff]  }
 0x3b6   : > { %3783 = vmatpush1.bf16.msra.mxu1 %v5620_v19  ;;  %3835 = vmatprep.mubr.bf16.mxu0 %v6871_v31  ;;  %v5685_v19 = vld [vmem:[#allocation6 + $0xa8] ss:$16 sps:$4 sm:$0xff]   ;;  %v5732_v27 = vld [vmem:[#allocation6 + $0x5a4] ss:$16 sps:$4 sm:$0xff]  }
 0x3b7   : > { %3784 = vmatprep.subr.bf16.mxu1 %v5622_v22  ;;  %v5693_v22 = vld [vmem:[#allocation6 + $0xcc] ss:$16 sps:$4 sm:$0xff]  }
 0x3b8   : > { %3816 = vmatpush1.bf16.msra.mxu0 %v5597_v1  ;;  %v5666_v1 = vld [vmem:[#allocation6 + $0x444] ss:$16 sps:$4 sm:$0xff]  }
 0x3b9   : > { %3817 = vmatprep.subr.bf16.mxu0 %v5600_v10  ;;  %v5664_v10 = vld [vmem:[#allocation6 + $0x440] ss:$16 sps:$4 sm:$0xff]  }
 0x3ba   : > { %3785 = vmatpush1.bf16.msra.mxu1 %v5626_v20  ;;  %v5691_v20 = vld [vmem:[#allocation6 + $0xc8] ss:$16 sps:$4 sm:$0xff]  }
 0x3bb   : > { %3786 = vmatprep.subr.bf16.mxu1 %v5628_v28  ;;  %v5697_v28 = vld [vmem:[#allocation6 + $0xe8] ss:$16 sps:$4 sm:$0xff]  }
 0x3bc   : > { %3818 = vmatpush1.bf16.msra.mxu0 %v5603_v3  ;;  %v5672_v3 = vld [vmem:[#allocation6 + $0x464] ss:$16 sps:$4 sm:$0xff]  }
 0x3bd   : > { %3819 = vmatprep.subr.bf16.mxu0 %v5606_v4  ;;  %v5670_v4 = vld [vmem:[#allocation6 + $0x460] ss:$16 sps:$4 sm:$0xff]  }
 0x3be   : > { %3787 = vmatpush1.bf16.msra.mxu1 %v5632_v36  ;;  %v5700_v36 = vld [vmem:[#allocation6 + $0x500] ss:$16 sps:$4 sm:$0xff]  }
 0x3bf   : > { %3788 = vmatprep.subr.bf16.mxu1 %v5634_v38  ;;  %v5708_v38 = vld [vmem:[#allocation6 + $0x524] ss:$16 sps:$4 sm:$0xff]  }
 0x3c0   : > { %3820 = vmatpush1.bf16.msra.mxu0 %v5609_v5  ;;  %v5678_v5 = vld [vmem:[#allocation6 + $0x484] ss:$16 sps:$4 sm:$0xff]  }
 0x3c1   : > { %3821 = vmatprep.subr.bf16.mxu0 %v5612_v6  ;;  %v5676_v6 = vld [vmem:[#allocation6 + $0x480] ss:$16 sps:$4 sm:$0xff]  }
 0x3c2   : > { %3789 = vmatpush1.bf16.msra.mxu1 %v5638_v44  ;;  %v5706_v44 = vld [vmem:[#allocation6 + $0x520] ss:$16 sps:$4 sm:$0xff]  }
 0x3c3   : > { %3790 = vmatprep.subr.bf16.mxu1 %v5640_v40  ;;  %v5714_v40 = vld [vmem:[#allocation6 + $0x544] ss:$16 sps:$4 sm:$0xff]  }
 0x3c4   : > { %3822 = vmatpush1.bf16.msra.mxu0 %v5615_v14  ;;  %v5684_v14 = vld [vmem:[#allocation6 + $0x4a4] ss:$16 sps:$4 sm:$0xff]  }
 0x3c5   : > { %3823 = vmatprep.subr.bf16.mxu0 %v5618_v16  ;;  %v5682_v16 = vld [vmem:[#allocation6 + $0x4a0] ss:$16 sps:$4 sm:$0xff]  }
 0x3c6   : > { %3791 = vmatpush1.bf16.msra.mxu1 %v5644_v56  ;;  %v5712_v56 = vld [vmem:[#allocation6 + $0x540] ss:$16 sps:$4 sm:$0xff]  }
 0x3c7   : > { %3792 = vmatprep.subr.bf16.mxu1 %v5646_v47  ;;  %v5720_v47 = vld [vmem:[#allocation6 + $0x564] ss:$16 sps:$4 sm:$0xff]  }
 0x3c8   : > { %3824 = vmatpush1.bf16.msra.mxu0 %v5621_v21  ;;  %v5690_v21 = vld [vmem:[#allocation6 + $0x4c4] ss:$16 sps:$4 sm:$0xff]  }
 0x3c9   : > { %3825 = vmatprep.subr.bf16.mxu0 %v5624_v24  ;;  %v5688_v24 = vld [vmem:[#allocation6 + $0x4c0] ss:$16 sps:$4 sm:$0xff]  }
 0x3ca   : > { %3793 = vmatpush1.bf16.msra.mxu1 %v5650_v49  ;;  %v5718_v49 = vld [vmem:[#allocation6 + $0x560] ss:$16 sps:$4 sm:$0xff]  }
 0x3cb   : > { %3926 = vmatprep.subr.bf16.mxu1 %v5657_v57  ;;  %v5727_v57 = vld [vmem:[#allocation6 + $0x188] ss:$16 sps:$4 sm:$0xff]  }
 0x3cc   : > { %3826 = vmatpush1.bf16.msra.mxu0 %v5627_v26  ;;  %v5694_v26 = vld [vmem:[#allocation6 + $0x4e0] ss:$16 sps:$4 sm:$0xff]  }
 0x3cd   : > { %3827 = vmatprep.subr.bf16.mxu0 %v5630_v29  ;;  %3795 = vmatmul.mubr.bf16.vlgmr.msra.gmra.mrb[0].mxu1 %v6881_v58  ;;  %v5702_v29 = vld [vmem:[#allocation6 + $0x504] ss:$16 sps:$4 sm:$0xff]  }
 0x3ce   : > { %3927 = vmatpush1.bf16.msra.mxu1 %v5655_v7  ;;  %3958 = vmatprep.mubr.bf16.mxu1 %v2197_v30  ;;  %v5705_v30 = vld [vmem:[#allocation6 + $0x10c] ss:$16 sps:$4 sm:$0xff]   ;;  %v5730_v7 = vld [vmem:[#allocation6 + $0x5a0] ss:$16 sps:$4 sm:$0xff]  }
 0x3cf   : > { %3928 = vmatprep.subr.bf16.mxu1 %v5663_v62  ;;  %v5738_v62 = vld [vmem:[#allocation6 + $0x5c4] ss:$16 sps:$4 sm:$0xff]  }
 0x3d0   : > { %3828 = vmatpush1.bf16.msra.mxu0 %v5633_v37  ;;  %v5703_v37 = vld [vmem:[#allocation6 + $0x108] ss:$16 sps:$4 sm:$0xff]  }
 0x3d1   : > { %3829 = vmatprep.subr.bf16.mxu0 %v5636_v42  ;;  %v5711_v42 = vld [vmem:[#allocation6 + $0x12c] ss:$16 sps:$4 sm:$0xff]  }
 0x3d2   : > { %3929 = vmatpush1.bf16.msra.mxu1 %v5661_v52  ;;  %v5736_v52 = vld [vmem:[#allocation6 + $0x5c0] ss:$16 sps:$4 sm:$0xff]  }
 0x3d3   : > { %3930 = vmatprep.subr.bf16.mxu1 %v5669_v41  ;;  %v5744_v41 = vld [vmem:[#allocation6 + $0x5e4] ss:$16 sps:$4 sm:$0xff]  }
 0x3d4   : > { %3830 = vmatpush1.bf16.msra.mxu0 %v5639_v39  ;;  %v5709_v39 = vld [vmem:[#allocation6 + $0x128] ss:$16 sps:$4 sm:$0xff]  }
 0x3d5   : > { %3831 = vmatprep.subr.bf16.mxu0 %v5642_v11  ;;  %v5717_v11 = vld [vmem:[#allocation6 + $0x14c] ss:$16 sps:$4 sm:$0xff]  }
 0x3d6   : > { %3931 = vmatpush1.bf16.msra.mxu1 %v5667_v2  ;;  %v5742_v2 = vld [vmem:[#allocation6 + $0x5e0] ss:$16 sps:$4 sm:$0xff]  }
 0x3d7   : > { %3932 = vmatprep.subr.bf16.mxu1 %v5675_v18  ;;  %v5745_v18 = vld [vmem:[#allocation6 + $0x1e8] ss:$16 sps:$4 sm:$0xff]  }
 0x3d8   : > { %3832 = vmatpush1.bf16.msra.mxu0 %v5645_v45  ;;  %v5715_v45 = vld [vmem:[#allocation6 + $0x148] ss:$16 sps:$4 sm:$0xff]  }
 0x3d9   : > { %3833 = vmatprep.subr.bf16.mxu0 %v5648_v48  ;;  %v5723_v48 = vld [vmem:[#allocation6 + $0x16c] ss:$16 sps:$4 sm:$0xff]  }
 0x3da   : > { %3933 = vmatpush1.bf16.msra.mxu1 %v5673_v12  ;;  %v5753_v12 = vld [vmem:[#allocation6 + $0x20c] ss:$16 sps:$4 sm:$0xff]  }
 0x3db   : > { %3934 = vmatprep.subr.bf16.mxu1 %v5681_v13  ;;  %v5748_v13 = vld [vmem:[#allocation6 + $0x600] ss:$16 sps:$4 sm:$0xff]  }
 0x3dc   : > { %3834 = vmatpush1.bf16.msra.mxu0 %v5651_v54  ;;  %v5729_v54 = vld [vmem:[#allocation6 + $0x18c] ss:$16 sps:$4 sm:$0xff]  }
 0x3dd   : > { %3844 = vmatprep.subr.bf16.mxu0 %v5654_v55  ;;  %v5724_v55 = vld [vmem:[#allocation6 + $0x580] ss:$16 sps:$4 sm:$0xff]  }
 0x3de   : > { %3935 = vmatpush1.bf16.msra.mxu1 %v5679_v34  ;;  %v5751_v34 = vld [vmem:[#allocation6 + $0x208] ss:$16 sps:$4 sm:$0xff]  }
 0x3df   : > { %3836 = vmatmul.mubr.bf16.vlgmr.msra.gmra.mrb[0].mxu0 %v6883_v60  ;;  %3936 = vmatprep.subr.bf16.mxu1 %v5687_v15 }
 0x3e0   : > { %3845 = vmatpush1.bf16.msra.mxu0 %v5652_v32  ;;  %3876 = vmatprep.mubr.bf16.mxu0 %v6885_v0  ;;  %v5735_v32 = vld [vmem:[#allocation6 + $0x1ac] ss:$16 sps:$4 sm:$0xff]  }
 0x3e1   : > { %3846 = vmatprep.subr.bf16.mxu0 %v5660_v61  ;;  %v5733_v61 = vld [vmem:[#allocation6 + $0x1a8] ss:$16 sps:$4 sm:$0xff]  }
 0x3e2   : > { %3937 = vmatpush1.bf16.msra.mxu1 %v5685_v19  ;;  %v5765_v19 = vld [vmem:[#allocation6 + $0x24c] ss:$16 sps:$4 sm:$0xff]  }
 0x3e3   : > { %3938 = vmatprep.subr.bf16.mxu1 %v5693_v22  ;;  %v5763_v22 = vld [vmem:[#allocation6 + $0x248] ss:$16 sps:$4 sm:$0xff]  }
 0x3e4   : > { %3847 = vmatpush1.bf16.msra.mxu0 %v5658_v33  ;;  %v5741_v33 = vld [vmem:[#allocation6 + $0x1cc] ss:$16 sps:$4 sm:$0xff]  }
 0x3e5   : > { %3848 = vmatprep.subr.bf16.mxu0 %v5666_v1  ;;  %v5739_v1 = vld [vmem:[#allocation6 + $0x1c8] ss:$16 sps:$4 sm:$0xff]  }
 0x3e6   : > { %3939 = vmatpush1.bf16.msra.mxu1 %v5691_v20  ;;  %v5766_v20 = vld [vmem:[#allocation6 + $0x660] ss:$16 sps:$4 sm:$0xff]  }
 0x3e7   : > { %3940 = vmatprep.subr.bf16.mxu1 %v5699_v25  ;;  %v5774_v25 = vld [vmem:[#allocation6 + $0x684] ss:$16 sps:$4 sm:$0xff]  }
 0x3e8   : > { %3849 = vmatpush1.bf16.msra.mxu0 %v5664_v10  ;;  %v5747_v10 = vld [vmem:[#allocation6 + $0x1ec] ss:$16 sps:$4 sm:$0xff]  }
 0x3e9   : > { %3850 = vmatprep.subr.bf16.mxu0 %v5672_v3  ;;  %v2175_v3 = vrot.slane %v6865_v17, %v999_v46  ;;  %v5756_v46 = vld [vmem:[#allocation6 + $0x624] ss:$16 sps:$4 sm:$0xff]  }
 0x3ea   : > { %3941 = vmatpush1.bf16.msra.mxu1 %v5697_v28  ;;  %v5772_v28 = vld [vmem:[#allocation6 + $0x680] ss:$16 sps:$4 sm:$0xff]  }
 0x3eb   : > { %3942 = vmatprep.subr.bf16.mxu1 %v5705_v30  ;;  %v5783_v30 = vld [vmem:[#allocation6 + $0x2ac] ss:$16 sps:$4 sm:$0xff]  }
 0x3ec   : > { %3851 = vmatpush1.bf16.msra.mxu0 %v5670_v4  ;;  %v5750_v4 = vld [vmem:[#allocation6 + $0x604] ss:$16 sps:$4 sm:$0xff]  }
 0x3ed   : > { %3852 = vmatprep.subr.bf16.mxu0 %v5678_v5  ;;  %v2187_v5 = vrot.slane %v6865_v17, %v1011_v59  ;;  %v5757_v59 = vld [vmem:[#allocation6 + $0x228] ss:$16 sps:$4 sm:$0xff]   ;;  %v5762_v17 = vld [vmem:[#allocation6 + $0x644] ss:$16 sps:$4 sm:$0xff]  }
 0x3ee   : > { %3943 = vmatpush1.bf16.msra.mxu1 %v5703_v37  ;;  %v5781_v37 = vld [vmem:[#allocation6 + $0x2a8] ss:$16 sps:$4 sm:$0xff]  }
 0x3ef   : > { %3944 = vmatprep.subr.bf16.mxu1 %v5711_v42  ;;  %v6898_v15 = vpack.c.bf16 %v2187_v5, %v2187_v5  ;;  %v5789_v42 = vld [vmem:[#allocation6 + $0x2cc] ss:$16 sps:$4 sm:$0xff]   ;;  %v5829_v5 = vld [vmem:[#allocation6 + $0x3a8] ss:$16 sps:$4 sm:$0xff]  }
 0x3f0   : > { %3853 = vmatpush1.bf16.msra.mxu0 %v5676_v6  ;;  %v6896_v6 = vpack.c.bf16 %v2175_v3, %v2175_v3  ;;  %v5823_v3 = vld [vmem:[#allocation6 + $0x388] ss:$16 sps:$4 sm:$0xff]  }
 0x3f1   : > { %3854 = vmatprep.subr.bf16.mxu0 %v5684_v14  ;;  %v5759_v14 = vld [vmem:[#allocation6 + $0x22c] ss:$16 sps:$4 sm:$0xff]  }
 0x3f2   : > { %3945 = vmatpush1.bf16.msra.mxu1 %v5709_v39  ;;  %v5787_v39 = vld [vmem:[#allocation6 + $0x2c8] ss:$16 sps:$4 sm:$0xff]  }
 0x3f3   : > { %3946 = vmatprep.subr.bf16.mxu1 %v5717_v11  ;;  %v5795_v11 = vld [vmem:[#allocation6 + $0x2ec] ss:$16 sps:$4 sm:$0xff]  }
 0x3f4   : > { %3855 = vmatpush1.bf16.msra.mxu0 %v5682_v16  ;;  %v5754_v16 = vld [vmem:[#allocation6 + $0x620] ss:$16 sps:$4 sm:$0xff]  }
 0x3f5   : > { %3856 = vmatprep.subr.bf16.mxu0 %v5690_v21  ;;  %v5760_v21 = vld [vmem:[#allocation6 + $0x640] ss:$16 sps:$4 sm:$0xff]  }
 0x3f6   : > { %3947 = vmatpush1.bf16.msra.mxu1 %v5715_v45  ;;  %v5793_v45 = vld [vmem:[#allocation6 + $0x2e8] ss:$16 sps:$4 sm:$0xff]  }
 0x3f7   : > { %3948 = vmatprep.subr.bf16.mxu1 %v5723_v48  ;;  %v5801_v48 = vld [vmem:[#allocation6 + $0x30c] ss:$16 sps:$4 sm:$0xff]  }
 0x3f8   : > { %3857 = vmatpush1.bf16.msra.mxu0 %v5688_v24  ;;  %v5768_v24 = vld [vmem:[#allocation6 + $0x664] ss:$16 sps:$4 sm:$0xff]  }
 0x3f9   : > { %3858 = vmatprep.subr.bf16.mxu0 %v5696_v23  ;;  %v5769_v23 = vld [vmem:[#allocation6 + $0x268] ss:$16 sps:$4 sm:$0xff]  }
 0x3fa   : > { %3949 = vmatpush1.bf16.msra.mxu1 %v5721_v50  ;;  %v5799_v50 = vld [vmem:[#allocation6 + $0x308] ss:$16 sps:$4 sm:$0xff]  }
 0x3fb   : > { %3950 = vmatprep.subr.bf16.mxu1 %v5729_v54  ;;  %v5807_v54 = vld [vmem:[#allocation6 + $0x32c] ss:$16 sps:$4 sm:$0xff]  }
 0x3fc   : > { %3859 = vmatpush1.bf16.msra.mxu0 %v5694_v26  ;;  %v5777_v26 = vld [vmem:[#allocation6 + $0x28c] ss:$16 sps:$4 sm:$0xff]  }
 0x3fd   : > { %3860 = vmatprep.subr.bf16.mxu0 %v5702_v29  ;;  %v5780_v29 = vld [vmem:[#allocation6 + $0x6a4] ss:$16 sps:$4 sm:$0xff]  }
 0x3fe   : > { %3951 = vmatpush1.bf16.msra.mxu1 %v5727_v57  ;;  %v5805_v57 = vld [vmem:[#allocation6 + $0x328] ss:$16 sps:$4 sm:$0xff]  }
 0x3ff   : > { %3952 = vmatprep.subr.bf16.mxu1 %v5735_v32  ;;  %v5813_v32 = vld [vmem:[#allocation6 + $0x34c] ss:$16 sps:$4 sm:$0xff]  }
 0x400   : > { %3861 = vmatpush1.bf16.msra.mxu0 %v5700_v36  ;;  %v5778_v36 = vld [vmem:[#allocation6 + $0x6a0] ss:$16 sps:$4 sm:$0xff]  }
 0x401   : > { %3862 = vmatprep.subr.bf16.mxu0 %v5708_v38  ;;  %v5786_v38 = vld [vmem:[#allocation6 + $0x6c4] ss:$16 sps:$4 sm:$0xff]  }
 0x402   : > { %3953 = vmatpush1.bf16.msra.mxu1 %v5733_v61  ;;  %v5811_v61 = vld [vmem:[#allocation6 + $0x348] ss:$16 sps:$4 sm:$0xff]  }
 0x403   : > { %3954 = vmatprep.subr.bf16.mxu1 %v5741_v33  ;;  %v5819_v33 = vld [vmem:[#allocation6 + $0x36c] ss:$16 sps:$4 sm:$0xff]  }
 0x404   : > { %3863 = vmatpush1.bf16.msra.mxu0 %v5706_v44  ;;  %v5784_v44 = vld [vmem:[#allocation6 + $0x6c0] ss:$16 sps:$4 sm:$0xff]  }
 0x405   : > { %3864 = vmatprep.subr.bf16.mxu0 %v5714_v40  ;;  %v5792_v40 = vld [vmem:[#allocation6 + $0x6e4] ss:$16 sps:$4 sm:$0xff]  }
 0x406   : > { %3955 = vmatpush1.bf16.msra.mxu1 %v5739_v1  ;;  %v5817_v1 = vld [vmem:[#allocation6 + $0x368] ss:$16 sps:$4 sm:$0xff]  }
 0x407   : > { %3956 = vmatprep.subr.bf16.mxu1 %v5747_v10  ;;  %v5825_v10 = vld [vmem:[#allocation6 + $0x38c] ss:$16 sps:$4 sm:$0xff]  }
 0x408   : > { %3865 = vmatpush1.bf16.msra.mxu0 %v5712_v56  ;;  %v5790_v56 = vld [vmem:[#allocation6 + $0x6e0] ss:$16 sps:$4 sm:$0xff]  }
 0x409   : > { %3866 = vmatprep.subr.bf16.mxu0 %v5720_v47  ;;  %v5798_v47 = vld [vmem:[#allocation6 + $0x704] ss:$16 sps:$4 sm:$0xff]  }
 0x40a   : > { %3957 = vmatpush1.bf16.msra.mxu1 %v5745_v18  ;;  %v5828_v18 = vld [vmem:[#allocation6 + $0x7a4] ss:$16 sps:$4 sm:$0xff]  }
 0x40b   : > { %3967 = vmatprep.subr.bf16.mxu1 %v5753_v12  ;;  %v5826_v12 = vld [vmem:[#allocation6 + $0x7a0] ss:$16 sps:$4 sm:$0xff]  }
 0x40c   : > { %3867 = vmatpush1.bf16.msra.mxu0 %v5718_v49  ;;  %v5796_v49 = vld [vmem:[#allocation6 + $0x700] ss:$16 sps:$4 sm:$0xff]  }
 0x40d   : > { %3868 = vmatprep.subr.bf16.mxu0 %v5726_v53  ;;  %3959 = vmatmul.mubr.bf16.vlgmr.msra.gmra.mrb[4].mxu1 %v6881_v58  ;;  %v5771_v58 = vld [vmem:[#allocation6 + $0x26c] ss:$16 sps:$4 sm:$0xff]   ;;  %v5804_v53 = vld [vmem:[#allocation6 + $0x724] ss:$16 sps:$4 sm:$0xff]  }
 0x40e   : > { %3968 = vmatpush1.bf16.msra.mxu1 %v5751_v34  ;;  %3999 = vmatprep.mubr.bf16.mxu1 %v6871_v31  ;;  %v5775_v31 = vld [vmem:[#allocation6 + $0x288] ss:$16 sps:$4 sm:$0xff]   ;;  %v5837_v34 = vld [vmem:[#allocation6 + $0x3cc] ss:$16 sps:$4 sm:$0xff]  }
 0x40f   : > { %3969 = vmatprep.subr.bf16.mxu1 %v5759_v14  ;;  %v5835_v14 = vld [vmem:[#allocation6 + $0x3c8] ss:$16 sps:$4 sm:$0xff]  }
 0x410   : > { %3869 = vmatpush1.bf16.msra.mxu0 %v5724_v55  ;;  %v5802_v55 = vld [vmem:[#allocation6 + $0x720] ss:$16 sps:$4 sm:$0xff]  }
 0x411   : > { %3870 = vmatprep.subr.bf16.mxu0 %v5732_v27  ;;  %v5810_v27 = vld [vmem:[#allocation6 + $0x744] ss:$16 sps:$4 sm:$0xff]  }
 0x412   : > { %3970 = vmatpush1.bf16.msra.mxu1 %v5757_v59  ;;  %v5843_v59 = vld [vmem:[#allocation6 + $0x3ec] ss:$16 sps:$4 sm:$0xff]  }
 0x413   : > { %3971 = vmatprep.subr.bf16.mxu1 %v5765_v19  ;;  %v6052_v19 = vld [vmem:[#allocation2] sm:$0xff] }
 0x414   : > { %3871 = vmatpush1.bf16.msra.mxu0 %v5730_v7  ;;  %v5808_v7 = vld [vmem:[#allocation6 + $0x740] ss:$16 sps:$4 sm:$0xff]  }
 0x415   : > { %3872 = vmatprep.subr.bf16.mxu0 %v5738_v62  ;;  %v5816_v62 = vld [vmem:[#allocation6 + $0x764] ss:$16 sps:$4 sm:$0xff]  }
 0x416   : > { %3972 = vmatpush1.bf16.msra.mxu1 %v5763_v22  ;;  %v5841_v22 = vld [vmem:[#allocation6 + $0x3e8] ss:$16 sps:$4 sm:$0xff]  }
 0x417   : > { %3973 = vmatprep.subr.bf16.mxu1 %v5771_v58  ;;  %v5844_v58 = vld [vmem:[#allocation6 + $0x408] ss:$16 sps:$4 sm:$0xff]  }
 0x418   : > { %3873 = vmatpush1.bf16.msra.mxu0 %v5736_v52  ;;  %v5814_v52 = vld [vmem:[#allocation6 + $0x760] ss:$16 sps:$4 sm:$0xff]  }
 0x419   : > { %3874 = vmatprep.subr.bf16.mxu0 %v5744_v41  ;;  %v5822_v41 = vld [vmem:[#allocation6 + $0x784] ss:$16 sps:$4 sm:$0xff]  }
 0x41a   : > { %3974 = vmatpush1.bf16.msra.mxu1 %v5769_v23  ;;  %v5849_v23 = vld [vmem:[#allocation6 + $0x42c] ss:$16 sps:$4 sm:$0xff]  }
 0x41b   : > { %3975 = vmatprep.subr.bf16.mxu1 %v5777_v26  ;;  %v5945_v26 = vld [vmem:[#allocation8 + $0x14] ss:$8 sps:$4 sm:$0xff]  }
 0x41c   : > { %3875 = vmatpush1.bf16.msra.mxu0 %v5742_v2  ;;  %v5820_v2 = vld [vmem:[#allocation6 + $0x780] ss:$16 sps:$4 sm:$0xff]  }
 0x41d   : > { %3885 = vmatprep.subr.bf16.mxu0 %v5750_v4  ;;  %v5831_v4 = vld [vmem:[#allocation6 + $0x3ac] ss:$16 sps:$4 sm:$0xff]  }
 0x41e   : > { %3976 = vmatpush1.bf16.msra.mxu1 %v5775_v31  ;;  %v5943_v31 = vld [vmem:[#allocation8 + $0x10] ss:$8 sps:$4 sm:$0xff]  }
 0x41f   : > { %3877 = vmatmul.mubr.bf16.vlgmr.msra.gmra.mrb[0].mxu0 %v6896_v6  ;;  %3977 = vmatprep.subr.bf16.mxu1 %v5783_v30  ;;  %v5850_v30 = vld [vmem:[#allocation6 + $0x448] ss:$16 sps:$4 sm:$0xff]  }
 0x420   : > { %3886 = vmatpush1.bf16.msra.mxu0 %v5748_v13  ;;  %3917 = vmatprep.mubr.bf16.mxu0 %v6898_v15  ;;  %v5834_v13 = vld [vmem:[#allocation6 + $0x7c4] ss:$16 sps:$4 sm:$0xff]  }
 0x421   : > { %3887 = vmatprep.subr.bf16.mxu0 %v5756_v46  ;;  %v5832_v46 = vld [vmem:[#allocation6 + $0x7c0] ss:$16 sps:$4 sm:$0xff]  }
 0x422   : > { %3978 = vmatpush1.bf16.msra.mxu1 %v5781_v37  ;;  %v5853_v37 = vld [vmem:[#allocation6 + $0x468] ss:$16 sps:$4 sm:$0xff]  }
 0x423   : > { %3979 = vmatprep.subr.bf16.mxu1 %v5789_v42  ;;  %v5951_v42 = vld [vmem:[#allocation8 + $0x34] ss:$8 sps:$4 sm:$0xff]  }
 0x424   : > { %3888 = vmatpush1.bf16.msra.mxu0 %v5754_v16  ;;  %v5840_v16 = vld [vmem:[#allocation6 + $0x7e4] ss:$16 sps:$4 sm:$0xff]  }
 0x425   : > { %3889 = vmatprep.subr.bf16.mxu0 %v5762_v17  ;;  %v5838_v17 = vld [vmem:[#allocation6 + $0x7e0] ss:$16 sps:$4 sm:$0xff]  }
 0x426   : > { %3980 = vmatpush1.bf16.msra.mxu1 %v5787_v39  ;;  %v5856_v39 = vld [vmem:[#allocation6 + $0x488] ss:$16 sps:$4 sm:$0xff]  }
 0x427   : > { %3981 = vmatprep.subr.bf16.mxu1 %v5795_v11  ;;  %v5952_v11 = vld [vmem:[#allocation8 + $0x40] ss:$8 sps:$4 sm:$0xff]  }
 0x428   : > { %3890 = vmatpush1.bf16.msra.mxu0 %v5760_v21  ;;  %v2183_v21 = vrot.slane %v6052_v19, %v1007_v51  ;;  %v5847_v51 = vld [vmem:[#allocation6 + $0x428] ss:$16 sps:$4 sm:$0xff]  }
 0x429   : > { %3891 = vmatprep.subr.bf16.mxu0 %v5768_v24  ;;  %v5846_v24 = vld [vmem:[#allocation6 + $0x40c] ss:$16 sps:$4 sm:$0xff]   ;;  %v5883_v19 = vld [vmem:[#allocation6 + $0x5a8] ss:$16 sps:$4 sm:$0xff]  }
 0x42a   : > { %3982 = vmatpush1.bf16.msra.mxu1 %v5793_v45  ;;  %v5859_v45 = vld [vmem:[#allocation6 + $0x4a8] ss:$16 sps:$4 sm:$0xff]  }
 0x42b   : > { %3983 = vmatprep.subr.bf16.mxu1 %v5801_v48  ;;  %v5955_v48 = vld [vmem:[#allocation8 + $0x50] ss:$8 sps:$4 sm:$0xff]  }
 0x42c   : > { %3892 = vmatpush1.bf16.msra.mxu0 %v5766_v20  ;;  %v6906_v20 = vpack.c.bf16 %v2183_v21, %v2183_v21  ;;  %v5888_v21 = vld [vmem:[#allocation6 + $0x5cc] ss:$16 sps:$4 sm:$0xff]  }
 0x42d   : > { %3893 = vmatprep.subr.bf16.mxu0 %v5774_v25  ;;  %v5940_v25 = vld [vmem:[#allocation8] ss:$8 sps:$4 sm:$0xff]  }
 0x42e   : > { %3984 = vmatpush1.bf16.msra.mxu1 %v5799_v50  ;;  %v5862_v50 = vld [vmem:[#allocation6 + $0x4c8] ss:$16 sps:$4 sm:$0xff]  }
 0x42f   : > { %3985 = vmatprep.subr.bf16.mxu1 %v5807_v54  ;;  %v5958_v54 = vld [vmem:[#allocation8 + $0x60] ss:$8 sps:$4 sm:$0xff]  }
 0x430   : > { %3894 = vmatpush1.bf16.msra.mxu0 %v5772_v28  ;;  %v5852_v28 = vld [vmem:[#allocation6 + $0x44c] ss:$16 sps:$4 sm:$0xff]  }
 0x431   : > { %3895 = vmatprep.subr.bf16.mxu0 %v5780_v29  ;;  %v5948_v29 = vld [vmem:[#allocation8 + $0x24] ss:$8 sps:$4 sm:$0xff]  }
 0x432   : > { %3986 = vmatpush1.bf16.msra.mxu1 %v5805_v57  ;;  %v5865_v57 = vld [vmem:[#allocation6 + $0x4e8] ss:$16 sps:$4 sm:$0xff]  }
 0x433   : > { %3987 = vmatprep.subr.bf16.mxu1 %v5813_v32  ;;  %v5961_v32 = vld [vmem:[#allocation8 + $0x70] ss:$8 sps:$4 sm:$0xff]  }
 0x434   : > { %3896 = vmatpush1.bf16.msra.mxu0 %v5778_v36  ;;  %v5855_v36 = vld [vmem:[#allocation6 + $0x46c] ss:$16 sps:$4 sm:$0xff]  }
 0x435   : > { %3897 = vmatprep.subr.bf16.mxu0 %v5786_v38  ;;  %v5858_v38 = vld [vmem:[#allocation6 + $0x48c] ss:$16 sps:$4 sm:$0xff]  }
 0x436   : > { %3988 = vmatpush1.bf16.msra.mxu1 %v5811_v61  ;;  %v5868_v61 = vld [vmem:[#allocation6 + $0x508] ss:$16 sps:$4 sm:$0xff]  }
 0x437   : > { %3989 = vmatprep.subr.bf16.mxu1 %v5819_v33  ;;  %v5964_v33 = vld [vmem:[#allocation8 + $0x80] ss:$8 sps:$4 sm:$0xff]  }
 0x438   : > { %3898 = vmatpush1.bf16.msra.mxu0 %v5784_v44  ;;  %v5954_v44 = vld [vmem:[#allocation8 + $0x44] ss:$8 sps:$4 sm:$0xff]  }
 0x439   : > { %3899 = vmatprep.subr.bf16.mxu0 %v5792_v40  ;;  %v5861_v40 = vld [vmem:[#allocation6 + $0x4ac] ss:$16 sps:$4 sm:$0xff]  }
 0x43a   : > { %3990 = vmatpush1.bf16.msra.mxu1 %v5817_v1  ;;  %v5871_v1 = vld [vmem:[#allocation6 + $0x528] ss:$16 sps:$4 sm:$0xff]  }
 0x43b   : > { %3991 = vmatprep.subr.bf16.mxu1 %v5825_v10  ;;  %v5967_v10 = vld [vmem:[#allocation8 + $0x90] ss:$8 sps:$4 sm:$0xff]  }
 0x43c   : > { %3900 = vmatpush1.bf16.msra.mxu0 %v5790_v56  ;;  %v5957_v56 = vld [vmem:[#allocation8 + $0x54] ss:$8 sps:$4 sm:$0xff]  }
 0x43d   : > { %3901 = vmatprep.subr.bf16.mxu0 %v5798_v47  ;;  %v5864_v47 = vld [vmem:[#allocation6 + $0x4cc] ss:$16 sps:$4 sm:$0xff]  }
 0x43e   : > { %3992 = vmatpush1.bf16.msra.mxu1 %v5823_v3  ;;  %v5874_v3 = vld [vmem:[#allocation6 + $0x548] ss:$16 sps:$4 sm:$0xff]  }
 0x43f   : > { %3993 = vmatprep.subr.bf16.mxu1 %v5831_v4  ;;  %v5970_v4 = vld [vmem:[#allocation8 + $0xa0] ss:$8 sps:$4 sm:$0xff]  }
 0x440   : > { %3902 = vmatpush1.bf16.msra.mxu0 %v5796_v49  ;;  %v5960_v49 = vld [vmem:[#allocation8 + $0x64] ss:$8 sps:$4 sm:$0xff]  }
 0x441   : > { %3903 = vmatprep.subr.bf16.mxu0 %v5804_v53  ;;  %v5867_v53 = vld [vmem:[#allocation6 + $0x4ec] ss:$16 sps:$4 sm:$0xff]  }
 0x442   : > { %3994 = vmatpush1.bf16.msra.mxu1 %v5829_v5  ;;  %v5877_v5 = vld [vmem:[#allocation6 + $0x568] ss:$16 sps:$4 sm:$0xff]  }
 0x443   : > { %3995 = vmatprep.subr.bf16.mxu1 %v5837_v34  ;;  %v5973_v34 = vld [vmem:[#allocation8 + $0xb0] ss:$8 sps:$4 sm:$0xff]  }
 0x444   : > { %3904 = vmatpush1.bf16.msra.mxu0 %v5802_v55  ;;  %v5963_v55 = vld [vmem:[#allocation8 + $0x74] ss:$8 sps:$4 sm:$0xff]  }
 0x445   : > { %3905 = vmatprep.subr.bf16.mxu0 %v5810_v27  ;;  %v5870_v27 = vld [vmem:[#allocation6 + $0x50c] ss:$16 sps:$4 sm:$0xff]  }
 0x446   : > { %3996 = vmatpush1.bf16.msra.mxu1 %v5835_v14  ;;  %v5880_v14 = vld [vmem:[#allocation6 + $0x588] ss:$16 sps:$4 sm:$0xff]  }
 0x447   : > { %3997 = vmatprep.subr.bf16.mxu1 %v5843_v59  ;;  %v5976_v59 = vld [vmem:[#allocation8 + $0xc0] ss:$8 sps:$4 sm:$0xff]  }
 0x448   : > { %3906 = vmatpush1.bf16.msra.mxu0 %v5808_v7  ;;  %v5966_v7 = vld [vmem:[#allocation8 + $0x84] ss:$8 sps:$4 sm:$0xff]  }
 0x449   : > { %3907 = vmatprep.subr.bf16.mxu0 %v5816_v62  ;;  %v5873_v62 = vld [vmem:[#allocation6 + $0x52c] ss:$16 sps:$4 sm:$0xff]  }
 0x44a   : > { %3998 = vmatpush1.bf16.msra.mxu1 %v5841_v22  ;;  %v5979_v22 = vld [vmem:[#allocation8 + $0xd0] ss:$8 sps:$4 sm:$0xff]  }
 0x44b   : > { %4008 = vmatprep.subr.bf16.mxu1 %v5846_v24  ;;  %v5886_v24 = vld [vmem:[#allocation6 + $0x5c8] ss:$16 sps:$4 sm:$0xff]  }
 0x44c   : > { %3908 = vmatpush1.bf16.msra.mxu0 %v5814_v52  ;;  %v5969_v52 = vld [vmem:[#allocation8 + $0x94] ss:$8 sps:$4 sm:$0xff]  }
 0x44d   : > { %3909 = vmatprep.subr.bf16.mxu0 %v5822_v41  ;;  %4000 = vmatmul.mubr.bf16.vlgmr.msra.gmra.mrb[4].mxu1 %v6883_v60  ;;  %v5946_v60 = vld [vmem:[#allocation8 + $0x20] ss:$8 sps:$4 sm:$0xff]   ;;  %v5876_v41 = vld [vmem:[#allocation6 + $0x54c] ss:$16 sps:$4 sm:$0xff]  }
 0x44e   : > { %4009 = vmatpush1.bf16.msra.mxu1 %v5844_v58  ;;  %4040 = vmatprep.mubr.bf16.mxu1 %v6885_v0  ;;  %v5949_v0 = vld [vmem:[#allocation8 + $0x30] ss:$8 sps:$4 sm:$0xff]   ;;  %v5891_v58 = vld [vmem:[#allocation6 + $0x5ec] ss:$16 sps:$4 sm:$0xff]  }
 0x44f   : > { %4010 = vmatprep.subr.bf16.mxu1 %v5849_v23  ;;  %v5889_v23 = vld [vmem:[#allocation6 + $0x5e8] ss:$16 sps:$4 sm:$0xff]  }
 0x450   : > { %3910 = vmatpush1.bf16.msra.mxu0 %v5820_v2  ;;  %v5972_v2 = vld [vmem:[#allocation8 + $0xa4] ss:$8 sps:$4 sm:$0xff]  }
 0x451   : > { %3911 = vmatprep.subr.bf16.mxu0 %v5828_v18  ;;  %v5879_v18 = vld [vmem:[#allocation6 + $0x56c] ss:$16 sps:$4 sm:$0xff]  }
 0x452   : > { %4011 = vmatpush1.bf16.msra.mxu1 %v5847_v51  ;;  %v5897_v51 = vld [vmem:[#allocation6 + $0x62c] ss:$16 sps:$4 sm:$0xff]  }
 0x453   : > { %4012 = vmatprep.subr.bf16.mxu1 %v5852_v28  ;;  %v5900_v28 = vld [vmem:[#allocation6 + $0x64c] ss:$16 sps:$4 sm:$0xff]  }
 0x454   : > { %3912 = vmatpush1.bf16.msra.mxu0 %v5826_v12  ;;  %v5975_v12 = vld [vmem:[#allocation8 + $0xb4] ss:$8 sps:$4 sm:$0xff]  }
 0x455   : > { %3913 = vmatprep.subr.bf16.mxu0 %v5834_v13  ;;  %v5882_v13 = vld [vmem:[#allocation6 + $0x58c] ss:$16 sps:$4 sm:$0xff]  }
 0x456   : > { %4013 = vmatpush1.bf16.msra.mxu1 %v5850_v30  ;;  %v5901_v30 = vld [vmem:[#allocation6 + $0x668] ss:$16 sps:$4 sm:$0xff]  }
 0x457   : > { %4014 = vmatprep.subr.bf16.mxu1 %v5855_v36  ;;  %v5906_v36 = vld [vmem:[#allocation6 + $0x68c] ss:$16 sps:$4 sm:$0xff]  }
 0x458   : > { %3914 = vmatpush1.bf16.msra.mxu0 %v5832_v46  ;;  %v5978_v46 = vld [vmem:[#allocation8 + $0xc4] ss:$8 sps:$4 sm:$0xff]  }
 0x459   : > { %3915 = vmatprep.subr.bf16.mxu0 %v5840_v16  ;;  %v5885_v16 = vld [vmem:[#allocation6 + $0x5ac] ss:$16 sps:$4 sm:$0xff]  }
 0x45a   : > { %4015 = vmatpush1.bf16.msra.mxu1 %v5853_v37  ;;  %v5909_v37 = vld [vmem:[#allocation6 + $0x6ac] ss:$16 sps:$4 sm:$0xff]  }
 0x45b   : > { %4016 = vmatprep.subr.bf16.mxu1 %v5858_v38  ;;  %v5912_v38 = vld [vmem:[#allocation6 + $0x6cc] ss:$16 sps:$4 sm:$0xff]  }
 0x45c   : > { %3916 = vmatpush1.bf16.msra.mxu0 %v5838_v17  ;;  %v5981_v17 = vld [vmem:[#allocation8 + $0xd4] ss:$8 sps:$4 sm:$0xff]  }
 0x45d   : > { %4494 = vmatprep.subr.bf16.mxu0 %v5942_v35  ;;  %v5892_v35 = vld [vmem:[#allocation6 + $0x608] ss:$16 sps:$4 sm:$0xff]  }
 0x45e   : > { %4017 = vmatpush1.bf16.msra.mxu1 %v5856_v39 }
 0x45f   : > { %3918 = vmatmul.mubr.bf16.vlgmr.msra.gmra.mrb[0].mxu0 %v6906_v20  ;;  %4018 = vmatprep.subr.bf16.mxu1 %v5861_v40  ;;  %v5910_v40 = vld [vmem:[#allocation6 + $0x6c8] ss:$16 sps:$4 sm:$0xff]  }
 0x460   : > { %4495 = vmatpush1.bf16.msra.mxu0 %v5940_v25  ;;  %v5894_v25 = vld [vmem:[#allocation6 + $0x60c] ss:$16 sps:$4 sm:$0xff]  }
 0x461   : > { %4496 = vmatprep.subr.bf16.mxu0 %v5945_v26  ;;  %v5895_v26 = vld [vmem:[#allocation6 + $0x628] ss:$16 sps:$4 sm:$0xff]  }
 0x462   : > { %4019 = vmatpush1.bf16.msra.mxu1 %v5859_v45  ;;  %v5987_v45 = vld [vmem:[#allocation8 + $0xf4] ss:$8 sps:$4 sm:$0xff]  }
 0x463   : > { %4020 = vmatprep.subr.bf16.mxu1 %v5864_v47  ;;  %v5985_v47 = vld [vmem:[#allocation8 + $0xf0] ss:$8 sps:$4 sm:$0xff]  }
 0x464   : > { %4497 = vmatpush1.bf16.msra.mxu0 %v5943_v31  ;;  %v5898_v31 = vld [vmem:[#allocation6 + $0x648] ss:$16 sps:$4 sm:$0xff]  }
 0x465   : > { %4498 = vmatprep.subr.bf16.mxu0 %v5948_v29  ;;  %v5903_v29 = vld [vmem:[#allocation6 + $0x66c] ss:$16 sps:$4 sm:$0xff]  }
 0x466   : > { %4021 = vmatpush1.bf16.msra.mxu1 %v5862_v50  ;;  %v5990_v50 = vld [vmem:[#allocation8 + $0x104] ss:$8 sps:$4 sm:$0xff]  }
 0x467   : > { %4022 = vmatprep.subr.bf16.mxu1 %v5867_v53  ;;  %v5916_v53 = vld [vmem:[#allocation6 + $0x708] ss:$16 sps:$4 sm:$0xff]  }
 0x468   : > { %4499 = vmatpush1.bf16.msra.mxu0 %v5946_v60  ;;  %v5904_v60 = vld [vmem:[#allocation6 + $0x688] ss:$16 sps:$4 sm:$0xff]  }
 0x469   : > { %4500 = vmatprep.subr.bf16.mxu0 %v5951_v42  ;;  %v5984_v42 = vld [vmem:[#allocation8 + $0xe4] ss:$8 sps:$4 sm:$0xff]  }
 0x46a   : > { %4023 = vmatpush1.bf16.msra.mxu1 %v5865_v57  ;;  %v5924_v57 = vld [vmem:[#allocation6 + $0x74c] ss:$16 sps:$4 sm:$0xff]  }
 0x46b   : > { %4024 = vmatprep.subr.bf16.mxu1 %v5870_v27  ;;  %v5922_v27 = vld [vmem:[#allocation6 + $0x748] ss:$16 sps:$4 sm:$0xff]  }
 0x46c   : > { %4501 = vmatpush1.bf16.msra.mxu0 %v5949_v0  ;;  %v5982_v0 = vld [vmem:[#allocation8 + $0xe0] ss:$8 sps:$4 sm:$0xff]  }
 0x46d   : > { %4502 = vmatprep.subr.bf16.mxu0 %v5954_v44 }
 0x46e   : > { %4025 = vmatpush1.bf16.msra.mxu1 %v5868_v61  ;;  %v5930_v61 = vld [vmem:[#allocation6 + $0x78c] ss:$16 sps:$4 sm:$0xff]  }
 0x46f   : > { %4026 = vmatprep.subr.bf16.mxu1 %v5873_v62  ;;  %v5928_v62 = vld [vmem:[#allocation6 + $0x788] ss:$16 sps:$4 sm:$0xff]  }
 0x470   : > { %4503 = vmatpush1.bf16.msra.mxu0 %v5952_v11 }
 0x471   : > { %4504 = vmatprep.subr.bf16.mxu0 %v5957_v56  ;;  %v5915_v56 = vld [vmem:[#allocation6 + $0x6ec] ss:$16 sps:$4 sm:$0xff]  }
 0x472   : > { %4027 = vmatpush1.bf16.msra.mxu1 %v5871_v1  ;;  %v5936_v1 = vld [vmem:[#allocation6 + $0x7cc] ss:$16 sps:$4 sm:$0xff]  }
 0x473   : > { %4028 = vmatprep.subr.bf16.mxu1 %v5876_v41  ;;  %v5934_v41 = vld [vmem:[#allocation6 + $0x7c8] ss:$16 sps:$4 sm:$0xff]  }
 0x474   : > { %4505 = vmatpush1.bf16.msra.mxu0 %v5955_v48  ;;  %v5913_v48 = vld [vmem:[#allocation6 + $0x6e8] ss:$16 sps:$4 sm:$0xff]  }
 0x475   : > { %4506 = vmatprep.subr.bf16.mxu0 %v5960_v49  ;;  %v5918_v49 = vld [vmem:[#allocation6 + $0x70c] ss:$16 sps:$4 sm:$0xff]  }
 0x476   : > { %4029 = vmatpush1.bf16.msra.mxu1 %v5874_v3  ;;  %v6917_v3 = vld [vmem:[%s7046_s8] sm:$0xf] }
 0x477   : > { %4030 = vmatprep.subr.bf16.mxu1 %v5879_v18  ;;  %v3745_v18 = vrot.slane %v6917_v3, %v6662_v63 }
 0x478   : > { %4507 = vmatpush1.bf16.msra.mxu0 %v5958_v54  ;;  %v5921_v54 = vld [vmem:[#allocation6 + $0x72c] ss:$16 sps:$4 sm:$0xff]  }
 0x479   : > { %4508 = vmatprep.subr.bf16.mxu0 %v5963_v55  ;;  %v5919_v55 = vld [vmem:[#allocation6 + $0x728] ss:$16 sps:$4 sm:$0xff]  }
 0x47a   : > { %4031 = vmatpush1.bf16.msra.mxu1 %v5877_v5 }
 0x47b   : > { %4032 = vmatprep.subr.bf16.mxu1 %v5882_v13 }
 0x47c   : > { %4509 = vmatpush1.bf16.msra.mxu0 %v5961_v32  ;;  %v5927_v32 = vld [vmem:[#allocation6 + $0x76c] ss:$16 sps:$4 sm:$0xff]  }
 0x47d   : > { %4510 = vmatprep.subr.bf16.mxu0 %v5966_v7  ;;  %v5925_v7 = vld [vmem:[#allocation6 + $0x768] ss:$16 sps:$4 sm:$0xff]  }
 0x47e   : > { %4033 = vmatpush1.bf16.msra.mxu1 %v5880_v14 }
 0x47f   : > { %4034 = vmatprep.subr.bf16.mxu1 %v5885_v16 }
 0x480   : > { %4511 = vmatpush1.bf16.msra.mxu0 %v5964_v33  ;;  %v5933_v33 = vld [vmem:[#allocation6 + $0x7ac] ss:$16 sps:$4 sm:$0xff]  }
 0x481   : > { %4512 = vmatprep.subr.bf16.mxu0 %v5969_v52  ;;  %v5931_v52 = vld [vmem:[#allocation6 + $0x7a8] ss:$16 sps:$4 sm:$0xff]  }
 0x482   : > { %4035 = vmatpush1.bf16.msra.mxu1 %v5883_v19 }
 0x483   : > { %4036 = vmatprep.subr.bf16.mxu1 %v5888_v21  ;;  %v5988_v21 = vld [vmem:[#allocation8 + $0x100] ss:$8 sps:$4 sm:$0xff]  }
 0x484   : > { %4513 = vmatpush1.bf16.msra.mxu0 %v5967_v10  ;;  %v5939_v10 = vld [vmem:[#allocation6 + $0x7ec] ss:$16 sps:$4 sm:$0xff]  }
 0x485   : > { %4514 = vmatprep.subr.bf16.mxu0 %v5972_v2  ;;  %v5937_v2 = vld [vmem:[#allocation6 + $0x7e8] ss:$16 sps:$4 sm:$0xff]  }
 0x486   : > { %4037 = vmatpush1.bf16.msra.mxu1 %v5886_v24  ;;  %v5993_v24 = vld [vmem:[#allocation8 + $0x114] ss:$8 sps:$4 sm:$0xff]  }
 0x487   : > { %4038 = vmatprep.subr.bf16.mxu1 %v5891_v58  ;;  %v6036_v58 = vld [vmem:[%s7090_s22 + $0x40] sm:$0xff]  }
 0x488   : > { %4515 = vmatpush1.bf16.msra.mxu0 %v5970_v4  ;;  %v3749_v4 = vrot.slane %v6917_v3, %v6673_v8 }
 0x489   : > { %4516 = vmatprep.subr.bf16.mxu0 %v5975_v12 }
 0x48a   : > { %4039 = vmatpush1.bf16.msra.mxu1 %v5889_v23  ;;  %v6037_v23 = vld [vmem:[%s7090_s22] sm:$0xff]  }
 0x48b   : > { %4049 = vmatprep.subr.bf16.mxu1 %v5894_v25  ;;  %v6038_v25 = vld [vmem:[%s7090_s22 + $0x48] sm:$0xff]  }
 0x48c   : > { %4517 = vmatpush1.bf16.msra.mxu0 %v5973_v34 }
 0x48d   : > { %4518 = vmatprep.subr.bf16.mxu0 %v5978_v46  ;;  %4041 = vmatmul.mubr.bf16.vlgmr.msra.gmra.mrb[4].mxu1 %v6896_v6  ;;  %v5907_v6 = vld [vmem:[#allocation6 + $0x6a8] ss:$16 sps:$4 sm:$0xff]  }
 0x48e   : > { %4050 = vmatpush1.bf16.msra.mxu1 %v5892_v35  ;;  %4081 = vmatprep.mubr.bf16.mxu1 %v6898_v15  ;;  %v5991_v35 = vld [vmem:[#allocation8 + $0x110] ss:$8 sps:$4 sm:$0xff]  }
 0x48f   : > { %4051 = vmatprep.subr.bf16.mxu1 %v5897_v51  ;;  %v5996_v51 = vld [vmem:[#allocation8 + $0x124] ss:$8 sps:$4 sm:$0xff]  }
 0x490   : > { %4519 = vmatpush1.bf16.msra.mxu0 %v5976_v59 }
 0x491   : > { %4520 = vmatprep.subr.bf16.mxu0 %v5981_v17 }
 0x492   : > { %4052 = vmatpush1.bf16.msra.mxu1 %v5895_v26  ;;  %v6039_v26 = vld [vmem:[%s7090_s22 + $0x8] sm:$0xff]  }
 0x493   : > { %4053 = vmatprep.subr.bf16.mxu1 %v5900_v28  ;;  %v6040_v28 = vld [vmem:[%s7090_s22 + $0x50] sm:$0xff]  }
 0x494   : > { %4521 = vmatpush1.bf16.msra.mxu0 %v5979_v22 }
 0x495   : > { %4522 = vmatprep.subr.bf16.mxu0 %v5984_v42  ;;  %v6000_v42 = vld [vmem:[#allocation8 + $0x140] ss:$8 sps:$4 sm:$0xff]  }
 0x496   : > { %4054 = vmatpush1.bf16.msra.mxu1 %v5898_v31  ;;  %v5994_v31 = vld [vmem:[#allocation8 + $0x120] ss:$8 sps:$4 sm:$0xff]  }
 0x497   : > { %4055 = vmatprep.subr.bf16.mxu1 %v5903_v29  ;;  %v5999_v29 = vld [vmem:[#allocation8 + $0x134] ss:$8 sps:$4 sm:$0xff]  }
 0x498   : > { %4523 = vmatpush1.bf16.msra.mxu0 %v5982_v0  ;;  %v6045_v0 = vld [vmem:[%s7090_s22 + $0x20] sm:$0xff]  }
 0x499   : > { %4524 = vmatprep.subr.bf16.mxu0 %v5987_v45  ;;  %v6011_v45 = vld [vmem:[#allocation8 + $0x174] ss:$8 sps:$4 sm:$0xff]  }
 0x49a   : > { %4056 = vmatpush1.bf16.msra.mxu1 %v5901_v30  ;;  %v6041_v30 = vld [vmem:[%s7090_s22 + $0x10] sm:$0xff]  }
 0x49b   : > { %4057 = vmatprep.subr.bf16.mxu1 %v5906_v36  ;;  %v6042_v36 = vld [vmem:[%s7090_s22 + $0x58] sm:$0xff]  }
 0x49c   : > { %4525 = vmatpush1.bf16.msra.mxu0 %v5985_v47  ;;  %v6009_v47 = vld [vmem:[#allocation8 + $0x170] ss:$8 sps:$4 sm:$0xff]  }
 0x49d   : > { %4535 = vmatprep.subr.bf16.mxu0 %v5990_v50  ;;  %v6017_v50 = vld [vmem:[#allocation8 + $0x194] ss:$8 sps:$4 sm:$0xff]  }
 0x49e   : > { %4058 = vmatpush1.bf16.msra.mxu1 %v5904_v60  ;;  %v5997_v60 = vld [vmem:[#allocation8 + $0x130] ss:$8 sps:$4 sm:$0xff]  }
 0x49f   : > { %4059 = vmatprep.subr.bf16.mxu1 %v5909_v37  ;;  %v6002_v37 = vld [vmem:[#allocation8 + $0x144] ss:$8 sps:$4 sm:$0xff]  }
 0x4a0   : > { %v3796_v15 = vpop.f32.mrb[0].mxu1 }
 0x4a1   : > { %v3798_v44 = vpop.f32.mrb[1].mxu1  ;;  %v3797_v12 = vadd.f32 %v3796_v15, %v3745_v18  ;;  %v6005_v15 = vld [vmem:[#allocation8 + $0x154] ss:$8 sps:$4 sm:$0xff]  }
 0x4a2   : > { %v3800_v39 = vpop.f32.mrb[2].mxu1  ;;  %4060 = vmatpush1.bf16.msra.mxu1 %v5907_v6  ;;  %v3799_v5 = vadd.f32 %v3798_v44, %v3749_v4  ;;  %v6043_v6 = vld [vmem:[%s7090_s22 + $0x18] sm:$0xff]   ;;  %v6046_v44 = vld [vmem:[%s7090_s22 + $0x68] sm:$0xff]  }
 0x4a3   : > { %v3801_v11 = vpop.f32.mrb[3].mxu1  ;;  %4061 = vmatprep.subr.bf16.mxu1 %v5912_v38  ;;  %v6044_v38 = vld [vmem:[%s7090_s22 + $0x60] sm:$0xff]  }
 0x4a4   : > { %v6003_v39 = vld [vmem:[#allocation8 + $0x150] ss:$8 sps:$4 sm:$0xff]   ;;  %v6047_v11 = vld [vmem:[%s7090_s22 + $0x28] sm:$0xff]  }
 0x4a6   : > { %4062 = vmatpush1.bf16.msra.mxu1 %v5910_v40  ;;  %v6008_v40 = vld [vmem:[#allocation8 + $0x164] ss:$8 sps:$4 sm:$0xff]  }
 0x4a7   : > { %4063 = vmatprep.subr.bf16.mxu1 %v5915_v56  ;;  %v6006_v56 = vld [vmem:[#allocation8 + $0x160] ss:$8 sps:$4 sm:$0xff]  }
 0x4aa   : > { %4064 = vmatpush1.bf16.msra.mxu1 %v5913_v48  ;;  %v6014_v48 = vld [vmem:[#allocation8 + $0x184] ss:$8 sps:$4 sm:$0xff]  }
 0x4ab   : > { %4065 = vmatprep.subr.bf16.mxu1 %v5918_v49  ;;  %v6012_v49 = vld [vmem:[#allocation8 + $0x180] ss:$8 sps:$4 sm:$0xff]  }
 0x4ae   : > { %4066 = vmatpush1.bf16.msra.mxu1 %v5916_v53  ;;  %v6015_v53 = vld [vmem:[#allocation8 + $0x190] ss:$8 sps:$4 sm:$0xff]  }
 0x4af   : > { %4067 = vmatprep.subr.bf16.mxu1 %v5921_v54  ;;  %v6020_v54 = vld [vmem:[#allocation8 + $0x1a4] ss:$8 sps:$4 sm:$0xff]  }
 0x4b2   : > { %4068 = vmatpush1.bf16.msra.mxu1 %v5919_v55  ;;  %v6018_v55 = vld [vmem:[#allocation8 + $0x1a0] ss:$8 sps:$4 sm:$0xff]  }
 0x4b3   : > { %4069 = vmatprep.subr.bf16.mxu1 %v5924_v57  ;;  %v6023_v57 = vld [vmem:[#allocation8 + $0x1b4] ss:$8 sps:$4 sm:$0xff]  }
 0x4b6   : > { %4070 = vmatpush1.bf16.msra.mxu1 %v5922_v27  ;;  %v6021_v27 = vld [vmem:[#allocation8 + $0x1b0] ss:$8 sps:$4 sm:$0xff]  }
 0x4b7   : > { %4071 = vmatprep.subr.bf16.mxu1 %v5927_v32  ;;  %v6026_v32 = vld [vmem:[#allocation8 + $0x1c4] ss:$8 sps:$4 sm:$0xff]  }
 0x4ba   : > { %4072 = vmatpush1.bf16.msra.mxu1 %v5925_v7  ;;  %v6024_v7 = vld [vmem:[#allocation8 + $0x1c0] ss:$8 sps:$4 sm:$0xff]  }
 0x4bb   : > { %4073 = vmatprep.subr.bf16.mxu1 %v5930_v61  ;;  %v6029_v61 = vld [vmem:[#allocation8 + $0x1d4] ss:$8 sps:$4 sm:$0xff]  }
 0x4be   : > { %4074 = vmatpush1.bf16.msra.mxu1 %v5928_v62  ;;  %v6027_v62 = vld [vmem:[#allocation8 + $0x1d0] ss:$8 sps:$4 sm:$0xff]  }
 0x4bf   : > { %4075 = vmatprep.subr.bf16.mxu1 %v5933_v33  ;;  %v6032_v33 = vld [vmem:[#allocation8 + $0x1e4] ss:$8 sps:$4 sm:$0xff]  }
 0x4c2   : > { %4076 = vmatpush1.bf16.msra.mxu1 %v5931_v52  ;;  %v6030_v52 = vld [vmem:[#allocation8 + $0x1e0] ss:$8 sps:$4 sm:$0xff]  }
 0x4c3   : > { %4077 = vmatprep.subr.bf16.mxu1 %v5936_v1  ;;  %v6035_v1 = vld [vmem:[#allocation8 + $0x1f4] ss:$8 sps:$4 sm:$0xff]  }
 0x4c6   : > { %4078 = vmatpush1.bf16.msra.mxu1 %v5934_v41  ;;  %v6033_v41 = vld [vmem:[#allocation8 + $0x1f0] ss:$8 sps:$4 sm:$0xff]  }
 0x4c7   : > { %4079 = vmatprep.subr.bf16.mxu1 %v5939_v10  ;;  %v3753_v10 = vrot.slane %v6917_v3, %v6665_v43  ;;  %v6049_v43 = vld [vmem:[%s7090_s22 + $0x30] sm:$0xff]  }
 0x4ca   : > { %4080 = vmatpush1.bf16.msra.mxu1 %v5937_v2  ;;  %v3757_v2 = vrot.slane %v6917_v3, %v6676_v9  ;;  %v6050_v9 = vld [vmem:[%s7090_s22 + $0x78] sm:$0xff]  }
 0x4cb   : > { %5336 = vmatprep.subr.bf16.mxu1 %v6036_v58  ;;  %v6051_v3 = vld [vmem:[%s7090_s22 + $0x38] sm:$0xff]  }
 0x4cd   : > { %4082 = vmatmul.mubr.bf16.vlgmr.msra.gmra.mrb[4].mxu1 %v6906_v20 }
 0x4ce   : > { %5337 = vmatpush3.bf16.msra.mxu1 %v6037_v23 }
 0x4cf   : > { %5338 = vmatprep.subr.bf16.mxu1 %v6038_v25 }
 0x4d2   : > { %5339 = vmatpush3.bf16.msra.mxu1 %v6039_v26 }
 0x4d3   : > { %5340 = vmatprep.subr.bf16.mxu1 %v6040_v28 }
 0x4d6   : > { %5341 = vmatpush3.bf16.msra.mxu1 %v6041_v30 }
 0x4d7   : > { %5342 = vmatprep.subr.bf16.mxu1 %v6042_v36 }
 0x4da   : > { %5343 = vmatpush3.bf16.msra.mxu1 %v6043_v6 }
 0x4db   : > { %5344 = vmatprep.subr.bf16.mxu1 %v6044_v38 }
 0x4de   : > { %5345 = vmatpush3.bf16.msra.mxu1 %v6045_v0 }
 0x4df   : > { %5346 = vmatprep.subr.bf16.mxu1 %v6046_v44 }
 0x4e2   : > { %5347 = vmatpush3.bf16.msra.mxu1 %v6047_v11 }
 0x532   : > { %v3919_v13 = vpop.f32.mrb[0].mxu0 }
 0x533   : > { %v5401_v34 = vadd.f32 %v3919_v13, %v3797_v12  ;;  %v3921_v46 = vpop.f32.mrb[1].mxu0 }
 0x534   : > { %v5403_v14 = vadd.f32 %v3921_v46, %v3799_v5  ;;  %v3923_v16 = vpop.f32.mrb[2].mxu0 }
 0x535   : > { %v4090_v59 = vmax.f32 %v5401_v34, 0.0  ;;  %v3924_v20 = vpop.f32.mrb[3].mxu0 }
 0x536   : > { %v4091_v17 = vmax.f32 %v5403_v14, 0.0  ;;  %v6048_v20 = vld [vmem:[%s7090_s22 + $0x70] sm:$0xff]  }
 0x537   : > { %v4094_v22 = vpack.c.bf16 %v4090_v59, %v4090_v59  ;;  %5348 = vmatprep.subr.bf16.mxu1 %v6048_v20 }
 0x538   : > { %v4095_v19 = vpack.c.bf16 %v4091_v17, %v4091_v17  ;;  %5349 = vmatpush3.bf16.msra.mxu1 %v6049_v43  ;;  %v4162_v17 = vld [vmem:[%s7091_s12] sm:$0x3] }
 0x539   : > { %5350 = vmatprep.subr.bf16.mxu1 %v6050_v9 }
 0x53a   : > { %4526 = vmatprep.mubr.bf16.mxu0 %v4095_v19  ;;  %v4487_v19 = vrot.slane %v4162_v17, %v6662_v63  ;;  %v4612_v63 = vld [vmem:[%s7092_s11] sm:$0x1] }
 0x53b   : > { %4527 = vmatmul.mubr.bf16.vlgmr.msra.gmra.mrb[4].mxu0 %v4094_v22 }
 0x53c   : > { %4536 = vmatpush1.bf16.msra.mxu0 %v5988_v21  ;;  %5351 = vmatpush3.bf16.msra.mxu1 %v6051_v3  ;;  %v4491_v21 = vrot.slane %v4162_v17, %v6673_v8 }
 0x53d   : > { %4537 = vmatprep.subr.bf16.mxu0 %v5993_v24 }
 0x540   : > { %4538 = vmatpush1.bf16.msra.mxu0 %v5991_v35 }
 0x541   : > { %4539 = vmatprep.subr.bf16.mxu0 %v5996_v51 }
 0x544   : > { %4540 = vmatpush1.bf16.msra.mxu0 %v5994_v31 }
 0x545   : > { %4541 = vmatprep.subr.bf16.mxu0 %v5999_v29 }
 0x548   : > { %4542 = vmatpush1.bf16.msra.mxu0 %v5997_v60 }
 0x549   : > { %4543 = vmatprep.subr.bf16.mxu0 %v6002_v37 }
 0x54c   : > { %4544 = vmatpush1.bf16.msra.mxu0 %v6000_v42 }
 0x54d   : > { %4545 = vmatprep.subr.bf16.mxu0 %v6005_v15 }
 0x550   : > { %4546 = vmatpush1.bf16.msra.mxu0 %v6003_v39 }
 0x551   : > { %4547 = vmatprep.subr.bf16.mxu0 %v6008_v40 }
 0x554   : > { %4548 = vmatpush1.bf16.msra.mxu0 %v6006_v56 }
 0x555   : > { %4549 = vmatprep.subr.bf16.mxu0 %v6011_v45 }
 0x558   : > { %4550 = vmatpush1.bf16.msra.mxu0 %v6009_v47 }
 0x559   : > { %4551 = vmatprep.subr.bf16.mxu0 %v6014_v48 }
 0x55c   : > { %4552 = vmatpush1.bf16.msra.mxu0 %v6012_v49 }
 0x55d   : > { %4553 = vmatprep.subr.bf16.mxu0 %v6017_v50 }
 0x560   : > { %4554 = vmatpush1.bf16.msra.mxu0 %v6015_v53 }
 0x561   : > { %4555 = vmatprep.subr.bf16.mxu0 %v6020_v54 }
 0x564   : > { %4556 = vmatpush1.bf16.msra.mxu0 %v6018_v55 }
 0x565   : > { %4557 = vmatprep.subr.bf16.mxu0 %v6023_v57 }
 0x568   : > { %4558 = vmatpush1.bf16.msra.mxu0 %v6021_v27 }
 0x569   : > { %4559 = vmatprep.subr.bf16.mxu0 %v6026_v32 }
 0x56c   : > { %4560 = vmatpush1.bf16.msra.mxu0 %v6024_v7 }
 0x56d   : > { %4561 = vmatprep.subr.bf16.mxu0 %v6029_v61 }
 0x570   : > { %4562 = vmatpush1.bf16.msra.mxu0 %v6027_v62 }
 0x571   : > { %4563 = vmatprep.subr.bf16.mxu0 %v6032_v33 }
 0x574   : > { %4564 = vmatpush1.bf16.msra.mxu0 %v6030_v52 }
 0x575   : > { %4565 = vmatprep.subr.bf16.mxu0 %v6035_v1 }
 0x578   : > { %4566 = vmatpush1.bf16.msra.mxu0 %v6033_v41 }
 0x5a0   : > { %v4083_v18 = vpop.f32.mrb[4].mxu1 }
 0x5a1   : > { %v5404_v4 = vadd.f32 %v4083_v18, %v3753_v10  ;;  %v4085_v12 = vpop.f32.mrb[5].mxu1 }
 0x5a2   : > { %v5405_v5 = vadd.f32 %v4085_v12, %v3757_v2  ;;  %v4087_v13 = vpop.f32.mrb[6].mxu1 }
 0x5a3   : > { %v4092_v34 = vmax.f32 %v5404_v4, 0.0  ;;  %v4088_v46 = vpop.f32.mrb[7].mxu1 }
 0x5a4   : > { %v4093_v14 = vmax.f32 %v5405_v5, 0.0 }
 0x5a5   : > { %v4096_v59 = vpack.c.bf16 %v4092_v34, %v4092_v34 }
 0x5a6   : > { %v4097_v16 = vpack.c.bf16 %v4093_v14, %v4093_v14 }
 0x5a8   : > { %4567 = vmatprep.mubr.bf16.mxu0 %v4097_v16 }
 0x5a9   : > { %4568 = vmatmul.mubr.bf16.vlgmr.msra.gmra.mrb[4].mxu0 %v4096_v59 }
 0x67c   : > { %v4569_v22 = vpop.f32.mrb[4].mxu0 }
 0x67d   : > { %v5406_v24 = vadd.f32 %v4569_v22, %v4487_v19  ;;  %v4571_v58 = vpop.f32.mrb[5].mxu0 }
 0x67e   : > { %v5407_v23 = vadd.f32 %v4571_v58, %v4491_v21  ;;  %v4573_v25 = vpop.f32.mrb[6].mxu0 }
 0x67f   : > { %v4576_v35 = vmax.f32 %v5406_v24, 0.0  ;;  %v4574_v51 = vpop.f32.mrb[7].mxu0 }
 0x680   : > { %v4577_v26 = vmax.f32 %v5407_v23, 0.0 }
 0x681   : > { %v4578_v31 = vpack.c.bf16 %v4576_v35, %v4576_v35 }
 0x682   : > { %v4579_v28 = vpack.c.bf16 %v4577_v26, %v4577_v26 }
 0x684   : > { %4741 = vmatprep.mubr.bf16.mxu1 %v4579_v28 }
 0x685   : > { %4742 = vmatmul.mubr.bf16.vlgmr.msra.gmra.mrb[8].mxu1 %v4578_v31 }
 0x758   : > { %v5352_v29 = vpop.f32.mrb[8].mxu1 }
 0x759   : > { %v5353_v30 = vpop.f32.mrb[9].mxu1 }
 0x75a   : > { %v5354_v8 = vadd.f32 %v5353_v30, %v5352_v29  ;;  %v5355_v36 = vpop.f32.mrb[10].mxu1 }
 0x75b   : > { %v5356_v60 = vpop.f32.mrb[11].mxu1 }
 0x75c   : > { %v4744_v37 = vadd.f32 %v5354_v8, %v4612_v63 }
 0x75e   : > { %4749 = vst [vmem:[%s6490_s17] sm:$0x1] %v4744_v37 }
 0x75f PF: > { %s7093_s23 = sld [smem:[#allocation19_spill]]  ;;  %s5312_s20 = sshll.u32 %s6227_s29, 4 }
 0x760   : > { %s7094_s15 = sld [smem:[#allocation26_spill]]  ;;  %s4763_s14 = sshll.u32 %s6490_s17, 4  ;;  %s4764_s14 = int_to_ptr.vmem [resolvable:$true] %s4763_s14 }
 0x761   : > { %s4751_s28 = scalar_lea.sflag [#allocation5], %s498_s30  ;;  %s6137_s16 = scalar_lea.vmem %s4764_s14, 16 }
 0x762   : > { %p6138_p1 = scmp.ne.s32.totalorder %s4764_s14, %s6137_s16  ;;  %s6253_s19 = smov [#allocation9]  }
 0x763   : > { %s6141_s25 = sshll.u32 %s6253_s19, 4  ;;  %s6142_s25 = int_to_ptr.vmem [resolvable:$false] %s6141_s25 }
 0x764   : > { %s6143_s12 = scalar_lea.vmem %s6142_s25, 32  ;;  %p6144_p7 = scmp.lt.s32.totalorder %s4764_s14, %s6142_s25 }
 0x765   : > { %p7096_p4 = scmp.ne.s32.totalorder %s7093_s23, 0  ;;  %p6145_p8 = scmp.lt.s32.totalorder %s6143_s12, %s6137_s16 }
 0x766   : > { %s7095_s24 = smov %s7094_s15  ;;  %s6988_s18 = scalar_lea.hbm %s7094_s15, %s5312_s20 }
 0x767   : > { %p6139_p5 = pnand %p6138_p1, %p7096_p4  ;;  %p6146_p11 = por %p6145_p8, %p6144_p7 }
 0x769   : > { %p6140_p6 = pneg %p6139_p5 }
 0x76b   : > { %p6147_p12 = pnand %p6146_p11, %p6140_p6 }
 0x76d   : > { %6150 = shalt.err (!%p6147_p12)
}
 0x76e   : > { %s6151_s29 = scalar_lea.hbm %s6988_s18, 16  ;;  %s6155_s13 = scalar_lea.hbm %s7095_s24, 32 }
 0x76f   : > { %p6152_p3 = scmp.ne.s32.totalorder %s6988_s18, %s6151_s29  ;;  %p6156_p2 = scmp.lt.u32.totalorder %s6988_s18, %s7095_s24 }
 0x770   : > { %p6157_p10 = scmp.lt.u32.totalorder %s6155_s13, %s6151_s29  ;;  %p6159_p1 = scmp.lt.u32.totalorder %s6151_s29, %s6988_s18 }
 0x771   : > { %p6153_p9 = pnand %p6152_p3, %p7096_p4 }
 0x772   : > { %p6158_p13 = por %p6157_p10, %p6156_p2 }
 0x773   : > { %p6154_p0 = pneg %p6153_p9 }
 0x774   : > { %p6160_p5 = por %p6159_p1, %p6158_p13 }
 0x776   : > { %p6161_p6 = pnand %p6160_p5, %p6154_p0 }
 0x778   : > { %6164 = shalt.err (!%p6161_p6)
}
 0x779   : > { %5445 = dma.vmem_to_hbm [thread:$0]  (%p7096_p4), %s4764_s14, 16, %s6988_s18, %s4751_s28  }
 0x77a PF: > { %s7097_s20 = sld [smem:[#allocation17_spill]]  ;;  %s7098_s27 = sld [smem:[#allocation13_spill]] }
 0x77b   : > { %s7099_s21 = sld [smem:[#allocation21_spill]] }
 0x780   : > { %p5467_p7 = scmp.ge.s32.totalorder %s7097_s20, 2  ;;  %s4775_s15 = sand.u32 1, %s7098_s27  }
 0x781   : > { %p7100_p8 = scmp.ne.s32.totalorder %s7099_s21, 0  ;;  %s4776_s16 = scalar_lea.sflag [#allocation5], %s4775_s15 }
 0x783   : > { %p5458_p11 = pnand %p5467_p7, %p7100_p8 }
 0x785   : > { %6206 = dma.done.wait (!%p5458_p11), %s4776_s16, 16  }
 0x786   : > { %6208 = vsyncadd (!%p5458_p11), %s4776_s16, 4294967280  ;;  %s28_s15 = sadd.s32 1, %s7097_s20   ;;  %s7101_s19 = sld [smem:[#allocation14_spill]] }
 0x787   : > { %p25_p12 = scmp.ge.s32.totalorder %s28_s15, 6   ;;  %s7102_s27 = sld [smem:[#allocation22_spill]] }
 0x788   : > { %s7103_s28 = sld [smem:[#allocation15_spill]]  ;;  %s7104_s29 = sld [smem:[#allocation16_spill]] }
 0x789   : > { %s7105_s30 = sld [smem:[#allocation18_spill]]  ;;  %s7106_s14 = sld [smem:[#allocation20_spill]] }
 0x78a   : > { %s7107_s25 = smov %s6215_s26  ;;  %27 = sbr.rel (!%p25_p12) target bundleno = 12 (0xc), region = 128 }
 0x78c   : > { %s7108_s26 = smov %s7101_s19 }
 0x791   :  { %4780 = vsyncpa [#allocation4], 1 }
 0x792   :  { %4782 = vsyncpa [#allocation4 + $0x1], 1 }
 0x793   :  { %4783 = vsyncpa [#allocation7], 1 }
 0x794   :  { %4784 = vsyncpa [#allocation5], 1 }
 0x795   :  { %4786 = vsyncpa [#allocation5 + $0x1], 1 }

</bundles_post_ra>
